<compile_context>
chip_gen: v6e
topology: v6e:2x2x1
jax: 0.10.0
libtpu: 0.0.40
codegen_flags: <defaults>
</compile_context>

<pallas_src>
import jax
import jax.numpy as jnp
from jax import lax
from jax.experimental import pallas as pl
from jax.experimental.pallas import tpu as pltpu


def _caption_encoder_kernel(len_ref, emb_ref, wx_ref, wh_ref, b_ref, wa_ref,
                            ba_ref, hs_ref, ms_ref, fh_ref, mask_ref):
    # len_ref : (tB, 1)  int32   per-row caption length
    # emb_ref : (T, tB, E)        time-major embeddings
    # wx_ref  : (E, 4H)           x2h weight, pre-transposed
    # wh_ref  : (H, 4H)           h2h weight, pre-transposed
    # b_ref   : (1, 4H)           x2h.bias + h2h.bias
    # wa_ref  : (H, H)            affine_hn weight, pre-transposed
    # ba_ref  : (1, H)            affine_hn bias
    # hs_ref  : (T, tB, H)        hidden_states (time-major)
    # ms_ref  : (T, tB, H)        memory_states (time-major)
    # fh_ref  : (tB, H)           tanh(affine(final hidden))
    # mask_ref: (tB, T)           (memory_states.sum(-1) != 0) as float
    T, tB, _E = emb_ref.shape
    H = wh_ref.shape[0]

    lengths = len_ref[...]                                   # (tB, 1) int32
    wx = wx_ref[...]                                         # (E, 4H)
    wh = wh_ref[...]                                         # (H, 4H)
    bias = b_ref[...]                                        # (1, 4H)
    col_ids = lax.broadcasted_iota(jnp.int32, (tB, T), 1)    # hoisted out of loop

    def step(t, carry):
        h, c, fh, mask_acc = carry
        x_t = emb_ref[t]                                     # (tB, E)
        gates = (jnp.dot(x_t, wx, preferred_element_type=jnp.float32)
                 + jnp.dot(h, wh, preferred_element_type=jnp.float32)
                 + bias)                                     # (tB, 4H)
        # Gate order matches gates.chunk(4, 1): in, forget, new_memory, out.
        i_g = jax.nn.sigmoid(gates[:, 0 * H:1 * H])
        f_g = jax.nn.sigmoid(gates[:, 1 * H:2 * H])
        g_g = jnp.tanh(gates[:, 2 * H:3 * H])
        o_g = jax.nn.sigmoid(gates[:, 3 * H:4 * H])
        c_new = f_g * c + i_g * g_g
        h_new = o_g * jnp.tanh(c_new)

        valid = t < lengths                                  # (tB, 1) bool
        h = jnp.where(valid, h_new, h)
        c = jnp.where(valid, c_new, c)
        fh = jnp.where(valid, h_new, fh)

        hs_ref[t] = jnp.where(valid, h_new, 0.0)             # leading-axis store
        ms_ref[t] = jnp.where(valid, c_new, 0.0)

        m_t = jnp.logical_and(
            valid, jnp.sum(c_new, axis=-1, keepdims=True) != 0.0)   # (tB, 1)
        mask_acc = jnp.where(col_ids == t, m_t.astype(mask_acc.dtype), mask_acc)
        return h, c, fh, mask_acc

    zeros = jnp.zeros((tB, H), jnp.float32)
    init = (zeros, zeros, zeros, jnp.zeros((tB, T), jnp.float32))
    h, c, fh, mask_acc = lax.fori_loop(0, T, step, init, unroll=True)

    fh_ref[...] = jnp.tanh(
        jnp.dot(fh, wa_ref[...], preferred_element_type=jnp.float32) + ba_ref[...])
    mask_ref[...] = mask_acc


def caption_encoder_forward(params, seq, seq_len, *, block_b=8):
    """Pallas forward of CaptionEncoderC.

    seq: (B, T) int32 token ids; seq_len: (B,) or (B, 1) int32 lengths.
    Returns (hidden_states (B,T,H), memory_states (B,T,H),
             final_hidden (B,H), mask (B,T)) -- same as the PyTorch module.
    """
    seq = jnp.asarray(seq, jnp.int32)
    B, T = seq.shape
    seq_len = jnp.asarray(seq_len, jnp.int32).reshape(B, 1)

    embed = params["embed"]                                  # (V, E)
    wx, wh, b = params["wx"], params["wh"], params["b"]
    wa, ba = params["wa"], params["ba"]
    E = embed.shape[1]
    H = wh.shape[0]

    tB = min(block_b, B)
    Bp = ((B + tB - 1) // tB) * tB                           # pad batch to tile
    if Bp != B:
        seq = jnp.pad(seq, ((0, Bp - B), (0, 0)))
        seq_len = jnp.pad(seq_len, ((0, Bp - B), (0, 0)))    # padded rows: len 0

    # Embedding gather directly into time-major layout (no extra transpose pass).
    emb_tm = embed[seq.T]                                    # (T, Bp, E)

    out_shape = (
        jax.ShapeDtypeStruct((T, Bp, H), jnp.float32),       # hidden_states (tm)
        jax.ShapeDtypeStruct((T, Bp, H), jnp.float32),       # memory_states (tm)
        jax.ShapeDtypeStruct((Bp, H), jnp.float32),          # final_hidden
        jax.ShapeDtypeStruct((Bp, T), jnp.float32),          # mask
    )

    hs_tm, ms_tm, fh, mask = pl.pallas_call(
        _caption_encoder_kernel,
        out_shape=out_shape,
        grid_spec=pltpu.PrefetchScalarGridSpec(
            num_scalar_prefetch=0,
            grid=(Bp // tB,),
            in_specs=[
                pl.BlockSpec((tB, 1), lambda i: (i, 0)),          # lengths
                pl.BlockSpec((T, tB, E), lambda i: (0, i, 0)),    # embeddings
                pl.BlockSpec((E, 4 * H), lambda i: (0, 0)),       # wx^T
                pl.BlockSpec((H, 4 * H), lambda i: (0, 0)),       # wh^T
                pl.BlockSpec((1, 4 * H), lambda i: (0, 0)),       # bias
                pl.BlockSpec((H, H), lambda i: (0, 0)),           # wa^T
                pl.BlockSpec((1, H), lambda i: (0, 0)),           # ba
            ],
            out_specs=(
                pl.BlockSpec((T, tB, H), lambda i: (0, i, 0)),
                pl.BlockSpec((T, tB, H), lambda i: (0, i, 0)),
                pl.BlockSpec((tB, H), lambda i: (i, 0)),
                pl.BlockSpec((tB, T), lambda i: (i, 0)),
            ),
        ),
        compiler_params=pltpu.CompilerParams(
            dimension_semantics=("parallel",)),
    )(seq_len, emb_tm, wx, wh, b, wa, ba)

    hidden_states = jnp.transpose(hs_tm, (1, 0, 2))[:B]
    memory_states = jnp.transpose(ms_tm, (1, 0, 2))[:B]
    return hidden_states, memory_states, fh[:B], mask[:B]


def _ref_forward(params, seq, seq_len):
    """Plain-JAX reference mirroring the PyTorch forward semantics."""
    embed, wx, wh, b = params["embed"], params["wx"], params["wh"], params["b"]
    wa, ba = params["wa"], params["ba"]
    B, T = seq.shape
    H = wh.shape[0]
    emb = embed[seq]                                         # (B, T, E)
    lengths = jnp.asarray(seq_len, jnp.int32).reshape(B, 1)
    h = jnp.zeros((B, H), jnp.float32)
    c = jnp.zeros((B, H), jnp.float32)
    fh = jnp.zeros((B, H), jnp.float32)
    hs = jnp.zeros((B, T, H), jnp.float32)
    ms = jnp.zeros((B, T, H), jnp.float32)
    for t in range(T):
        gates = emb[:, t, :] @ wx + h @ wh + b
        i_g = jax.nn.sigmoid(gates[:, :H])
        f_g = jax.nn.sigmoid(gates[:, H:2 * H])
        g_g = jnp.tanh(gates[:, 2 * H:3 * H])
        o_g = jax.nn.sigmoid(gates[:, 3 * H:])
        c_new = f_g * c + i_g * g_g
        h_new = o_g * jnp.tanh(c_new)
        valid = t < lengths
        h = jnp.where(valid, h_new, h)
        c = jnp.where(valid, c_new, c)
        fh = jnp.where(valid, h_new, fh)
        hs = hs.at[:, t, :].set(jnp.where(valid, h_new, 0.0))
        ms = ms.at[:, t, :].set(jnp.where(valid, c_new, 0.0))
    mask = (jnp.sum(ms, axis=2) != 0).astype(jnp.float32)
    final = jnp.tanh(fh @ wa + ba)
    return hs, ms, final, mask


if __name__ == "__main__":
    # Small demo shapes: vocab=50, emb_dim=32, enc_hid_dim=128 (lane-dense),
    # batch=16 (-> 2 grid steps with tB=8), max caption length T=8.
    B, T, V, E, H = 16, 8, 50, 32, 128
    key = jax.random.PRNGKey(0)
    ks = jax.random.split(key, 8)
    std = 1.0 / (H ** 0.5)
    params = {
        "embed": jax.random.normal(ks[0], (V, E), jnp.float32),
        "wx": jax.random.uniform(ks[1], (E, 4 * H), jnp.float32, -std, std),
        "wh": jax.random.uniform(ks[2], (H, 4 * H), jnp.float32, -std, std),
        "b": (jax.random.uniform(ks[3], (1, 4 * H), jnp.float32, -std, std)
              + jax.random.uniform(ks[4], (1, 4 * H), jnp.float32, -std, std)),
        "wa": jax.random.uniform(ks[5], (H, H), jnp.float32, -std, std),
        "ba": jax.random.uniform(ks[6], (1, H), jnp.float32, -std, std),
    }
    seq = jax.random.randint(ks[7], (B, T), 0, V, dtype=jnp.int32)
    seq_len = jax.random.randint(jax.random.PRNGKey(1), (B, 1), 1, T + 1,
                                 dtype=jnp.int32)

    outs = jax.block_until_ready(
        caption_encoder_forward(params, seq, seq_len, block_b=8))
    refs = _ref_forward(params, seq, seq_len)

    names = ("hidden_states", "memory_states", "final_hidden", "mask")
    for name, o, r in zip(names, outs, refs):
        assert o.shape == r.shape, (name, o.shape, r.shape)
        err = float(jnp.max(jnp.abs(o - r)))
        assert jnp.allclose(o, r, atol=2e-3, rtol=2e-3), (name, err)

    print("KERNEL_OK")
</pallas_src>

<mosaic_0001>
module attributes {stable_mosaic.version = 11 : i64} {
  func.func @_caption_encoder_kernel(%arg0: i32, %arg1: memref<8x1xi32, #tpu.memory_space<vmem>>, %arg2: memref<8x8x32xf32, #tpu.memory_space<vmem>>, %arg3: memref<32x512xf32, #tpu.memory_space<vmem>>, %arg4: memref<128x512xf32, #tpu.memory_space<vmem>>, %arg5: memref<1x512xf32, #tpu.memory_space<vmem>>, %arg6: memref<128x128xf32, #tpu.memory_space<vmem>>, %arg7: memref<1x128xf32, #tpu.memory_space<vmem>>, %arg8: memref<8x8x128xf32, #tpu.memory_space<vmem>>, %arg9: memref<8x8x128xf32, #tpu.memory_space<vmem>>, %arg10: memref<8x128xf32, #tpu.memory_space<vmem>>, %arg11: memref<8x8xf32, #tpu.memory_space<vmem>>) attributes {dimension_semantics = [#tpu.dimension_semantics<parallel>], iteration_bounds = array<i64: 2>, scalar_prefetch = 0 : i64, scratch_operands = 0 : i64, tpu.core_type = #tpu.core_type<tc>, window_params = [{transform_indices = @transform_0, window_bounds = array<i64: 8, 1>}, {transform_indices = @transform_1, window_bounds = array<i64: 8, 8, 32>}, {pipeline_mode = #tpu.pipeline_mode<synchronous>, transform_indices = @transform_2, window_bounds = array<i64: 32, 512>}, {pipeline_mode = #tpu.pipeline_mode<synchronous>, transform_indices = @transform_3, window_bounds = array<i64: 128, 512>}, {pipeline_mode = #tpu.pipeline_mode<synchronous>, transform_indices = @transform_4, window_bounds = array<i64: 1, 512>}, {pipeline_mode = #tpu.pipeline_mode<synchronous>, transform_indices = @transform_5, window_bounds = array<i64: 128, 128>}, {pipeline_mode = #tpu.pipeline_mode<synchronous>, transform_indices = @transform_6, window_bounds = array<i64: 1, 128>}, {transform_indices = @transform_7, window_bounds = array<i64: 8, 8, 128>}, {transform_indices = @transform_8, window_bounds = array<i64: 8, 8, 128>}, {transform_indices = @transform_9, window_bounds = array<i64: 8, 128>}, {transform_indices = @transform_10, window_bounds = array<i64: 8, 8>}]} {
    %c0 = arith.constant 0 : index
    %c0_0 = arith.constant 0 : index
    %0 = vector.load %arg1[%c0, %c0_0] : memref<8x1xi32, #tpu.memory_space<vmem>>, vector<8x1xi32>
    %c0_1 = arith.constant 0 : index
    %c0_2 = arith.constant 0 : index
    %1 = vector.load %arg3[%c0_1, %c0_2] : memref<32x512xf32, #tpu.memory_space<vmem>>, vector<32x512xf32>
    %c0_3 = arith.constant 0 : index
    %c0_4 = arith.constant 0 : index
    %2 = vector.load %arg4[%c0_3, %c0_4] : memref<128x512xf32, #tpu.memory_space<vmem>>, vector<128x512xf32>
    %c0_5 = arith.constant 0 : index
    %c0_6 = arith.constant 0 : index
    %3 = vector.load %arg5[%c0_5, %c0_6] : memref<1x512xf32, #tpu.memory_space<vmem>>, vector<1x512xf32>
    %4 = tpu.iota {dimensions = array<i32: 1>} : vector<8x8xi32>
    %cst = arith.constant 0.000000e+00 : f32
    %5 = vector.broadcast %cst : f32 to vector<8x128xf32>
    %cst_7 = arith.constant 0.000000e+00 : f32
    %6 = vector.broadcast %cst_7 : f32 to vector<8x8xf32>
    %c0_i32 = arith.constant 0 : i32
    %7 = arith.index_cast %c0_i32 : i32 to index
    %c0_8 = arith.constant 0 : index
    %c0_9 = arith.constant 0 : index
    %8 = vector.load %arg2[%7, %c0_8, %c0_9] : memref<8x8x32xf32, #tpu.memory_space<vmem>>, vector<1x8x32xf32>
    %9 = vector.shape_cast %8 : vector<1x8x32xf32> to vector<8x32xf32>
    %cst_10 = arith.constant dense<0.000000e+00> : vector<8x512xf32>
    %10 = tpu.matmul %9, %1, %cst_10 {dimension_numbers = #tpu.dot_dimension_numbers<[1], [0], [0], [1], [0, 0, 1, 1], [], []>} : vector<8x32xf32>, vector<32x512xf32>, vector<8x512xf32> -> vector<8x512xf32>
    %cst_11 = arith.constant dense<0.000000e+00> : vector<8x512xf32>
    %11 = tpu.matmul %5, %2, %cst_11 {dimension_numbers = #tpu.dot_dimension_numbers<[1], [0], [0], [1], [0, 0, 1, 1], [], []>} : vector<8x128xf32>, vector<128x512xf32>, vector<8x512xf32> -> vector<8x512xf32>
    %12 = arith.addf %10, %11 : vector<8x512xf32>
    %13 = vector.broadcast %3 : vector<1x512xf32> to vector<8x512xf32>
    %14 = arith.addf %12, %13 : vector<8x512xf32>
    %15 = vector.extract_strided_slice %14 {offsets = [0, 0], sizes = [8, 128], strides = [1, 1]} : vector<8x512xf32> to vector<8x128xf32>
    %16 = arith.negf %15 : vector<8x128xf32>
    %17 = math.exp %16 : vector<8x128xf32>
    %cst_12 = arith.constant 1.000000e+00 : f32
    %18 = vector.broadcast %cst_12 : f32 to vector<8x128xf32>
    %19 = arith.addf %18, %17 : vector<8x128xf32>
    %20 = arith.divf %18, %19 : vector<8x128xf32>
    %21 = vector.extract_strided_slice %14 {offsets = [0, 128], sizes = [8, 128], strides = [1, 1]} : vector<8x512xf32> to vector<8x128xf32>
    %22 = arith.negf %21 : vector<8x128xf32>
    %23 = math.exp %22 : vector<8x128xf32>
    %cst_13 = arith.constant 1.000000e+00 : f32
    %24 = vector.broadcast %cst_13 : f32 to vector<8x128xf32>
    %25 = arith.addf %24, %23 : vector<8x128xf32>
    %26 = arith.divf %24, %25 : vector<8x128xf32>
    %27 = vector.extract_strided_slice %14 {offsets = [0, 256], sizes = [8, 128], strides = [1, 1]} : vector<8x512xf32> to vector<8x128xf32>
    %28 = math.tanh %27 : vector<8x128xf32>
    %29 = vector.extract_strided_slice %14 {offsets = [0, 384], sizes = [8, 128], strides = [1, 1]} : vector<8x512xf32> to vector<8x128xf32>
    %30 = arith.negf %29 : vector<8x128xf32>
    %31 = math.exp %30 : vector<8x128xf32>
    %cst_14 = arith.constant 1.000000e+00 : f32
    %32 = vector.broadcast %cst_14 : f32 to vector<8x128xf32>
    %33 = arith.addf %32, %31 : vector<8x128xf32>
    %34 = arith.divf %32, %33 : vector<8x128xf32>
    %35 = arith.mulf %26, %5 : vector<8x128xf32>
    %36 = arith.mulf %20, %28 : vector<8x128xf32>
    %37 = arith.addf %35, %36 : vector<8x128xf32>
    %38 = math.tanh %37 : vector<8x128xf32>
    %39 = arith.mulf %34, %38 : vector<8x128xf32>
    %40 = vector.broadcast %c0_i32 : i32 to vector<8x1xi32>
    %41 = arith.cmpi slt, %40, %0 : vector<8x1xi32>
    %42 = vector.shape_cast %41 : vector<8x1xi1> to vector<8x1xi1>
    %43 = vector.broadcast %42 : vector<8x1xi1> to vector<8x128xi1>
    %44 = arith.select %43, %39, %5 : vector<8x128xi1>, vector<8x128xf32>
    %45 = vector.shape_cast %41 : vector<8x1xi1> to vector<8x1xi1>
    %46 = vector.broadcast %45 : vector<8x1xi1> to vector<8x128xi1>
    %47 = arith.select %46, %37, %5 : vector<8x128xi1>, vector<8x128xf32>
    %48 = vector.shape_cast %41 : vector<8x1xi1> to vector<8x1xi1>
    %49 = vector.broadcast %48 : vector<8x1xi1> to vector<8x128xi1>
    %50 = arith.select %49, %39, %5 : vector<8x128xi1>, vector<8x128xf32>
    %cst_15 = arith.constant 0.000000e+00 : f32
    %51 = vector.shape_cast %41 : vector<8x1xi1> to vector<8x1xi1>
    %52 = vector.broadcast %51 : vector<8x1xi1> to vector<8x128xi1>
    %53 = vector.broadcast %cst_15 : f32 to vector<8x128xf32>
    %54 = arith.select %52, %39, %53 : vector<8x128xi1>, vector<8x128xf32>
    %55 = arith.index_cast %c0_i32 : i32 to index
    %c0_16 = arith.constant 0 : index
    %c0_17 = arith.constant 0 : index
    %56 = vector.load %arg8[%55, %c0_16, %c0_17] : memref<8x8x128xf32, #tpu.memory_space<vmem>>, vector<1x8x128xf32>
    %57 = vector.shape_cast %56 : vector<1x8x128xf32> to vector<8x128xf32>
    %58 = vector.shape_cast %54 : vector<8x128xf32> to vector<1x8x128xf32>
    tpu.vector_store %arg8[%55, %c0_16, %c0_17], %58 {strides = array<i32>} : memref<8x8x128xf32, #tpu.memory_space<vmem>>, vector<1x8x128xf32>,
    %cst_18 = arith.constant 0.000000e+00 : f32
    %59 = vector.shape_cast %41 : vector<8x1xi1> to vector<8x1xi1>
    %60 = vector.broadcast %59 : vector<8x1xi1> to vector<8x128xi1>
    %61 = vector.broadcast %cst_18 : f32 to vector<8x128xf32>
    %62 = arith.select %60, %37, %61 : vector<8x128xi1>, vector<8x128xf32>
    %63 = arith.index_cast %c0_i32 : i32 to index
    %c0_19 = arith.constant 0 : index
    %c0_20 = arith.constant 0 : index
    %64 = vector.load %arg9[%63, %c0_19, %c0_20] : memref<8x8x128xf32, #tpu.memory_space<vmem>>, vector<1x8x128xf32>
    %65 = vector.shape_cast %64 : vector<1x8x128xf32> to vector<8x128xf32>
    %66 = vector.shape_cast %62 : vector<8x128xf32> to vector<1x8x128xf32>
    tpu.vector_store %arg9[%63, %c0_19, %c0_20], %66 {strides = array<i32>} : memref<8x8x128xf32, #tpu.memory_space<vmem>>, vector<1x8x128xf32>,
    %cst_21 = arith.constant dense<0.000000e+00> : vector<8xf32>
    %67 = vector.multi_reduction <add>, %37, %cst_21 [1] : vector<8x128xf32> to vector<8xf32>
    %68 = vector.shape_cast %67 : vector<8xf32> to vector<8x1xf32>
    %cst_22 = arith.constant 0.000000e+00 : f32
    %69 = vector.broadcast %cst_22 : f32 to vector<8x1xf32>
    %70 = arith.cmpf one, %68, %69 : vector<8x1xf32>
    %71 = arith.andi %41, %70 : vector<8x1xi1>
    %72 = vector.broadcast %c0_i32 : i32 to vector<8x8xi32>
    %73 = arith.cmpi eq, %4, %72 : vector<8x8xi32>
    %74 = arith.extui %71 : vector<8x1xi1> to vector<8x1xi32>
    %75 = arith.sitofp %74 : vector<8x1xi32> to vector<8x1xf32>
    %76 = vector.shape_cast %75 : vector<8x1xf32> to vector<8x1xf32>
    %77 = vector.broadcast %76 : vector<8x1xf32> to vector<8x8xf32>
    %78 = arith.select %73, %77, %6 : vector<8x8xi1>, vector<8x8xf32>
    %c1_i32 = arith.constant 1 : i32
    %79 = arith.index_cast %c1_i32 : i32 to index
    %c0_23 = arith.constant 0 : index
    %c0_24 = arith.constant 0 : index
    %80 = vector.load %arg2[%79, %c0_23, %c0_24] : memref<8x8x32xf32, #tpu.memory_space<vmem>>, vector<1x8x32xf32>
    %81 = vector.shape_cast %80 : vector<1x8x32xf32> to vector<8x32xf32>
    %cst_25 = arith.constant dense<0.000000e+00> : vector<8x512xf32>
    %82 = tpu.matmul %81, %1, %cst_25 {dimension_numbers = #tpu.dot_dimension_numbers<[1], [0], [0], [1], [0, 0, 1, 1], [], []>} : vector<8x32xf32>, vector<32x512xf32>, vector<8x512xf32> -> vector<8x512xf32>
    %cst_26 = arith.constant dense<0.000000e+00> : vector<8x512xf32>
    %83 = tpu.matmul %44, %2, %cst_26 {dimension_numbers = #tpu.dot_dimension_numbers<[1], [0], [0], [1], [0, 0, 1, 1], [], []>} : vector<8x128xf32>, vector<128x512xf32>, vector<8x512xf32> -> vector<8x512xf32>
    %84 = arith.addf %82, %83 : vector<8x512xf32>
    %85 = vector.broadcast %3 : vector<1x512xf32> to vector<8x512xf32>
    %86 = arith.addf %84, %85 : vector<8x512xf32>
    %87 = vector.extract_strided_slice %86 {offsets = [0, 0], sizes = [8, 128], strides = [1, 1]} : vector<8x512xf32> to vector<8x128xf32>
    %88 = arith.negf %87 : vector<8x128xf32>
    %89 = math.exp %88 : vector<8x128xf32>
    %cst_27 = arith.constant 1.000000e+00 : f32
    %90 = vector.broadcast %cst_27 : f32 to vector<8x128xf32>
    %91 = arith.addf %90, %89 : vector<8x128xf32>
    %92 = arith.divf %90, %91 : vector<8x128xf32>
    %93 = vector.extract_strided_slice %86 {offsets = [0, 128], sizes = [8, 128], strides = [1, 1]} : vector<8x512xf32> to vector<8x128xf32>
    %94 = arith.negf %93 : vector<8x128xf32>
    %95 = math.exp %94 : vector<8x128xf32>
    %cst_28 = arith.constant 1.000000e+00 : f32
    %96 = vector.broadcast %cst_28 : f32 to vector<8x128xf32>
    %97 = arith.addf %96, %95 : vector<8x128xf32>
    %98 = arith.divf %96, %97 : vector<8x128xf32>
    %99 = vector.extract_strided_slice %86 {offsets = [0, 256], sizes = [8, 128], strides = [1, 1]} : vector<8x512xf32> to vector<8x128xf32>
    %100 = math.tanh %99 : vector<8x128xf32>
    %101 = vector.extract_strided_slice %86 {offsets = [0, 384], sizes = [8, 128], strides = [1, 1]} : vector<8x512xf32> to vector<8x128xf32>
    %102 = arith.negf %101 : vector<8x128xf32>
    %103 = math.exp %102 : vector<8x128xf32>
    %cst_29 = arith.constant 1.000000e+00 : f32
    %104 = vector.broadcast %cst_29 : f32 to vector<8x128xf32>
    %105 = arith.addf %104, %103 : vector<8x128xf32>
    %106 = arith.divf %104, %105 : vector<8x128xf32>
    %107 = arith.mulf %98, %47 : vector<8x128xf32>
    %108 = arith.mulf %92, %100 : vector<8x128xf32>
    %109 = arith.addf %107, %108 : vector<8x128xf32>
    %110 = math.tanh %109 : vector<8x128xf32>
    %111 = arith.mulf %106, %110 : vector<8x128xf32>
    %112 = vector.broadcast %c1_i32 : i32 to vector<8x1xi32>
    %113 = arith.cmpi slt, %112, %0 : vector<8x1xi32>
    %114 = vector.shape_cast %113 : vector<8x1xi1> to vector<8x1xi1>
    %115 = vector.broadcast %114 : vector<8x1xi1> to vector<8x128xi1>
    %116 = arith.select %115, %111, %44 : vector<8x128xi1>, vector<8x128xf32>
    %117 = vector.shape_cast %113 : vector<8x1xi1> to vector<8x1xi1>
    %118 = vector.broadcast %117 : vector<8x1xi1> to vector<8x128xi1>
    %119 = arith.select %118, %109, %47 : vector<8x128xi1>, vector<8x128xf32>
    %120 = vector.shape_cast %113 : vector<8x1xi1> to vector<8x1xi1>
    %121 = vector.broadcast %120 : vector<8x1xi1> to vector<8x128xi1>
    %122 = arith.select %121, %111, %50 : vector<8x128xi1>, vector<8x128xf32>
    %cst_30 = arith.constant 0.000000e+00 : f32
    %123 = vector.shape_cast %113 : vector<8x1xi1> to vector<8x1xi1>
    %124 = vector.broadcast %123 : vector<8x1xi1> to vector<8x128xi1>
    %125 = vector.broadcast %cst_30 : f32 to vector<8x128xf32>
    %126 = arith.select %124, %111, %125 : vector<8x128xi1>, vector<8x128xf32>
    %127 = arith.index_cast %c1_i32 : i32 to index
    %c0_31 = arith.constant 0 : index
    %c0_32 = arith.constant 0 : index
    %128 = vector.load %arg8[%127, %c0_31, %c0_32] : memref<8x8x128xf32, #tpu.memory_space<vmem>>, vector<1x8x128xf32>
    %129 = vector.shape_cast %128 : vector<1x8x128xf32> to vector<8x128xf32>
    %130 = vector.shape_cast %126 : vector<8x128xf32> to vector<1x8x128xf32>
    tpu.vector_store %arg8[%127, %c0_31, %c0_32], %130 {strides = array<i32>} : memref<8x8x128xf32, #tpu.memory_space<vmem>>, vector<1x8x128xf32>,
    %cst_33 = arith.constant 0.000000e+00 : f32
    %131 = vector.shape_cast %113 : vector<8x1xi1> to vector<8x1xi1>
    %132 = vector.broadcast %131 : vector<8x1xi1> to vector<8x128xi1>
    %133 = vector.broadcast %cst_33 : f32 to vector<8x128xf32>
    %134 = arith.select %132, %109, %133 : vector<8x128xi1>, vector<8x128xf32>
    %135 = arith.index_cast %c1_i32 : i32 to index
    %c0_34 = arith.constant 0 : index
    %c0_35 = arith.constant 0 : index
    %136 = vector.load %arg9[%135, %c0_34, %c0_35] : memref<8x8x128xf32, #tpu.memory_space<vmem>>, vector<1x8x128xf32>
    %137 = vector.shape_cast %136 : vector<1x8x128xf32> to vector<8x128xf32>
    %138 = vector.shape_cast %134 : vector<8x128xf32> to vector<1x8x128xf32>
    tpu.vector_store %arg9[%135, %c0_34, %c0_35], %138 {strides = array<i32>} : memref<8x8x128xf32, #tpu.memory_space<vmem>>, vector<1x8x128xf32>,
    %cst_36 = arith.constant dense<0.000000e+00> : vector<8xf32>
    %139 = vector.multi_reduction <add>, %109, %cst_36 [1] : vector<8x128xf32> to vector<8xf32>
    %140 = vector.shape_cast %139 : vector<8xf32> to vector<8x1xf32>
    %cst_37 = arith.constant 0.000000e+00 : f32
    %141 = vector.broadcast %cst_37 : f32 to vector<8x1xf32>
    %142 = arith.cmpf one, %140, %141 : vector<8x1xf32>
    %143 = arith.andi %113, %142 : vector<8x1xi1>
    %144 = vector.broadcast %c1_i32 : i32 to vector<8x8xi32>
    %145 = arith.cmpi eq, %4, %144 : vector<8x8xi32>
    %146 = arith.extui %143 : vector<8x1xi1> to vector<8x1xi32>
    %147 = arith.sitofp %146 : vector<8x1xi32> to vector<8x1xf32>
    %148 = vector.shape_cast %147 : vector<8x1xf32> to vector<8x1xf32>
    %149 = vector.broadcast %148 : vector<8x1xf32> to vector<8x8xf32>
    %150 = arith.select %145, %149, %78 : vector<8x8xi1>, vector<8x8xf32>
    %c2_i32 = arith.constant 2 : i32
    %151 = arith.index_cast %c2_i32 : i32 to index
    %c0_38 = arith.constant 0 : index
    %c0_39 = arith.constant 0 : index
    %152 = vector.load %arg2[%151, %c0_38, %c0_39] : memref<8x8x32xf32, #tpu.memory_space<vmem>>, vector<1x8x32xf32>
    %153 = vector.shape_cast %152 : vector<1x8x32xf32> to vector<8x32xf32>
    %cst_40 = arith.constant dense<0.000000e+00> : vector<8x512xf32>
    %154 = tpu.matmul %153, %1, %cst_40 {dimension_numbers = #tpu.dot_dimension_numbers<[1], [0], [0], [1], [0, 0, 1, 1], [], []>} : vector<8x32xf32>, vector<32x512xf32>, vector<8x512xf32> -> vector<8x512xf32>
    %cst_41 = arith.constant dense<0.000000e+00> : vector<8x512xf32>
    %155 = tpu.matmul %116, %2, %cst_41 {dimension_numbers = #tpu.dot_dimension_numbers<[1], [0], [0], [1], [0, 0, 1, 1], [], []>} : vector<8x128xf32>, vector<128x512xf32>, vector<8x512xf32> -> vector<8x512xf32>
    %156 = arith.addf %154, %155 : vector<8x512xf32>
    %157 = vector.broadcast %3 : vector<1x512xf32> to vector<8x512xf32>
    %158 = arith.addf %156, %157 : vector<8x512xf32>
    %159 = vector.extract_strided_slice %158 {offsets = [0, 0], sizes = [8, 128], strides = [1, 1]} : vector<8x512xf32> to vector<8x128xf32>
    %160 = arith.negf %159 : vector<8x128xf32>
    %161 = math.exp %160 : vector<8x128xf32>
    %cst_42 = arith.constant 1.000000e+00 : f32
    %162 = vector.broadcast %cst_42 : f32 to vector<8x128xf32>
    %163 = arith.addf %162, %161 : vector<8x128xf32>
    %164 = arith.divf %162, %163 : vector<8x128xf32>
    %165 = vector.extract_strided_slice %158 {offsets = [0, 128], sizes = [8, 128], strides = [1, 1]} : vector<8x512xf32> to vector<8x128xf32>
    %166 = arith.negf %165 : vector<8x128xf32>
    %167 = math.exp %166 : vector<8x128xf32>
    %cst_43 = arith.constant 1.000000e+00 : f32
    %168 = vector.broadcast %cst_43 : f32 to vector<8x128xf32>
    %169 = arith.addf %168, %167 : vector<8x128xf32>
    %170 = arith.divf %168, %169 : vector<8x128xf32>
    %171 = vector.extract_strided_slice %158 {offsets = [0, 256], sizes = [8, 128], strides = [1, 1]} : vector<8x512xf32> to vector<8x128xf32>
    %172 = math.tanh %171 : vector<8x128xf32>
    %173 = vector.extract_strided_slice %158 {offsets = [0, 384], sizes = [8, 128], strides = [1, 1]} : vector<8x512xf32> to vector<8x128xf32>
    %174 = arith.negf %173 : vector<8x128xf32>
    %175 = math.exp %174 : vector<8x128xf32>
    %cst_44 = arith.constant 1.000000e+00 : f32
    %176 = vector.broadcast %cst_44 : f32 to vector<8x128xf32>
    %177 = arith.addf %176, %175 : vector<8x128xf32>
    %178 = arith.divf %176, %177 : vector<8x128xf32>
    %179 = arith.mulf %170, %119 : vector<8x128xf32>
    %180 = arith.mulf %164, %172 : vector<8x128xf32>
    %181 = arith.addf %179, %180 : vector<8x128xf32>
    %182 = math.tanh %181 : vector<8x128xf32>
    %183 = arith.mulf %178, %182 : vector<8x128xf32>
    %184 = vector.broadcast %c2_i32 : i32 to vector<8x1xi32>
    %185 = arith.cmpi slt, %184, %0 : vector<8x1xi32>
    %186 = vector.shape_cast %185 : vector<8x1xi1> to vector<8x1xi1>
    %187 = vector.broadcast %186 : vector<8x1xi1> to vector<8x128xi1>
    %188 = arith.select %187, %183, %116 : vector<8x128xi1>, vector<8x128xf32>
    %189 = vector.shape_cast %185 : vector<8x1xi1> to vector<8x1xi1>
    %190 = vector.broadcast %189 : vector<8x1xi1> to vector<8x128xi1>
    %191 = arith.select %190, %181, %119 : vector<8x128xi1>, vector<8x128xf32>
    %192 = vector.shape_cast %185 : vector<8x1xi1> to vector<8x1xi1>
    %193 = vector.broadcast %192 : vector<8x1xi1> to vector<8x128xi1>
    %194 = arith.select %193, %183, %122 : vector<8x128xi1>, vector<8x128xf32>
    %cst_45 = arith.constant 0.000000e+00 : f32
    %195 = vector.shape_cast %185 : vector<8x1xi1> to vector<8x1xi1>
    %196 = vector.broadcast %195 : vector<8x1xi1> to vector<8x128xi1>
    %197 = vector.broadcast %cst_45 : f32 to vector<8x128xf32>
    %198 = arith.select %196, %183, %197 : vector<8x128xi1>, vector<8x128xf32>
    %199 = arith.index_cast %c2_i32 : i32 to index
    %c0_46 = arith.constant 0 : index
    %c0_47 = arith.constant 0 : index
    %200 = vector.load %arg8[%199, %c0_46, %c0_47] : memref<8x8x128xf32, #tpu.memory_space<vmem>>, vector<1x8x128xf32>
    %201 = vector.shape_cast %200 : vector<1x8x128xf32> to vector<8x128xf32>
    %202 = vector.shape_cast %198 : vector<8x128xf32> to vector<1x8x128xf32>
    tpu.vector_store %arg8[%199, %c0_46, %c0_47], %202 {strides = array<i32>} : memref<8x8x128xf32, #tpu.memory_space<vmem>>, vector<1x8x128xf32>,
    %cst_48 = arith.constant 0.000000e+00 : f32
    %203 = vector.shape_cast %185 : vector<8x1xi1> to vector<8x1xi1>
    %204 = vector.broadcast %203 : vector<8x1xi1> to vector<8x128xi1>
    %205 = vector.broadcast %cst_48 : f32 to vector<8x128xf32>
    %206 = arith.select %204, %181, %205 : vector<8x128xi1>, vector<8x128xf32>
    %207 = arith.index_cast %c2_i32 : i32 to index
    %c0_49 = arith.constant 0 : index
    %c0_50 = arith.constant 0 : index
    %208 = vector.load %arg9[%207, %c0_49, %c0_50] : memref<8x8x128xf32, #tpu.memory_space<vmem>>, vector<1x8x128xf32>
    %209 = vector.shape_cast %208 : vector<1x8x128xf32> to vector<8x128xf32>
    %210 = vector.shape_cast %206 : vector<8x128xf32> to vector<1x8x128xf32>
    tpu.vector_store %arg9[%207, %c0_49, %c0_50], %210 {strides = array<i32>} : memref<8x8x128xf32, #tpu.memory_space<vmem>>, vector<1x8x128xf32>,
    %cst_51 = arith.constant dense<0.000000e+00> : vector<8xf32>
    %211 = vector.multi_reduction <add>, %181, %cst_51 [1] : vector<8x128xf32> to vector<8xf32>
    %212 = vector.shape_cast %211 : vector<8xf32> to vector<8x1xf32>
    %cst_52 = arith.constant 0.000000e+00 : f32
    %213 = vector.broadcast %cst_52 : f32 to vector<8x1xf32>
    %214 = arith.cmpf one, %212, %213 : vector<8x1xf32>
    %215 = arith.andi %185, %214 : vector<8x1xi1>
    %216 = vector.broadcast %c2_i32 : i32 to vector<8x8xi32>
    %217 = arith.cmpi eq, %4, %216 : vector<8x8xi32>
    %218 = arith.extui %215 : vector<8x1xi1> to vector<8x1xi32>
    %219 = arith.sitofp %218 : vector<8x1xi32> to vector<8x1xf32>
    %220 = vector.shape_cast %219 : vector<8x1xf32> to vector<8x1xf32>
    %221 = vector.broadcast %220 : vector<8x1xf32> to vector<8x8xf32>
    %222 = arith.select %217, %221, %150 : vector<8x8xi1>, vector<8x8xf32>
    %c3_i32 = arith.constant 3 : i32
    %223 = arith.index_cast %c3_i32 : i32 to index
    %c0_53 = arith.constant 0 : index
    %c0_54 = arith.constant 0 : index
    %224 = vector.load %arg2[%223, %c0_53, %c0_54] : memref<8x8x32xf32, #tpu.memory_space<vmem>>, vector<1x8x32xf32>
    %225 = vector.shape_cast %224 : vector<1x8x32xf32> to vector<8x32xf32>
    %cst_55 = arith.constant dense<0.000000e+00> : vector<8x512xf32>
    %226 = tpu.matmul %225, %1, %cst_55 {dimension_numbers = #tpu.dot_dimension_numbers<[1], [0], [0], [1], [0, 0, 1, 1], [], []>} : vector<8x32xf32>, vector<32x512xf32>, vector<8x512xf32> -> vector<8x512xf32>
    %cst_56 = arith.constant dense<0.000000e+00> : vector<8x512xf32>
    %227 = tpu.matmul %188, %2, %cst_56 {dimension_numbers = #tpu.dot_dimension_numbers<[1], [0], [0], [1], [0, 0, 1, 1], [], []>} : vector<8x128xf32>, vector<128x512xf32>, vector<8x512xf32> -> vector<8x512xf32>
    %228 = arith.addf %226, %227 : vector<8x512xf32>
    %229 = vector.broadcast %3 : vector<1x512xf32> to vector<8x512xf32>
    %230 = arith.addf %228, %229 : vector<8x512xf32>
    %231 = vector.extract_strided_slice %230 {offsets = [0, 0], sizes = [8, 128], strides = [1, 1]} : vector<8x512xf32> to vector<8x128xf32>
    %232 = arith.negf %231 : vector<8x128xf32>
    %233 = math.exp %232 : vector<8x128xf32>
    %cst_57 = arith.constant 1.000000e+00 : f32
    %234 = vector.broadcast %cst_57 : f32 to vector<8x128xf32>
    %235 = arith.addf %234, %233 : vector<8x128xf32>
    %236 = arith.divf %234, %235 : vector<8x128xf32>
    %237 = vector.extract_strided_slice %230 {offsets = [0, 128], sizes = [8, 128], strides = [1, 1]} : vector<8x512xf32> to vector<8x128xf32>
    %238 = arith.negf %237 : vector<8x128xf32>
    %239 = math.exp %238 : vector<8x128xf32>
    %cst_58 = arith.constant 1.000000e+00 : f32
    %240 = vector.broadcast %cst_58 : f32 to vector<8x128xf32>
    %241 = arith.addf %240, %239 : vector<8x128xf32>
    %242 = arith.divf %240, %241 : vector<8x128xf32>
    %243 = vector.extract_strided_slice %230 {offsets = [0, 256], sizes = [8, 128], strides = [1, 1]} : vector<8x512xf32> to vector<8x128xf32>
    %244 = math.tanh %243 : vector<8x128xf32>
    %245 = vector.extract_strided_slice %230 {offsets = [0, 384], sizes = [8, 128], strides = [1, 1]} : vector<8x512xf32> to vector<8x128xf32>
    %246 = arith.negf %245 : vector<8x128xf32>
    %247 = math.exp %246 : vector<8x128xf32>
    %cst_59 = arith.constant 1.000000e+00 : f32
    %248 = vector.broadcast %cst_59 : f32 to vector<8x128xf32>
    %249 = arith.addf %248, %247 : vector<8x128xf32>
    %250 = arith.divf %248, %249 : vector<8x128xf32>
    %251 = arith.mulf %242, %191 : vector<8x128xf32>
    %252 = arith.mulf %236, %244 : vector<8x128xf32>
    %253 = arith.addf %251, %252 : vector<8x128xf32>
    %254 = math.tanh %253 : vector<8x128xf32>
    %255 = arith.mulf %250, %254 : vector<8x128xf32>
    %256 = vector.broadcast %c3_i32 : i32 to vector<8x1xi32>
    %257 = arith.cmpi slt, %256, %0 : vector<8x1xi32>
    %258 = vector.shape_cast %257 : vector<8x1xi1> to vector<8x1xi1>
    %259 = vector.broadcast %258 : vector<8x1xi1> to vector<8x128xi1>
    %260 = arith.select %259, %255, %188 : vector<8x128xi1>, vector<8x128xf32>
    %261 = vector.shape_cast %257 : vector<8x1xi1> to vector<8x1xi1>
    %262 = vector.broadcast %261 : vector<8x1xi1> to vector<8x128xi1>
    %263 = arith.select %262, %253, %191 : vector<8x128xi1>, vector<8x128xf32>
    %264 = vector.shape_cast %257 : vector<8x1xi1> to vector<8x1xi1>
    %265 = vector.broadcast %264 : vector<8x1xi1> to vector<8x128xi1>
    %266 = arith.select %265, %255, %194 : vector<8x128xi1>, vector<8x128xf32>
    %cst_60 = arith.constant 0.000000e+00 : f32
    %267 = vector.shape_cast %257 : vector<8x1xi1> to vector<8x1xi1>
    %268 = vector.broadcast %267 : vector<8x1xi1> to vector<8x128xi1>
    %269 = vector.broadcast %cst_60 : f32 to vector<8x128xf32>
    %270 = arith.select %268, %255, %269 : vector<8x128xi1>, vector<8x128xf32>
    %271 = arith.index_cast %c3_i32 : i32 to index
    %c0_61 = arith.constant 0 : index
    %c0_62 = arith.constant 0 : index
    %272 = vector.load %arg8[%271, %c0_61, %c0_62] : memref<8x8x128xf32, #tpu.memory_space<vmem>>, vector<1x8x128xf32>
    %273 = vector.shape_cast %272 : vector<1x8x128xf32> to vector<8x128xf32>
    %274 = vector.shape_cast %270 : vector<8x128xf32> to vector<1x8x128xf32>
    tpu.vector_store %arg8[%271, %c0_61, %c0_62], %274 {strides = array<i32>} : memref<8x8x128xf32, #tpu.memory_space<vmem>>, vector<1x8x128xf32>,
    %cst_63 = arith.constant 0.000000e+00 : f32
    %275 = vector.shape_cast %257 : vector<8x1xi1> to vector<8x1xi1>
    %276 = vector.broadcast %275 : vector<8x1xi1> to vector<8x128xi1>
    %277 = vector.broadcast %cst_63 : f32 to vector<8x128xf32>
    %278 = arith.select %276, %253, %277 : vector<8x128xi1>, vector<8x128xf32>
    %279 = arith.index_cast %c3_i32 : i32 to index
    %c0_64 = arith.constant 0 : index
    %c0_65 = arith.constant 0 : index
    %280 = vector.load %arg9[%279, %c0_64, %c0_65] : memref<8x8x128xf32, #tpu.memory_space<vmem>>, vector<1x8x128xf32>
    %281 = vector.shape_cast %280 : vector<1x8x128xf32> to vector<8x128xf32>
    %282 = vector.shape_cast %278 : vector<8x128xf32> to vector<1x8x128xf32>
    tpu.vector_store %arg9[%279, %c0_64, %c0_65], %282 {strides = array<i32>} : memref<8x8x128xf32, #tpu.memory_space<vmem>>, vector<1x8x128xf32>,
    %cst_66 = arith.constant dense<0.000000e+00> : vector<8xf32>
    %283 = vector.multi_reduction <add>, %253, %cst_66 [1] : vector<8x128xf32> to vector<8xf32>
    %284 = vector.shape_cast %283 : vector<8xf32> to vector<8x1xf32>
    %cst_67 = arith.constant 0.000000e+00 : f32
    %285 = vector.broadcast %cst_67 : f32 to vector<8x1xf32>
    %286 = arith.cmpf one, %284, %285 : vector<8x1xf32>
    %287 = arith.andi %257, %286 : vector<8x1xi1>
    %288 = vector.broadcast %c3_i32 : i32 to vector<8x8xi32>
    %289 = arith.cmpi eq, %4, %288 : vector<8x8xi32>
    %290 = arith.extui %287 : vector<8x1xi1> to vector<8x1xi32>
    %291 = arith.sitofp %290 : vector<8x1xi32> to vector<8x1xf32>
    %292 = vector.shape_cast %291 : vector<8x1xf32> to vector<8x1xf32>
    %293 = vector.broadcast %292 : vector<8x1xf32> to vector<8x8xf32>
    %294 = arith.select %289, %293, %222 : vector<8x8xi1>, vector<8x8xf32>
    %c4_i32 = arith.constant 4 : i32
    %295 = arith.index_cast %c4_i32 : i32 to index
    %c0_68 = arith.constant 0 : index
    %c0_69 = arith.constant 0 : index
    %296 = vector.load %arg2[%295, %c0_68, %c0_69] : memref<8x8x32xf32, #tpu.memory_space<vmem>>, vector<1x8x32xf32>
    %297 = vector.shape_cast %296 : vector<1x8x32xf32> to vector<8x32xf32>
    %cst_70 = arith.constant dense<0.000000e+00> : vector<8x512xf32>
    %298 = tpu.matmul %297, %1, %cst_70 {dimension_numbers = #tpu.dot_dimension_numbers<[1], [0], [0], [1], [0, 0, 1, 1], [], []>} : vector<8x32xf32>, vector<32x512xf32>, vector<8x512xf32> -> vector<8x512xf32>
    %cst_71 = arith.constant dense<0.000000e+00> : vector<8x512xf32>
    %299 = tpu.matmul %260, %2, %cst_71 {dimension_numbers = #tpu.dot_dimension_numbers<[1], [0], [0], [1], [0, 0, 1, 1], [], []>} : vector<8x128xf32>, vector<128x512xf32>, vector<8x512xf32> -> vector<8x512xf32>
    %300 = arith.addf %298, %299 : vector<8x512xf32>
    %301 = vector.broadcast %3 : vector<1x512xf32> to vector<8x512xf32>
    %302 = arith.addf %300, %301 : vector<8x512xf32>
    %303 = vector.extract_strided_slice %302 {offsets = [0, 0], sizes = [8, 128], strides = [1, 1]} : vector<8x512xf32> to vector<8x128xf32>
    %304 = arith.negf %303 : vector<8x128xf32>
    %305 = math.exp %304 : vector<8x128xf32>
    %cst_72 = arith.constant 1.000000e+00 : f32
    %306 = vector.broadcast %cst_72 : f32 to vector<8x128xf32>
    %307 = arith.addf %306, %305 : vector<8x128xf32>
    %308 = arith.divf %306, %307 : vector<8x128xf32>
    %309 = vector.extract_strided_slice %302 {offsets = [0, 128], sizes = [8, 128], strides = [1, 1]} : vector<8x512xf32> to vector<8x128xf32>
    %310 = arith.negf %309 : vector<8x128xf32>
    %311 = math.exp %310 : vector<8x128xf32>
    %cst_73 = arith.constant 1.000000e+00 : f32
    %312 = vector.broadcast %cst_73 : f32 to vector<8x128xf32>
    %313 = arith.addf %312, %311 : vector<8x128xf32>
    %314 = arith.divf %312, %313 : vector<8x128xf32>
    %315 = vector.extract_strided_slice %302 {offsets = [0, 256], sizes = [8, 128], strides = [1, 1]} : vector<8x512xf32> to vector<8x128xf32>
    %316 = math.tanh %315 : vector<8x128xf32>
    %317 = vector.extract_strided_slice %302 {offsets = [0, 384], sizes = [8, 128], strides = [1, 1]} : vector<8x512xf32> to vector<8x128xf32>
    %318 = arith.negf %317 : vector<8x128xf32>
    %319 = math.exp %318 : vector<8x128xf32>
    %cst_74 = arith.constant 1.000000e+00 : f32
    %320 = vector.broadcast %cst_74 : f32 to vector<8x128xf32>
    %321 = arith.addf %320, %319 : vector<8x128xf32>
    %322 = arith.divf %320, %321 : vector<8x128xf32>
    %323 = arith.mulf %314, %263 : vector<8x128xf32>
    %324 = arith.mulf %308, %316 : vector<8x128xf32>
    %325 = arith.addf %323, %324 : vector<8x128xf32>
    %326 = math.tanh %325 : vector<8x128xf32>
    %327 = arith.mulf %322, %326 : vector<8x128xf32>
    %328 = vector.broadcast %c4_i32 : i32 to vector<8x1xi32>
    %329 = arith.cmpi slt, %328, %0 : vector<8x1xi32>
    %330 = vector.shape_cast %329 : vector<8x1xi1> to vector<8x1xi1>
    %331 = vector.broadcast %330 : vector<8x1xi1> to vector<8x128xi1>
    %332 = arith.select %331, %327, %260 : vector<8x128xi1>, vector<8x128xf32>
    %333 = vector.shape_cast %329 : vector<8x1xi1> to vector<8x1xi1>
    %334 = vector.broadcast %333 : vector<8x1xi1> to vector<8x128xi1>
    %335 = arith.select %334, %325, %263 : vector<8x128xi1>, vector<8x128xf32>
    %336 = vector.shape_cast %329 : vector<8x1xi1> to vector<8x1xi1>
    %337 = vector.broadcast %336 : vector<8x1xi1> to vector<8x128xi1>
    %338 = arith.select %337, %327, %266 : vector<8x128xi1>, vector<8x128xf32>
    %cst_75 = arith.constant 0.000000e+00 : f32
    %339 = vector.shape_cast %329 : vector<8x1xi1> to vector<8x1xi1>
    %340 = vector.broadcast %339 : vector<8x1xi1> to vector<8x128xi1>
    %341 = vector.broadcast %cst_75 : f32 to vector<8x128xf32>
    %342 = arith.select %340, %327, %341 : vector<8x128xi1>, vector<8x128xf32>
    %343 = arith.index_cast %c4_i32 : i32 to index
    %c0_76 = arith.constant 0 : index
    %c0_77 = arith.constant 0 : index
    %344 = vector.load %arg8[%343, %c0_76, %c0_77] : memref<8x8x128xf32, #tpu.memory_space<vmem>>, vector<1x8x128xf32>
    %345 = vector.shape_cast %344 : vector<1x8x128xf32> to vector<8x128xf32>
    %346 = vector.shape_cast %342 : vector<8x128xf32> to vector<1x8x128xf32>
    tpu.vector_store %arg8[%343, %c0_76, %c0_77], %346 {strides = array<i32>} : memref<8x8x128xf32, #tpu.memory_space<vmem>>, vector<1x8x128xf32>,
    %cst_78 = arith.constant 0.000000e+00 : f32
    %347 = vector.shape_cast %329 : vector<8x1xi1> to vector<8x1xi1>
    %348 = vector.broadcast %347 : vector<8x1xi1> to vector<8x128xi1>
    %349 = vector.broadcast %cst_78 : f32 to vector<8x128xf32>
    %350 = arith.select %348, %325, %349 : vector<8x128xi1>, vector<8x128xf32>
    %351 = arith.index_cast %c4_i32 : i32 to index
    %c0_79 = arith.constant 0 : index
    %c0_80 = arith.constant 0 : index
    %352 = vector.load %arg9[%351, %c0_79, %c0_80] : memref<8x8x128xf32, #tpu.memory_space<vmem>>, vector<1x8x128xf32>
    %353 = vector.shape_cast %352 : vector<1x8x128xf32> to vector<8x128xf32>
    %354 = vector.shape_cast %350 : vector<8x128xf32> to vector<1x8x128xf32>
    tpu.vector_store %arg9[%351, %c0_79, %c0_80], %354 {strides = array<i32>} : memref<8x8x128xf32, #tpu.memory_space<vmem>>, vector<1x8x128xf32>,
    %cst_81 = arith.constant dense<0.000000e+00> : vector<8xf32>
    %355 = vector.multi_reduction <add>, %325, %cst_81 [1] : vector<8x128xf32> to vector<8xf32>
    %356 = vector.shape_cast %355 : vector<8xf32> to vector<8x1xf32>
    %cst_82 = arith.constant 0.000000e+00 : f32
    %357 = vector.broadcast %cst_82 : f32 to vector<8x1xf32>
    %358 = arith.cmpf one, %356, %357 : vector<8x1xf32>
    %359 = arith.andi %329, %358 : vector<8x1xi1>
    %360 = vector.broadcast %c4_i32 : i32 to vector<8x8xi32>
    %361 = arith.cmpi eq, %4, %360 : vector<8x8xi32>
    %362 = arith.extui %359 : vector<8x1xi1> to vector<8x1xi32>
    %363 = arith.sitofp %362 : vector<8x1xi32> to vector<8x1xf32>
    %364 = vector.shape_cast %363 : vector<8x1xf32> to vector<8x1xf32>
    %365 = vector.broadcast %364 : vector<8x1xf32> to vector<8x8xf32>
    %366 = arith.select %361, %365, %294 : vector<8x8xi1>, vector<8x8xf32>
    %c5_i32 = arith.constant 5 : i32
    %367 = arith.index_cast %c5_i32 : i32 to index
    %c0_83 = arith.constant 0 : index
    %c0_84 = arith.constant 0 : index
    %368 = vector.load %arg2[%367, %c0_83, %c0_84] : memref<8x8x32xf32, #tpu.memory_space<vmem>>, vector<1x8x32xf32>
    %369 = vector.shape_cast %368 : vector<1x8x32xf32> to vector<8x32xf32>
    %cst_85 = arith.constant dense<0.000000e+00> : vector<8x512xf32>
    %370 = tpu.matmul %369, %1, %cst_85 {dimension_numbers = #tpu.dot_dimension_numbers<[1], [0], [0], [1], [0, 0, 1, 1], [], []>} : vector<8x32xf32>, vector<32x512xf32>, vector<8x512xf32> -> vector<8x512xf32>
    %cst_86 = arith.constant dense<0.000000e+00> : vector<8x512xf32>
    %371 = tpu.matmul %332, %2, %cst_86 {dimension_numbers = #tpu.dot_dimension_numbers<[1], [0], [0], [1], [0, 0, 1, 1], [], []>} : vector<8x128xf32>, vector<128x512xf32>, vector<8x512xf32> -> vector<8x512xf32>
    %372 = arith.addf %370, %371 : vector<8x512xf32>
    %373 = vector.broadcast %3 : vector<1x512xf32> to vector<8x512xf32>
    %374 = arith.addf %372, %373 : vector<8x512xf32>
    %375 = vector.extract_strided_slice %374 {offsets = [0, 0], sizes = [8, 128], strides = [1, 1]} : vector<8x512xf32> to vector<8x128xf32>
    %376 = arith.negf %375 : vector<8x128xf32>
    %377 = math.exp %376 : vector<8x128xf32>
    %cst_87 = arith.constant 1.000000e+00 : f32
    %378 = vector.broadcast %cst_87 : f32 to vector<8x128xf32>
    %379 = arith.addf %378, %377 : vector<8x128xf32>
    %380 = arith.divf %378, %379 : vector<8x128xf32>
    %381 = vector.extract_strided_slice %374 {offsets = [0, 128], sizes = [8, 128], strides = [1, 1]} : vector<8x512xf32> to vector<8x128xf32>
    %382 = arith.negf %381 : vector<8x128xf32>
    %383 = math.exp %382 : vector<8x128xf32>
    %cst_88 = arith.constant 1.000000e+00 : f32
    %384 = vector.broadcast %cst_88 : f32 to vector<8x128xf32>
    %385 = arith.addf %384, %383 : vector<8x128xf32>
    %386 = arith.divf %384, %385 : vector<8x128xf32>
    %387 = vector.extract_strided_slice %374 {offsets = [0, 256], sizes = [8, 128], strides = [1, 1]} : vector<8x512xf32> to vector<8x128xf32>
    %388 = math.tanh %387 : vector<8x128xf32>
    %389 = vector.extract_strided_slice %374 {offsets = [0, 384], sizes = [8, 128], strides = [1, 1]} : vector<8x512xf32> to vector<8x128xf32>
    %390 = arith.negf %389 : vector<8x128xf32>
    %391 = math.exp %390 : vector<8x128xf32>
    %cst_89 = arith.constant 1.000000e+00 : f32
    %392 = vector.broadcast %cst_89 : f32 to vector<8x128xf32>
    %393 = arith.addf %392, %391 : vector<8x128xf32>
    %394 = arith.divf %392, %393 : vector<8x128xf32>
    %395 = arith.mulf %386, %335 : vector<8x128xf32>
    %396 = arith.mulf %380, %388 : vector<8x128xf32>
    %397 = arith.addf %395, %396 : vector<8x128xf32>
    %398 = math.tanh %397 : vector<8x128xf32>
    %399 = arith.mulf %394, %398 : vector<8x128xf32>
    %400 = vector.broadcast %c5_i32 : i32 to vector<8x1xi32>
    %401 = arith.cmpi slt, %400, %0 : vector<8x1xi32>
    %402 = vector.shape_cast %401 : vector<8x1xi1> to vector<8x1xi1>
    %403 = vector.broadcast %402 : vector<8x1xi1> to vector<8x128xi1>
    %404 = arith.select %403, %399, %332 : vector<8x128xi1>, vector<8x128xf32>
    %405 = vector.shape_cast %401 : vector<8x1xi1> to vector<8x1xi1>
    %406 = vector.broadcast %405 : vector<8x1xi1> to vector<8x128xi1>
    %407 = arith.select %406, %397, %335 : vector<8x128xi1>, vector<8x128xf32>
    %408 = vector.shape_cast %401 : vector<8x1xi1> to vector<8x1xi1>
    %409 = vector.broadcast %408 : vector<8x1xi1> to vector<8x128xi1>
    %410 = arith.select %409, %399, %338 : vector<8x128xi1>, vector<8x128xf32>
    %cst_90 = arith.constant 0.000000e+00 : f32
    %411 = vector.shape_cast %401 : vector<8x1xi1> to vector<8x1xi1>
    %412 = vector.broadcast %411 : vector<8x1xi1> to vector<8x128xi1>
    %413 = vector.broadcast %cst_90 : f32 to vector<8x128xf32>
    %414 = arith.select %412, %399, %413 : vector<8x128xi1>, vector<8x128xf32>
    %415 = arith.index_cast %c5_i32 : i32 to index
    %c0_91 = arith.constant 0 : index
    %c0_92 = arith.constant 0 : index
    %416 = vector.load %arg8[%415, %c0_91, %c0_92] : memref<8x8x128xf32, #tpu.memory_space<vmem>>, vector<1x8x128xf32>
    %417 = vector.shape_cast %416 : vector<1x8x128xf32> to vector<8x128xf32>
    %418 = vector.shape_cast %414 : vector<8x128xf32> to vector<1x8x128xf32>
    tpu.vector_store %arg8[%415, %c0_91, %c0_92], %418 {strides = array<i32>} : memref<8x8x128xf32, #tpu.memory_space<vmem>>, vector<1x8x128xf32>,
    %cst_93 = arith.constant 0.000000e+00 : f32
    %419 = vector.shape_cast %401 : vector<8x1xi1> to vector<8x1xi1>
    %420 = vector.broadcast %419 : vector<8x1xi1> to vector<8x128xi1>
    %421 = vector.broadcast %cst_93 : f32 to vector<8x128xf32>
    %422 = arith.select %420, %397, %421 : vector<8x128xi1>, vector<8x128xf32>
    %423 = arith.index_cast %c5_i32 : i32 to index
    %c0_94 = arith.constant 0 : index
    %c0_95 = arith.constant 0 : index
    %424 = vector.load %arg9[%423, %c0_94, %c0_95] : memref<8x8x128xf32, #tpu.memory_space<vmem>>, vector<1x8x128xf32>
    %425 = vector.shape_cast %424 : vector<1x8x128xf32> to vector<8x128xf32>
    %426 = vector.shape_cast %422 : vector<8x128xf32> to vector<1x8x128xf32>
    tpu.vector_store %arg9[%423, %c0_94, %c0_95], %426 {strides = array<i32>} : memref<8x8x128xf32, #tpu.memory_space<vmem>>, vector<1x8x128xf32>,
    %cst_96 = arith.constant dense<0.000000e+00> : vector<8xf32>
    %427 = vector.multi_reduction <add>, %397, %cst_96 [1] : vector<8x128xf32> to vector<8xf32>
    %428 = vector.shape_cast %427 : vector<8xf32> to vector<8x1xf32>
    %cst_97 = arith.constant 0.000000e+00 : f32
    %429 = vector.broadcast %cst_97 : f32 to vector<8x1xf32>
    %430 = arith.cmpf one, %428, %429 : vector<8x1xf32>
    %431 = arith.andi %401, %430 : vector<8x1xi1>
    %432 = vector.broadcast %c5_i32 : i32 to vector<8x8xi32>
    %433 = arith.cmpi eq, %4, %432 : vector<8x8xi32>
    %434 = arith.extui %431 : vector<8x1xi1> to vector<8x1xi32>
    %435 = arith.sitofp %434 : vector<8x1xi32> to vector<8x1xf32>
    %436 = vector.shape_cast %435 : vector<8x1xf32> to vector<8x1xf32>
    %437 = vector.broadcast %436 : vector<8x1xf32> to vector<8x8xf32>
    %438 = arith.select %433, %437, %366 : vector<8x8xi1>, vector<8x8xf32>
    %c6_i32 = arith.constant 6 : i32
    %439 = arith.index_cast %c6_i32 : i32 to index
    %c0_98 = arith.constant 0 : index
    %c0_99 = arith.constant 0 : index
    %440 = vector.load %arg2[%439, %c0_98, %c0_99] : memref<8x8x32xf32, #tpu.memory_space<vmem>>, vector<1x8x32xf32>
    %441 = vector.shape_cast %440 : vector<1x8x32xf32> to vector<8x32xf32>
    %cst_100 = arith.constant dense<0.000000e+00> : vector<8x512xf32>
    %442 = tpu.matmul %441, %1, %cst_100 {dimension_numbers = #tpu.dot_dimension_numbers<[1], [0], [0], [1], [0, 0, 1, 1], [], []>} : vector<8x32xf32>, vector<32x512xf32>, vector<8x512xf32> -> vector<8x512xf32>
    %cst_101 = arith.constant dense<0.000000e+00> : vector<8x512xf32>
    %443 = tpu.matmul %404, %2, %cst_101 {dimension_numbers = #tpu.dot_dimension_numbers<[1], [0], [0], [1], [0, 0, 1, 1], [], []>} : vector<8x128xf32>, vector<128x512xf32>, vector<8x512xf32> -> vector<8x512xf32>
    %444 = arith.addf %442, %443 : vector<8x512xf32>
    %445 = vector.broadcast %3 : vector<1x512xf32> to vector<8x512xf32>
    %446 = arith.addf %444, %445 : vector<8x512xf32>
    %447 = vector.extract_strided_slice %446 {offsets = [0, 0], sizes = [8, 128], strides = [1, 1]} : vector<8x512xf32> to vector<8x128xf32>
    %448 = arith.negf %447 : vector<8x128xf32>
    %449 = math.exp %448 : vector<8x128xf32>
    %cst_102 = arith.constant 1.000000e+00 : f32
    %450 = vector.broadcast %cst_102 : f32 to vector<8x128xf32>
    %451 = arith.addf %450, %449 : vector<8x128xf32>
    %452 = arith.divf %450, %451 : vector<8x128xf32>
    %453 = vector.extract_strided_slice %446 {offsets = [0, 128], sizes = [8, 128], strides = [1, 1]} : vector<8x512xf32> to vector<8x128xf32>
    %454 = arith.negf %453 : vector<8x128xf32>
    %455 = math.exp %454 : vector<8x128xf32>
    %cst_103 = arith.constant 1.000000e+00 : f32
    %456 = vector.broadcast %cst_103 : f32 to vector<8x128xf32>
    %457 = arith.addf %456, %455 : vector<8x128xf32>
    %458 = arith.divf %456, %457 : vector<8x128xf32>
    %459 = vector.extract_strided_slice %446 {offsets = [0, 256], sizes = [8, 128], strides = [1, 1]} : vector<8x512xf32> to vector<8x128xf32>
    %460 = math.tanh %459 : vector<8x128xf32>
    %461 = vector.extract_strided_slice %446 {offsets = [0, 384], sizes = [8, 128], strides = [1, 1]} : vector<8x512xf32> to vector<8x128xf32>
    %462 = arith.negf %461 : vector<8x128xf32>
    %463 = math.exp %462 : vector<8x128xf32>
    %cst_104 = arith.constant 1.000000e+00 : f32
    %464 = vector.broadcast %cst_104 : f32 to vector<8x128xf32>
    %465 = arith.addf %464, %463 : vector<8x128xf32>
    %466 = arith.divf %464, %465 : vector<8x128xf32>
    %467 = arith.mulf %458, %407 : vector<8x128xf32>
    %468 = arith.mulf %452, %460 : vector<8x128xf32>
    %469 = arith.addf %467, %468 : vector<8x128xf32>
    %470 = math.tanh %469 : vector<8x128xf32>
    %471 = arith.mulf %466, %470 : vector<8x128xf32>
    %472 = vector.broadcast %c6_i32 : i32 to vector<8x1xi32>
    %473 = arith.cmpi slt, %472, %0 : vector<8x1xi32>
    %474 = vector.shape_cast %473 : vector<8x1xi1> to vector<8x1xi1>
    %475 = vector.broadcast %474 : vector<8x1xi1> to vector<8x128xi1>
    %476 = arith.select %475, %471, %404 : vector<8x128xi1>, vector<8x128xf32>
    %477 = vector.shape_cast %473 : vector<8x1xi1> to vector<8x1xi1>
    %478 = vector.broadcast %477 : vector<8x1xi1> to vector<8x128xi1>
    %479 = arith.select %478, %469, %407 : vector<8x128xi1>, vector<8x128xf32>
    %480 = vector.shape_cast %473 : vector<8x1xi1> to vector<8x1xi1>
    %481 = vector.broadcast %480 : vector<8x1xi1> to vector<8x128xi1>
    %482 = arith.select %481, %471, %410 : vector<8x128xi1>, vector<8x128xf32>
    %cst_105 = arith.constant 0.000000e+00 : f32
    %483 = vector.shape_cast %473 : vector<8x1xi1> to vector<8x1xi1>
    %484 = vector.broadcast %483 : vector<8x1xi1> to vector<8x128xi1>
    %485 = vector.broadcast %cst_105 : f32 to vector<8x128xf32>
    %486 = arith.select %484, %471, %485 : vector<8x128xi1>, vector<8x128xf32>
    %487 = arith.index_cast %c6_i32 : i32 to index
    %c0_106 = arith.constant 0 : index
    %c0_107 = arith.constant 0 : index
    %488 = vector.load %arg8[%487, %c0_106, %c0_107] : memref<8x8x128xf32, #tpu.memory_space<vmem>>, vector<1x8x128xf32>
    %489 = vector.shape_cast %488 : vector<1x8x128xf32> to vector<8x128xf32>
    %490 = vector.shape_cast %486 : vector<8x128xf32> to vector<1x8x128xf32>
    tpu.vector_store %arg8[%487, %c0_106, %c0_107], %490 {strides = array<i32>} : memref<8x8x128xf32, #tpu.memory_space<vmem>>, vector<1x8x128xf32>,
    %cst_108 = arith.constant 0.000000e+00 : f32
    %491 = vector.shape_cast %473 : vector<8x1xi1> to vector<8x1xi1>
    %492 = vector.broadcast %491 : vector<8x1xi1> to vector<8x128xi1>
    %493 = vector.broadcast %cst_108 : f32 to vector<8x128xf32>
    %494 = arith.select %492, %469, %493 : vector<8x128xi1>, vector<8x128xf32>
    %495 = arith.index_cast %c6_i32 : i32 to index
    %c0_109 = arith.constant 0 : index
    %c0_110 = arith.constant 0 : index
    %496 = vector.load %arg9[%495, %c0_109, %c0_110] : memref<8x8x128xf32, #tpu.memory_space<vmem>>, vector<1x8x128xf32>
    %497 = vector.shape_cast %496 : vector<1x8x128xf32> to vector<8x128xf32>
    %498 = vector.shape_cast %494 : vector<8x128xf32> to vector<1x8x128xf32>
    tpu.vector_store %arg9[%495, %c0_109, %c0_110], %498 {strides = array<i32>} : memref<8x8x128xf32, #tpu.memory_space<vmem>>, vector<1x8x128xf32>,
    %cst_111 = arith.constant dense<0.000000e+00> : vector<8xf32>
    %499 = vector.multi_reduction <add>, %469, %cst_111 [1] : vector<8x128xf32> to vector<8xf32>
    %500 = vector.shape_cast %499 : vector<8xf32> to vector<8x1xf32>
    %cst_112 = arith.constant 0.000000e+00 : f32
    %501 = vector.broadcast %cst_112 : f32 to vector<8x1xf32>
    %502 = arith.cmpf one, %500, %501 : vector<8x1xf32>
    %503 = arith.andi %473, %502 : vector<8x1xi1>
    %504 = vector.broadcast %c6_i32 : i32 to vector<8x8xi32>
    %505 = arith.cmpi eq, %4, %504 : vector<8x8xi32>
    %506 = arith.extui %503 : vector<8x1xi1> to vector<8x1xi32>
    %507 = arith.sitofp %506 : vector<8x1xi32> to vector<8x1xf32>
    %508 = vector.shape_cast %507 : vector<8x1xf32> to vector<8x1xf32>
    %509 = vector.broadcast %508 : vector<8x1xf32> to vector<8x8xf32>
    %510 = arith.select %505, %509, %438 : vector<8x8xi1>, vector<8x8xf32>
    %c7_i32 = arith.constant 7 : i32
    %511 = arith.index_cast %c7_i32 : i32 to index
    %c0_113 = arith.constant 0 : index
    %c0_114 = arith.constant 0 : index
    %512 = vector.load %arg2[%511, %c0_113, %c0_114] : memref<8x8x32xf32, #tpu.memory_space<vmem>>, vector<1x8x32xf32>
    %513 = vector.shape_cast %512 : vector<1x8x32xf32> to vector<8x32xf32>
    %cst_115 = arith.constant dense<0.000000e+00> : vector<8x512xf32>
    %514 = tpu.matmul %513, %1, %cst_115 {dimension_numbers = #tpu.dot_dimension_numbers<[1], [0], [0], [1], [0, 0, 1, 1], [], []>} : vector<8x32xf32>, vector<32x512xf32>, vector<8x512xf32> -> vector<8x512xf32>
    %cst_116 = arith.constant dense<0.000000e+00> : vector<8x512xf32>
    %515 = tpu.matmul %476, %2, %cst_116 {dimension_numbers = #tpu.dot_dimension_numbers<[1], [0], [0], [1], [0, 0, 1, 1], [], []>} : vector<8x128xf32>, vector<128x512xf32>, vector<8x512xf32> -> vector<8x512xf32>
    %516 = arith.addf %514, %515 : vector<8x512xf32>
    %517 = vector.broadcast %3 : vector<1x512xf32> to vector<8x512xf32>
    %518 = arith.addf %516, %517 : vector<8x512xf32>
    %519 = vector.extract_strided_slice %518 {offsets = [0, 0], sizes = [8, 128], strides = [1, 1]} : vector<8x512xf32> to vector<8x128xf32>
    %520 = arith.negf %519 : vector<8x128xf32>
    %521 = math.exp %520 : vector<8x128xf32>
    %cst_117 = arith.constant 1.000000e+00 : f32
    %522 = vector.broadcast %cst_117 : f32 to vector<8x128xf32>
    %523 = arith.addf %522, %521 : vector<8x128xf32>
    %524 = arith.divf %522, %523 : vector<8x128xf32>
    %525 = vector.extract_strided_slice %518 {offsets = [0, 128], sizes = [8, 128], strides = [1, 1]} : vector<8x512xf32> to vector<8x128xf32>
    %526 = arith.negf %525 : vector<8x128xf32>
    %527 = math.exp %526 : vector<8x128xf32>
    %cst_118 = arith.constant 1.000000e+00 : f32
    %528 = vector.broadcast %cst_118 : f32 to vector<8x128xf32>
    %529 = arith.addf %528, %527 : vector<8x128xf32>
    %530 = arith.divf %528, %529 : vector<8x128xf32>
    %531 = vector.extract_strided_slice %518 {offsets = [0, 256], sizes = [8, 128], strides = [1, 1]} : vector<8x512xf32> to vector<8x128xf32>
    %532 = math.tanh %531 : vector<8x128xf32>
    %533 = vector.extract_strided_slice %518 {offsets = [0, 384], sizes = [8, 128], strides = [1, 1]} : vector<8x512xf32> to vector<8x128xf32>
    %534 = arith.negf %533 : vector<8x128xf32>
    %535 = math.exp %534 : vector<8x128xf32>
    %cst_119 = arith.constant 1.000000e+00 : f32
    %536 = vector.broadcast %cst_119 : f32 to vector<8x128xf32>
    %537 = arith.addf %536, %535 : vector<8x128xf32>
    %538 = arith.divf %536, %537 : vector<8x128xf32>
    %539 = arith.mulf %530, %479 : vector<8x128xf32>
    %540 = arith.mulf %524, %532 : vector<8x128xf32>
    %541 = arith.addf %539, %540 : vector<8x128xf32>
    %542 = math.tanh %541 : vector<8x128xf32>
    %543 = arith.mulf %538, %542 : vector<8x128xf32>
    %544 = vector.broadcast %c7_i32 : i32 to vector<8x1xi32>
    %545 = arith.cmpi slt, %544, %0 : vector<8x1xi32>
    %546 = vector.shape_cast %545 : vector<8x1xi1> to vector<8x1xi1>
    %547 = vector.broadcast %546 : vector<8x1xi1> to vector<8x128xi1>
    %548 = arith.select %547, %543, %476 : vector<8x128xi1>, vector<8x128xf32>
    %549 = vector.shape_cast %545 : vector<8x1xi1> to vector<8x1xi1>
    %550 = vector.broadcast %549 : vector<8x1xi1> to vector<8x128xi1>
    %551 = arith.select %550, %541, %479 : vector<8x128xi1>, vector<8x128xf32>
    %552 = vector.shape_cast %545 : vector<8x1xi1> to vector<8x1xi1>
    %553 = vector.broadcast %552 : vector<8x1xi1> to vector<8x128xi1>
    %554 = arith.select %553, %543, %482 : vector<8x128xi1>, vector<8x128xf32>
    %cst_120 = arith.constant 0.000000e+00 : f32
    %555 = vector.shape_cast %545 : vector<8x1xi1> to vector<8x1xi1>
    %556 = vector.broadcast %555 : vector<8x1xi1> to vector<8x128xi1>
    %557 = vector.broadcast %cst_120 : f32 to vector<8x128xf32>
    %558 = arith.select %556, %543, %557 : vector<8x128xi1>, vector<8x128xf32>
    %559 = arith.index_cast %c7_i32 : i32 to index
    %c0_121 = arith.constant 0 : index
    %c0_122 = arith.constant 0 : index
    %560 = vector.load %arg8[%559, %c0_121, %c0_122] : memref<8x8x128xf32, #tpu.memory_space<vmem>>, vector<1x8x128xf32>
    %561 = vector.shape_cast %560 : vector<1x8x128xf32> to vector<8x128xf32>
    %562 = vector.shape_cast %558 : vector<8x128xf32> to vector<1x8x128xf32>
    tpu.vector_store %arg8[%559, %c0_121, %c0_122], %562 {strides = array<i32>} : memref<8x8x128xf32, #tpu.memory_space<vmem>>, vector<1x8x128xf32>,
    %cst_123 = arith.constant 0.000000e+00 : f32
    %563 = vector.shape_cast %545 : vector<8x1xi1> to vector<8x1xi1>
    %564 = vector.broadcast %563 : vector<8x1xi1> to vector<8x128xi1>
    %565 = vector.broadcast %cst_123 : f32 to vector<8x128xf32>
    %566 = arith.select %564, %541, %565 : vector<8x128xi1>, vector<8x128xf32>
    %567 = arith.index_cast %c7_i32 : i32 to index
    %c0_124 = arith.constant 0 : index
    %c0_125 = arith.constant 0 : index
    %568 = vector.load %arg9[%567, %c0_124, %c0_125] : memref<8x8x128xf32, #tpu.memory_space<vmem>>, vector<1x8x128xf32>
    %569 = vector.shape_cast %568 : vector<1x8x128xf32> to vector<8x128xf32>
    %570 = vector.shape_cast %566 : vector<8x128xf32> to vector<1x8x128xf32>
    tpu.vector_store %arg9[%567, %c0_124, %c0_125], %570 {strides = array<i32>} : memref<8x8x128xf32, #tpu.memory_space<vmem>>, vector<1x8x128xf32>,
    %cst_126 = arith.constant dense<0.000000e+00> : vector<8xf32>
    %571 = vector.multi_reduction <add>, %541, %cst_126 [1] : vector<8x128xf32> to vector<8xf32>
    %572 = vector.shape_cast %571 : vector<8xf32> to vector<8x1xf32>
    %cst_127 = arith.constant 0.000000e+00 : f32
    %573 = vector.broadcast %cst_127 : f32 to vector<8x1xf32>
    %574 = arith.cmpf one, %572, %573 : vector<8x1xf32>
    %575 = arith.andi %545, %574 : vector<8x1xi1>
    %576 = vector.broadcast %c7_i32 : i32 to vector<8x8xi32>
    %577 = arith.cmpi eq, %4, %576 : vector<8x8xi32>
    %578 = arith.extui %575 : vector<8x1xi1> to vector<8x1xi32>
    %579 = arith.sitofp %578 : vector<8x1xi32> to vector<8x1xf32>
    %580 = vector.shape_cast %579 : vector<8x1xf32> to vector<8x1xf32>
    %581 = vector.broadcast %580 : vector<8x1xf32> to vector<8x8xf32>
    %582 = arith.select %577, %581, %510 : vector<8x8xi1>, vector<8x8xf32>
    %c8_i32 = arith.constant 8 : i32
    %c0_128 = arith.constant 0 : index
    %c0_129 = arith.constant 0 : index
    %583 = vector.load %arg6[%c0_128, %c0_129] : memref<128x128xf32, #tpu.memory_space<vmem>>, vector<128x128xf32>
    %cst_130 = arith.constant dense<0.000000e+00> : vector<8x128xf32>
    %584 = tpu.matmul %554, %583, %cst_130 {dimension_numbers = #tpu.dot_dimension_numbers<[1], [0], [0], [1], [0, 0, 1, 1], [], []>} : vector<8x128xf32>, vector<128x128xf32>, vector<8x128xf32> -> vector<8x128xf32>
    %c0_131 = arith.constant 0 : index
    %c0_132 = arith.constant 0 : index
    %585 = vector.load %arg7[%c0_131, %c0_132] : memref<1x128xf32, #tpu.memory_space<vmem>>, vector<1x128xf32>
    %586 = vector.broadcast %585 : vector<1x128xf32> to vector<8x128xf32>
    %587 = arith.addf %584, %586 : vector<8x128xf32>
    %588 = math.tanh %587 : vector<8x128xf32>
    %c0_133 = arith.constant 0 : index
    %c0_134 = arith.constant 0 : index
    %589 = vector.load %arg10[%c0_133, %c0_134] : memref<8x128xf32, #tpu.memory_space<vmem>>, vector<8x128xf32>
    tpu.vector_store %arg10[%c0_133, %c0_134], %588 {strides = array<i32>} : memref<8x128xf32, #tpu.memory_space<vmem>>, vector<8x128xf32>,
    %c0_135 = arith.constant 0 : index
    %c0_136 = arith.constant 0 : index
    %590 = vector.load %arg11[%c0_135, %c0_136] : memref<8x8xf32, #tpu.memory_space<vmem>>, vector<8x8xf32>
    tpu.vector_store %arg11[%c0_135, %c0_136], %582 {strides = array<i32>} : memref<8x8xf32, #tpu.memory_space<vmem>>, vector<8x8xf32>,
    return
  }
  func.func @transform_0(%arg0: i32) -> (i32, i32) {
    %c0_i32 = arith.constant 0 : i32
    %c0_i32_0 = arith.constant 0 : i32
    return %arg0, %c0_i32 : i32, i32
  }
  func.func @transform_1(%arg0: i32) -> (i32, i32, i32) {
    %c0_i32 = arith.constant 0 : i32
    %c0_i32_0 = arith.constant 0 : i32
    %c0_i32_1 = arith.constant 0 : i32
    return %c0_i32, %arg0, %c0_i32_0 : i32, i32, i32
  }
  func.func @transform_2(%arg0: i32) -> (i32, i32) {
    %c0_i32 = arith.constant 0 : i32
    %c0_i32_0 = arith.constant 0 : i32
    %c0_i32_1 = arith.constant 0 : i32
    return %c0_i32, %c0_i32_0 : i32, i32
  }
  func.func @transform_3(%arg0: i32) -> (i32, i32) {
    %c0_i32 = arith.constant 0 : i32
    %c0_i32_0 = arith.constant 0 : i32
    %c0_i32_1 = arith.constant 0 : i32
    return %c0_i32, %c0_i32_0 : i32, i32
  }
  func.func @transform_4(%arg0: i32) -> (i32, i32) {
    %c0_i32 = arith.constant 0 : i32
    %c0_i32_0 = arith.constant 0 : i32
    %c0_i32_1 = arith.constant 0 : i32
    return %c0_i32, %c0_i32_0 : i32, i32
  }
  func.func @transform_5(%arg0: i32) -> (i32, i32) {
    %c0_i32 = arith.constant 0 : i32
    %c0_i32_0 = arith.constant 0 : i32
    %c0_i32_1 = arith.constant 0 : i32
    return %c0_i32, %c0_i32_0 : i32, i32
  }
  func.func @transform_6(%arg0: i32) -> (i32, i32) {
    %c0_i32 = arith.constant 0 : i32
    %c0_i32_0 = arith.constant 0 : i32
    %c0_i32_1 = arith.constant 0 : i32
    return %c0_i32, %c0_i32_0 : i32, i32
  }
  func.func @transform_7(%arg0: i32) -> (i32, i32, i32) {
    %c0_i32 = arith.constant 0 : i32
    %c0_i32_0 = arith.constant 0 : i32
    %c0_i32_1 = arith.constant 0 : i32
    return %c0_i32, %arg0, %c0_i32_0 : i32, i32, i32
  }
  func.func @transform_8(%arg0: i32) -> (i32, i32, i32) {
    %c0_i32 = arith.constant 0 : i32
    %c0_i32_0 = arith.constant 0 : i32
    %c0_i32_1 = arith.constant 0 : i32
    return %c0_i32, %arg0, %c0_i32_0 : i32, i32, i32
  }
  func.func @transform_9(%arg0: i32) -> (i32, i32) {
    %c0_i32 = arith.constant 0 : i32
    %c0_i32_0 = arith.constant 0 : i32
    return %arg0, %c0_i32 : i32, i32
  }
  func.func @transform_10(%arg0: i32) -> (i32, i32) {
    %c0_i32 = arith.constant 0 : i32
    %c0_i32_0 = arith.constant 0 : i32
    return %arg0, %c0_i32 : i32, i32
  }
}

</mosaic_0001>

<bundles_post_ra>
// kernel: tpu_custom_call.1
= control target key start
LH: loop header
LB: loop body
LE: loop exit
PB: predicated region body
PF: predicated region fallthrough
CT: control target
= control target key end

     0   :  { %s6001_s0 = inlined_call_operand.vmem [shape: s32[16,1], index: 0, kind: input, shape index: {}]   ;;  %s6002_s1 = inlined_call_operand.hbm [shape: f32[8,16,32], index: 1, kind: input, shape index: {}]   ;;  %s6003_s2 = inlined_call_operand.hbm [shape: f32[32,512], index: 2, kind: input, shape index: {}]   ;;  %s6004_s3 = inlined_call_operand.hbm [shape: f32[128,512], index: 3, kind: input, shape index: {}]   ;;  %s6005_s4 = inlined_call_operand.vmem [shape: f32[1,512], index: 4, kind: input, shape index: {}]   ;;  %s6006_s5 = inlined_call_operand.hbm [shape: f32[128,128], index: 5, kind: input, shape index: {}]   ;;  %s6007_s6 = inlined_call_operand.vmem [shape: f32[1,128], index: 6, kind: input, shape index: {}]   ;;  %s6008_s7 = inlined_call_operand.hbm [shape: f32[8,16,128], index: 7, kind: output, shape index: {0}]   ;;  %s6009_s8 = inlined_call_operand.hbm [shape: f32[8,16,128], index: 8, kind: output, shape index: {1}]   ;;  %s6010_s9 = inlined_call_operand.hbm [shape: f32[16,128], index: 9, kind: output, shape index: {2}]   ;;  %s6011_s10 = inlined_call_operand.vmem [shape: f32[16,8], index: 10, kind: output, shape index: {3}]  }
   0x1   :  { %6208 = sst [smem:[#allocation75_spill]] %s6003_s2 }
   0x2   :  { %6209 = sst [smem:[#allocation76_spill]] %s6004_s3 }
   0x3   :  { %6210 = sst [smem:[#allocation77_spill]] %s6011_s10 }
   0x4   :  { %16 = vsyncpa [#allocation3], 0 }
   0x5   :  { %18 = vsyncpa [#allocation3 + $0x1], 0 }
   0x6   :  { %19 = vsyncpa [#allocation6], 0 }
   0x7   :  { %20 = vsyncpa [#allocation9], 0 }
   0x8   :  { %21 = vsyncpa [#allocation4], 0 }
   0x9   :  { %23 = vsyncpa [#allocation4 + $0x1], 0 }
   0xa   :  { %24 = vsyncpa [#allocation12], 0 }
   0xb   :  { %26 = vsyncpa [#allocation12 + $0x1], 0  ;;  %s4451_s13 = smov 0   ;;  %s4453_s14 = smov 0  }
   0xc   :  { %s4455_s15 = smov 0   ;;  %s4457_s16 = smov 0  }
   0xd LB: > { %6211 = sst [smem:[#allocation19_spill]] %s4364_s13  ;;  %s4472_s17 = sadd.s32 4294967295, %s4376_s16   ;;  %s4376_s16 = sphi %s4457_s16, %s6563_s16   ;;  %s4372_s15 = sphi %s4455_s15, %s6567_s15   ;;  %s4368_s14 = sphi %s4453_s14, %s6566_s14   ;;  %s4364_s13 = sphi %s4451_s13, %s6565_s13  }
   0xe   : > { %s6014_s18 = sadd.s32 4294967294, %s4376_s16   ;;  %s4476_s19 = sadd.s32 1, %s4376_s16  }
   0xf   : > { %6212 = sst [smem:[#allocation20_spill]] %s4476_s19  ;;  %s65_s20 = sadd.s32 1, %s4372_s15 }
  0x10   : > { %s62_s21 = ssub.s32 %s4376_s16, %s4476_s19  ;;  %p72_p0 = scmp.ne.s32.totalorder %s4372_s15, %s4368_s14 }
  0x11   : > { %p63_p1 = scmp.eq.s32.totalorder %s62_s21, 0  ;;  %p73_p2 = scmp.eq.s32.totalorder %s4376_s16, 0 }
  0x12   : > { %p78_p3 = scmp.ne.s32.totalorder %s4368_s14, %s4364_s13  ;;  %p6013_p4 = scmp.eq.s32.totalorder %s4472_s17, 0 }
  0x13   : > { %s4488_s22 = scalar_select %p63_p1, %s4372_s15, %s65_s20  }
  0x14   : > { %p4490_p5 = por %p73_p2, %p72_p0  ;;  %p4496_p6 = por %p6013_p4, %p78_p3 }
  0x15   : > { %6213 = sst [smem:[#allocation21_spill]] %s4488_s22  ;;  %p207_p7 = scmp.eq.s32.totalorder %s4472_s17, 1 }
  0x16   : > { %s6215_s24 = scalar_select %p4496_p6, 1, 0 }
  0x17   : > { %p213_p8 = scmp.eq.s32.totalorder %s6014_s18, 1  ;;  %p3673_p9 = scmp.ge.s32.totalorder %s4376_s16, 1 }
  0x18   : > { %p298_p10 = scmp.lt.s32.totalorder %s4376_s16, 3  ;;  %p4505_p11 = por %p207_p7, %p72_p0 }
  0x19   : > { %p4509_p12 = por %p213_p8, %p78_p3  ;;  %s4378_s28 = smov [#allocation5]  }
  0x1a   : > { %s6216_s25 = scalar_select %p4505_p11, 1, 0 }
  0x1b   : > { %s6217_s26 = scalar_select %p4509_p12, 1, 0 }
  0x1c   : > { %p4513_p13 = pnand %p3673_p9, %p298_p10  ;;  %s310_s29 = sshll.u32 %s4378_s28, 4  ;;  %s311_s29 = int_to_ptr.vmem [resolvable:$true] %s310_s29 }
  0x1d   : > { %6218 = sst [smem:[#allocation22_spill]] %s6217_s26  ;;  %p3869_p3 = scmp.lt.s32.totalorder %s4376_s16, 2 }
  0x1e   : > { %s6219_s27 = scalar_select %p4513_p13, 1, 0 }
  0x1f   : > { %p3842_p1 = pneg %p4513_p13  ;;  %s4379_s11 = smov [#allocation7]  }
  0x20   : > { %s323_s12 = sshll.u32 %s4379_s11, 4  ;;  %s4153_s20 = scalar_lea.vmem %s311_s29, 2048  ;;  %s324_s12 = int_to_ptr.vmem [resolvable:$true] %s323_s12 }
  0x21   : > { %p4521_p2 = pnand %p3842_p1, %p6013_p4  ;;  %p4154_p8 = scmp.ne.s32.totalorder %s311_s29, %s4153_s20 }
  0x22   : > { %p4161_p12 = scmp.lt.s32.totalorder %s311_s29, %s311_s29  ;;  %p4162_p11 = scmp.lt.s32.totalorder %s4153_s20, %s4153_s20 }
  0x23   : > { %p4144_p7 = pneg %p4521_p2 }
  0x24   : > { %p4163_p1 = por %p4162_p11, %p4161_p12 }
  0x25   : > { %p4156_p9 = pnand %p4154_p8, %p4144_p7 }
  0x27   : > { %p4157_p10 = pneg %p4156_p9 }
  0x29   : > { %p4164_p4 = pnand %p4163_p1, %p4157_p10 }
  0x2b   : > { %4167 = shalt.err (!%p4164_p4)
}
  0x2c   : > { %s4380_s21 = smov 512   ;;  %s4381_s28 = smov 32  }
  0x2d   : > { %s6221_s2 = sld [smem:[#allocation75_spill]]  ;;  %p4541_p8 = pnand %p3869_p3, %p4490_p5 }
  0x2e   : > { %s4179_s20 = scalar_lea.vmem %s324_s12, 8192  ;;  %p4187_p9 = scmp.lt.s32.totalorder %s324_s12, %s324_s12 }
  0x2f   : > { %p4180_p4 = scmp.ne.s32.totalorder %s324_s12, %s4179_s20  ;;  %p4188_p10 = scmp.lt.s32.totalorder %s4179_s20, %s4179_s20 }
  0x31   : > { %p4182_p11 = pnand %p4180_p4, %p4144_p7  ;;  %p4189_p1 = por %p4188_p10, %p4187_p9 }
  0x33   : > { %3845 = dma.hbm_to_vmem [thread:$0]  (!%p4521_p2), %s6221_s2, 2048, %s311_s29, [#allocation6], %s4380_s21, %s4380_s21, %s4381_s28  }
  0x34   : > { %p4183_p12 = pneg %p4182_p11 }
  0x36   : > { %p4190_p0 = pnand %p4189_p1, %p4183_p12 }
  0x38   : > { %4193 = shalt.err (!%p4190_p0)
}
  0x39   : > { %s6223_s3 = sld [smem:[#allocation76_spill]]  ;;  %s4382_s29 = smov [#allocation8]  }
  0x3a   : > { %s339_s11 = sshll.u32 %s4382_s29, 4  ;;  %s340_s11 = int_to_ptr.vmem [resolvable:$true] %s339_s11 }
  0x3b   : > { %s4205_s2 = scalar_lea.vmem %s340_s11, 2048  ;;  %p4213_p11 = scmp.lt.s32.totalorder %s340_s11, %s340_s11 }
  0x3c   : > { %p4206_p5 = scmp.ne.s32.totalorder %s340_s11, %s4205_s2  ;;  %p4214_p9 = scmp.lt.s32.totalorder %s4205_s2, %s4205_s2 }
  0x3e   : > { %p4208_p3 = pnand %p4206_p5, %p4144_p7  ;;  %p4215_p12 = por %p4214_p9, %p4213_p11 }
  0x3f   : > { %3848 = dma.hbm_to_vmem [thread:$0]  (!%p4521_p2), %s6223_s3, 8192, %s324_s12, [#allocation6], %s4380_s21, %s4380_s21, %s4381_s28  }
  0x40   : > { %p4209_p4 = pneg %p4208_p3 }
  0x42   : > { %p4216_p0 = pnand %p4215_p12, %p4209_p4 }
  0x44   : > { %4219 = shalt.err (!%p4216_p0)
}
  0x45   : > { %s4383_s20 = smov 128   ;;  %s4384_s12 = smov 8  }
  0x46   : > { %3851 = dma.hbm_to_vmem [thread:$0]  (!%p4521_p2), %s6006_s5, 2048, %s340_s11, [#allocation9], %s4383_s20, %s4383_s20, %s4384_s12  }
  0x47   : > { %s363_s18 = sand.u32 1, %s4372_s15   ;;  %s3679_s23 = sshll.u32 %s4376_s16, 7 }
  0x48   : > { %s3678_s2 = sshll.u32 %s363_s18, 6  ;;  %s4569_s19 = scalar_lea.hbm %s6002_s1, %s3679_s23 }
  0x49   : > { %s367_s26 = scalar_lea.vmem [#allocation2], %s3678_s2  ;;  %s4573_s13 = scalar_lea.sflag [#allocation3], %s363_s18 }
  0x4a   : > { %s373_s30 = sshll.u32 %s367_s26, 4  ;;  %s4220_s10 = scalar_lea.hbm %s4569_s19, 1024  ;;  %s4571_s30 = int_to_ptr.vmem [resolvable:$true] %s373_s30 }
  0x4b   : > { %p4221_p7 = scmp.ne.s32.totalorder %s4569_s19, %s4220_s10  ;;  %p4222_p2 = pneg %p4541_p8 }
  0x4c   : > { %s4225_s3 = scalar_lea.hbm %s6002_s1, 2048  ;;  %p4226_p5 = scmp.lt.s32.totalorder %s4569_s19, %s6002_s1 }
  0x4d   : > { %p4223_p10 = pnand %p4222_p2, %p4221_p7  ;;  %p4227_p3 = scmp.lt.s32.totalorder %s4225_s3, %s4220_s10 }
  0x4f   : > { %p4224_p1 = pneg %p4223_p10  ;;  %p4228_p4 = por %p4227_p3, %p4226_p5 }
  0x51   : > { %p4229_p11 = pnand %p4228_p4, %p4224_p1 }
  0x53   : > { %4232 = shalt.err (!%p4229_p11)
}
  0x54   : > { %s4233_s26 = scalar_lea.vmem %s4571_s30, 1024  ;;  %s4385_s18 = smov [#allocation2]  }
  0x55   : > { %p4234_p9 = scmp.ne.s32.totalorder %s4571_s30, %s4233_s26  ;;  %s4238_s2 = sshll.u32 %s4385_s18, 4  ;;  %s4239_s2 = int_to_ptr.vmem [resolvable:$false] %s4238_s2 }
  0x56   : > { %s4240_s29 = scalar_lea.vmem %s4239_s2, 2048  ;;  %p4241_p7 = scmp.lt.s32.totalorder %s4571_s30, %s4239_s2 }
  0x57   : > { %p4236_p12 = pnand %p4234_p9, %p4222_p2  ;;  %p4242_p10 = scmp.lt.s32.totalorder %s4240_s29, %s4233_s26 }
  0x59   : > { %p4237_p0 = pneg %p4236_p12  ;;  %p4243_p6 = por %p4242_p10, %p4241_p7 }
  0x5b   : > { %p4244_p13 = pnand %p4243_p6, %p4237_p0 }
  0x5d   : > { %4247 = shalt.err (!%p4244_p13)
}
  0x5e   : > { %s4386_s10 = smov 256   ;;  %p6224_p2 = scmp.ne.s32.totalorder %s6219_s27, 0 }
  0x5f   : > { %3855 = dma.hbm_to_vmem [thread:$0]  (!%p4541_p8), %s4569_s19, 1024, %s4571_s30, %s4573_s13, %s4386_s10, %s4383_s20, %s4384_s12  }
  0x60   : > { %385 = sbr.rel (%p6224_p2) target bundleno = 2487 (0x9b7), region = 48 }
  0x65   : > { %s4599_s11 = sand.u32 1, %s4368_s14   ;;  %p6225_p6 = scmp.ne.s32.totalorder %s6215_s24, 0 }
  0x66   : > { %s4602_s21 = sshll.u32 %s4599_s11, 6  ;;  %s388_s3 = scalar_lea.sflag [#allocation3], %s4599_s11 }
  0x67   : > { %s4606_s22 = scalar_lea.vmem [#allocation2], %s4602_s21 }
  0x68   : > { %4343 = dma.done.wait (%p6225_p6), %s388_s3, 1024  }
  0x69   : > { %4345 = vsyncadd (%p6225_p6), %s388_s3, 4294966272  ;;  %p6226_p13 = scmp.eq.s32.totalorder %s4472_s17, 0 }
  0x6b   : > { %4347 = dma.done.wait (%p6226_p13), [#allocation6], 10240   ;;  %p6227_p8 = pmov %p6226_p13 }
  0x6d   : > { %4349 = vsyncadd (%p6227_p8), [#allocation6], 4294957056  ;;  %p6228_p1 = pmov %p6227_p8 }
  0x6f   : > { %4351 = dma.done.wait (%p6228_p1), [#allocation9], 2048   ;;  %p6229_p5 = pmov %p6228_p1 }
  0x70   : > { %v6023_v0 = vmov 0.0   ;;  %v6021_v1 = vmov 0   ;;  %v4624_v2 = vld [vmem:[#allocation7 + $0x1f8] sm:$0xff]  ;;  %v4626_v3 = vld [vmem:[#allocation7 + $0x1f0] sm:$0xff]  ;;  %v4636_v7 = vld [vmem:[#allocation7 + $0x1e8] sm:$0xff]  ;;  %p458_p3 = scmp.lt.s32.totalorder %s4472_s17, 1 }
  0x71   : > { %4353 = vsyncadd (%p6229_p5), [#allocation9], 4294965248  ;;  %686 = vmatprep.mubr.f32.mxu1 %v6023_v0  ;;  %615 = vmatprep.mubr.f32.mxu0 %v6023_v0  ;;  %v4628_v4 = vld [vmem:[#allocation7 + $0x1d8] sm:$0xff]  ;;  %v4631_v5 = vld [vmem:[#allocation7 + $0x1d0] sm:$0xff]  ;;  %6230 = vst [vmem:[#allocation23_spill] sm:$0xff] %v4636_v7  ;;  %vm693_vm2 = vcmask 261120  }
  0x72   : > { %3920 = vset.pattern.permute.xlu0 %v6021_v1  ;;  %3921 = vset.pattern.permute.xlu1 %v6021_v1  ;;  %v4634_v6 = vld [vmem:[#allocation7 + $0x1b8] sm:$0xff]  ;;  %v4638_v8 = vld [vmem:[#allocation7 + $0x1e0] sm:$0xff]  ;;  %v4641_v9 = vld [vmem:[#allocation7 + $0x1b0] sm:$0xff]  ;;  %s4748_s13 = scalar_select %p458_p3, %s4472_s17, 1 }
  0x73   : > { %622 = vmatprep.subr.mxu1 %v4624_v2  ;;  %551 = vmatprep.subr.mxu0 %v4636_v7  ;;  %v4644_v10 = vld [vmem:[#allocation7 + $0x1c8] sm:$0xff]  ;;  %v4647_v11 = vld [vmem:[#allocation7 + $0x198] sm:$0xff]  ;;  %v4650_v12 = vld [vmem:[#allocation7 + $0x1c0] sm:$0xff]  ;;  %s5004_s28 = scalar_lea.vmem [#allocation11], %s4602_s21  ;;  %s5013_s23 = scalar_lea.vmem [#allocation10], %s4602_s21 }
  0x74   : > { %623 = vmatpush1.msra.mxu1 %v4626_v3  ;;  %552 = vmatpush1.msra.mxu0 %v4638_v8  ;;  %v4652_v13 = vld [vmem:[#allocation7 + $0x1a8] sm:$0xff]  ;;  %v4655_v14 = vld [vmem:[#allocation7 + $0x190] sm:$0xff]  ;;  %v4658_v15 = vld [vmem:[#allocation7 + $0x1a0] sm:$0xff]  ;;  %s6207_s19 = sshll.u32 %s4748_s13, 3  ;;  %s3457_s26 = sshll.u32 %s5004_s28, 4  ;;  %s5881_s26 = int_to_ptr.vmem [resolvable:$true] %s3457_s26 }
  0x75   : > { %624 = vmatprep.subr.mxu1 %v4628_v4  ;;  %553 = vmatprep.subr.mxu0 %v4644_v10  ;;  %v4661_v16 = vld [vmem:[#allocation7 + $0x178] sm:$0xff]  ;;  %v4664_v17 = vld [vmem:[#allocation7 + $0x188] sm:$0xff]  ;;  %v4667_v18 = vld [vmem:[#allocation7 + $0x170] sm:$0xff]  ;;  %s461_s20 = scalar_lea.vmem %s6001_s0, %s6207_s19  ;;  %s3442_s18 = sshll.u32 %s5013_s23, 4  ;;  %s5883_s18 = int_to_ptr.vmem [resolvable:$true] %s3442_s18 }
  0x76   : > { %625 = vmatpush1.msra.mxu1 %v4631_v5  ;;  %554 = vmatpush1.msra.mxu0 %v4650_v12  ;;  %v4670_v19 = vld [vmem:[#allocation7 + $0x180] sm:$0xff]  ;;  %v4673_v20 = vld [vmem:[#allocation7 + $0x158] sm:$0xff]  ;;  %v4676_v21 = vld [vmem:[#allocation7 + $0x168] sm:$0xff]  ;;  %s3420_s2 = sand.u32 1, %s4472_s17   ;;  %s5889_s29 = sshll.u32 %s4472_s17, 7 }
  0x77   : > { %626 = vmatprep.subr.mxu1 %v4634_v6  ;;  %555 = vmatprep.subr.mxu0 %v4652_v13  ;;  %v4679_v22 = vld [vmem:[#allocation7 + $0x150] sm:$0xff]  ;;  %v4682_v23 = vld [vmem:[#allocation7 + $0x160] sm:$0xff]  ;;  %v4685_v24 = vld [vmem:[#allocation7 + $0x138] sm:$0xff]  ;;  %s5895_s3 = scalar_lea.hbm %s6009_s8, %s5889_s29  ;;  %s4248_s24 = scalar_lea.vmem %s5881_s26, 1024 }
  0x78   : > { %627 = vmatpush1.msra.mxu1 %v4641_v9  ;;  %556 = vmatpush1.msra.mxu0 %v4658_v15  ;;  %6231 = vst [vmem:[#allocation24_spill] sm:$0xff] %v4685_v24  ;;  %v4688_v25 = vld [vmem:[#allocation7 + $0x148] sm:$0xff]  ;;  %v4691_v26 = vld [vmem:[#allocation7 + $0x130] sm:$0xff]  ;;  %v4694_v27 = vld [vmem:[#allocation7 + $0x140] sm:$0xff]  ;;  %p4249_p4 = scmp.ne.s32.totalorder %s5881_s26, %s4248_s24  ;;  %p6553_p11 = scmp.ne.s32.totalorder %s6216_s25, 0 }
  0x79   : > { %628 = vmatprep.subr.mxu1 %v4647_v11  ;;  %557 = vmatprep.subr.mxu0 %v4664_v17  ;;  %6232 = vst [vmem:[#allocation25_spill] sm:$0xff] %v4691_v26  ;;  %v4697_v28 = vld [vmem:[#allocation7 + $0x118] sm:$0xff]  ;;  %v4700_v29 = vld [vmem:[#allocation7 + $0x128] sm:$0xff]  ;;  %v4703_v30 = vld [vmem:[#allocation7 + $0x110] sm:$0xff]  ;;  %s4390_s27 = smov [#allocation11]  }
  0x7a   : > { %629 = vmatpush1.msra.mxu1 %v4655_v14  ;;  %558 = vmatpush1.msra.mxu0 %v4670_v19  ;;  %6233 = vst [vmem:[#allocation26_spill] sm:$0xff] %v4697_v28  ;;  %6234 = vst [vmem:[#allocation27_spill] sm:$0xff] %v4700_v29  ;;  %v4706_v31 = vld [vmem:[#allocation7 + $0x120] sm:$0xff]  ;;  %v4709_v32 = vld [vmem:[#allocation7 + $0xf8] sm:$0xff]  ;;  %p4250_p9 = pnand %p4249_p4, %p6553_p11 }
  0x7b   : > { %630 = vmatprep.subr.mxu1 %v4661_v16  ;;  %559 = vmatprep.subr.mxu0 %v4676_v21  ;;  %6235 = vst [vmem:[#allocation28_spill] sm:$0xff] %v4703_v30  ;;  %6236 = vst [vmem:[#allocation29_spill] sm:$0xff] %v4706_v31  ;;  %v4712_v33 = vld [vmem:[#allocation7 + $0x108] sm:$0xff]  ;;  %v4715_v34 = vld [vmem:[#allocation7 + $0xf0] sm:$0xff] }
  0x7c   : > { %631 = vmatpush1.msra.mxu1 %v4667_v18  ;;  %560 = vmatpush1.msra.mxu0 %v4682_v23  ;;  %6237 = vst [vmem:[#allocation30_spill] sm:$0xff] %v4709_v32  ;;  %6238 = vst [vmem:[#allocation31_spill] sm:$0xff] %v4712_v33  ;;  %v4718_v35 = vld [vmem:[#allocation7 + $0x100] sm:$0xff]  ;;  %v4722_v36 = vld [vmem:[#allocation7 + $0xd8] sm:$0xff]  ;;  %p4251_p12 = pneg %p4250_p9 }
  0x7d   : > { %632 = vmatprep.subr.mxu1 %v4673_v20  ;;  %561 = vmatprep.subr.mxu0 %v4688_v25  ;;  %6239 = vst [vmem:[#allocation32_spill] sm:$0xff] %v4715_v34  ;;  %6240 = vst [vmem:[#allocation33_spill] sm:$0xff] %v4718_v35  ;;  %v4725_v37 = vld [vmem:[#allocation7 + $0xe8] sm:$0xff]  ;;  %v4728_v38 = vld [vmem:[#allocation7 + $0xd0] sm:$0xff] }
  0x7e   : > { %633 = vmatpush1.msra.mxu1 %v4679_v22  ;;  %562 = vmatpush1.msra.mxu0 %v4694_v27  ;;  %6241 = vst [vmem:[#allocation34_spill] sm:$0xff] %v4722_v36  ;;  %6242 = vst [vmem:[#allocation35_spill] sm:$0xff] %v4725_v37  ;;  %v4731_v39 = vld [vmem:[#allocation7 + $0xe0] sm:$0xff]  ;;  %v4734_v40 = vld [vmem:[#allocation7 + $0xb8] sm:$0xff] }
  0x7f   : > { %634 = vmatprep.subr.mxu1 %v4685_v24  ;;  %563 = vmatprep.subr.mxu0 %v4700_v29  ;;  %6243 = vst [vmem:[#allocation36_spill] sm:$0xff] %v4728_v38  ;;  %6244 = vst [vmem:[#allocation37_spill] sm:$0xff] %v4731_v39  ;;  %v4737_v41 = vld [vmem:[#allocation7 + $0xc8] sm:$0xff]  ;;  %v4740_v42 = vld [vmem:[#allocation7 + $0xb0] sm:$0xff] }
  0x80   : > { %635 = vmatpush1.msra.mxu1 %v4691_v26  ;;  %564 = vmatpush1.msra.mxu0 %v4706_v31  ;;  %6245 = vst [vmem:[#allocation38_spill] sm:$0xff] %v4734_v40  ;;  %6246 = vst [vmem:[#allocation39_spill] sm:$0xff] %v4737_v41  ;;  %v4743_v43 = vld [vmem:[#allocation7 + $0xc0] sm:$0xff]  ;;  %v4751_v44 = vld [vmem:[#allocation7 + $0x98] sm:$0xff] }
  0x81   : > { %636 = vmatprep.subr.mxu1 %v4697_v28  ;;  %565 = vmatprep.subr.mxu0 %v4712_v33  ;;  %6247 = vst [vmem:[#allocation40_spill] sm:$0xff] %v4740_v42  ;;  %6248 = vst [vmem:[#allocation41_spill] sm:$0xff] %v4743_v43  ;;  %v4754_v45 = vld [vmem:[#allocation7 + $0xa8] sm:$0xff]  ;;  %v4757_v46 = vld [vmem:[#allocation7 + $0x90] sm:$0xff] }
  0x82   : > { %637 = vmatpush1.msra.mxu1 %v4703_v30  ;;  %566 = vmatpush1.msra.mxu0 %v4718_v35  ;;  %6249 = vst [vmem:[#allocation42_spill] sm:$0xff] %v4751_v44  ;;  %6250 = vst [vmem:[#allocation43_spill] sm:$0xff] %v4754_v45  ;;  %v4760_v47 = vld [vmem:[#allocation7 + $0xa0] sm:$0xff]  ;;  %v4763_v48 = vld [vmem:[#allocation7 + $0x78] sm:$0xff] }
  0x83   : > { %638 = vmatprep.subr.mxu1 %v4709_v32  ;;  %567 = vmatprep.subr.mxu0 %v4725_v37  ;;  %6251 = vst [vmem:[#allocation44_spill] sm:$0xff] %v4757_v46  ;;  %6252 = vst [vmem:[#allocation45_spill] sm:$0xff] %v4760_v47  ;;  %v4766_v49 = vld [vmem:[#allocation7 + $0x88] sm:$0xff]  ;;  %v4769_v50 = vld [vmem:[#allocation7 + $0x70] sm:$0xff] }
  0x84   : > { %639 = vmatpush1.msra.mxu1 %v4715_v34  ;;  %568 = vmatpush1.msra.mxu0 %v4731_v39  ;;  %6253 = vst [vmem:[#allocation46_spill] sm:$0xff] %v4763_v48  ;;  %6254 = vst [vmem:[#allocation47_spill] sm:$0xff] %v4766_v49  ;;  %v4772_v51 = vld [vmem:[#allocation7 + $0x80] sm:$0xff]  ;;  %v4776_v52 = vld [vmem:[#allocation7 + $0x58] sm:$0xff] }
  0x85   : > { %640 = vmatprep.subr.mxu1 %v4722_v36  ;;  %569 = vmatprep.subr.mxu0 %v4737_v41  ;;  %6255 = vst [vmem:[#allocation48_spill] sm:$0xff] %v4769_v50  ;;  %6256 = vst [vmem:[#allocation49_spill] sm:$0xff] %v4772_v51  ;;  %v4779_v53 = vld [vmem:[#allocation7 + $0x68] sm:$0xff]  ;;  %v4782_v54 = vld [vmem:[#allocation7 + $0x50] sm:$0xff] }
  0x86   : > { %641 = vmatpush1.msra.mxu1 %v4728_v38  ;;  %570 = vmatpush1.msra.mxu0 %v4743_v43  ;;  %6257 = vst [vmem:[#allocation50_spill] sm:$0xff] %v4776_v52  ;;  %6258 = vst [vmem:[#allocation51_spill] sm:$0xff] %v4779_v53  ;;  %v4785_v55 = vld [vmem:[#allocation7 + $0x60] sm:$0xff]  ;;  %v4788_v56 = vld [vmem:[#allocation7 + $0x38] sm:$0xff] }
  0x87   : > { %642 = vmatprep.subr.mxu1 %v4734_v40  ;;  %571 = vmatprep.subr.mxu0 %v4754_v45  ;;  %6259 = vst [vmem:[#allocation52_spill] sm:$0xff] %v4782_v54  ;;  %6260 = vst [vmem:[#allocation53_spill] sm:$0xff] %v4785_v55  ;;  %v4791_v57 = vld [vmem:[#allocation7 + $0x48] sm:$0xff]  ;;  %v4799_v58 = vld [vmem:[#allocation7 + $0x30] sm:$0xff] }
  0x88   : > { %643 = vmatpush1.msra.mxu1 %v4740_v42  ;;  %572 = vmatpush1.msra.mxu0 %v4760_v47  ;;  %6261 = vst [vmem:[#allocation54_spill] sm:$0xff] %v4788_v56  ;;  %6262 = vst [vmem:[#allocation55_spill] sm:$0xff] %v4791_v57  ;;  %v4802_v59 = vld [vmem:[#allocation7 + $0x40] sm:$0xff]  ;;  %v4805_v60 = vld [vmem:[#allocation7 + $0x18] sm:$0xff] }
  0x89   : > { %644 = vmatprep.subr.mxu1 %v4751_v44  ;;  %573 = vmatprep.subr.mxu0 %v4766_v49  ;;  %6263 = vst [vmem:[#allocation56_spill] sm:$0xff] %v4799_v58  ;;  %6264 = vst [vmem:[#allocation57_spill] sm:$0xff] %v4802_v59  ;;  %v4808_v61 = vld [vmem:[#allocation7 + $0x28] sm:$0xff]  ;;  %v4811_v62 = vld [vmem:[#allocation7 + $0x10] sm:$0xff] }
  0x8a   : > { %645 = vmatpush1.msra.mxu1 %v4757_v46  ;;  %574 = vmatpush1.msra.mxu0 %v4772_v51  ;;  %6265 = vst [vmem:[#allocation58_spill] sm:$0xff] %v4805_v60  ;;  %6266 = vst [vmem:[#allocation59_spill] sm:$0xff] %v4808_v61  ;;  %v4814_v63 = vld [vmem:[#allocation7 + $0x20] sm:$0xff]  ;;  %v4819_v0 = vld [vmem:[#allocation5 + $0x68] sm:$0xff] }
  0x8b   : > { %646 = vmatprep.subr.mxu1 %v4763_v48  ;;  %575 = vmatprep.subr.mxu0 %v4779_v53  ;;  %6267 = vst [vmem:[#allocation60_spill] sm:$0xff] %v4811_v62  ;;  %6268 = vst [vmem:[#allocation61_spill] sm:$0xff] %v4814_v63  ;;  %v4816_v1 = vld [vmem:[%s461_s20] sm:$0xff]  ;;  %s4252_s20 = sshll.u32 %s4390_s27, 4  ;;  %s4253_s20 = int_to_ptr.vmem [resolvable:$false] %s4252_s20 }
  0x8c   : > { %647 = vmatpush1.msra.mxu1 %v4769_v50  ;;  %576 = vmatpush1.msra.mxu0 %v4785_v55  ;;  %6269 = vst [vmem:[#allocation62_spill] sm:$0xff] %v4816_v1  ;;  %6270 = vst [vmem:[#allocation63_spill] sm:$0xff] %v4819_v0  ;;  %v4832_v50 = vld [vmem:[#allocation7] sm:$0xff]  ;;  %vm888_vm0 = vcmp.gt.s32.totalorder %v4816_v1, 0  ;;  %vm1228_vm1 = vcmp.gt.s32.totalorder %v4816_v1, 1  ;;  %vm2260_vm3 = vcmp.gt.s32.totalorder %v4816_v1, 4  ;;  %p4255_p0 = scmp.lt.s32.totalorder %s5881_s26, %s4253_s20 }
  0x8d   : > { %648 = vmatprep.subr.mxu1 %v4776_v52  ;;  %577 = vmatprep.subr.mxu0 %v4791_v57  ;;  %v4829_v52 = vld [vmem:[#allocation5 + $0x48] sm:$0xff]  ;;  %6274 = vst [vmem:[#allocation67_spill] sm:$0xff] %v4832_v50  ;;  %vm2948_vm4 = vcmp.gt.s32.totalorder %v4816_v1, 6  ;;  %vm3292_vm5 = vcmp.gt.s32.totalorder %v4816_v1, 7  ;;  %vm1572_vm6 = vcmp.gt.s32.totalorder %v4816_v1, 2  ;;  %vm1916_vm7 = vcmp.gt.s32.totalorder %v4816_v1, 3 }
  0x8e   : > { %649 = vmatpush1.msra.mxu1 %v4782_v54  ;;  %578 = vmatpush1.msra.mxu0 %v4802_v59  ;;  %v4823_v54 = vld [vmem:[#allocation5 + $0x60] sm:$0xff]  ;;  %6273 = vst [vmem:[#allocation66_spill] sm:$0xff] %v4829_v52  ;;  %vm2604_vm8 = vcmp.gt.s32.totalorder %v4816_v1, 5  ;;  %s4254_s12 = scalar_lea.vmem %s4253_s20, 2048 }
  0x8f   : > { %650 = vmatprep.subr.mxu1 %v4788_v56  ;;  %6271 = vst [vmem:[#allocation64_spill] sm:$0xff] %v4823_v54  ;;  %579 = vmatprep.subr.mxu0 %v4808_v61  ;;  %v4826_v56 = vld [vmem:[#allocation7 + $0x8] sm:$0xff]  ;;  %v6279_v61 = vmov 0   ;;  %p4256_p7 = scmp.lt.s32.totalorder %s4254_s12, %s4248_s24 }
  0x90   : > { %651 = vmatpush1.msra.mxu1 %v4799_v58  ;;  %6272 = vst [vmem:[#allocation65_spill] sm:$0xff] %v4826_v56  ;;  %580 = vmatpush1.msra.mxu0 %v4814_v63  ;;  %v6275_v58 = vmov 0.0   ;;  %v4845_v63 = vld [vmem:[#allocation5 + $0x20] sm:$0xff]  ;;  %v889_v59 = vsel %vm888_vm0, 1, %v6279_v61 }
  0x91   : > { %652 = vmatprep.subr.mxu1 %v4805_v60  ;;  %v4837_v60 = vld [vmem:[#allocation5 + $0x40] sm:$0xff]  ;;  %581 = vmatprep.subr.mxu0 %v4826_v56  ;;  %6278 = vst [vmem:[#allocation70_spill] sm:$0xff] %v4845_v63  ;;  %v1229_v56 = vsel %vm1228_vm1, 1, %v6279_v61  ;;  %p4257_p10 = por %p4256_p7, %p4255_p0 }
  0x92   : > { %653 = vmatpush1.msra.mxu1 %v4811_v62  ;;  %6276 = vst [vmem:[#allocation68_spill] sm:$0xff] %v4837_v60  ;;  %v4841_v62 = vld [vmem:[#allocation5 + $0x28] sm:$0xff]  ;;  %582 = vmatpush1.msra.mxu0 %v4832_v50  ;;  %v4861_v50 = vld [vmem:[#allocation5 + $0x78] sm:$0xff] }
  0x93   : > { %687 = vmatmul.mubr.f32.vlgmr.msra.gmra.mxu1 %v6275_v58  ;;  %721 = vmatprep.subr.mxu1 %v4819_v0  ;;  %6277 = vst [vmem:[#allocation69_spill] sm:$0xff] %v4841_v62  ;;  %v4852_v0 = vld [vmem:[#allocation5 + $0x8] sm:$0xff]  ;;  %6282 = vst [vmem:[#allocation73_spill] sm:$0xff] %v4861_v50  ;;  %p4258_p2 = pnand %p4257_p10, %p4251_p12 }
  0x94   : > { %722 = vmatpush1.msra.mxu1 %v4823_v54  ;;  %616 = vmatmul.mubr.f32.vlgmr.msra.gmra.mxu0 %v6275_v58  ;;  %6280 = vst [vmem:[#allocation71_spill] sm:$0xff] %v4852_v0  ;;  %v4855_v54 = vld [vmem:[#allocation5] sm:$0xff] }
  0x95   : > { %723 = vmatprep.subr.mxu1 %v4829_v52  ;;  %6281 = vst [vmem:[#allocation72_spill] sm:$0xff] %v4855_v54  ;;  %761 = vmatprep.mubr.f32.mxu1 %v6275_v58  ;;  %v550_v52 = vld [vmem:[%s4606_s22] sm:$0xff] }
  0x96   : > { %724 = vmatpush1.msra.mxu1 %v4837_v60  ;;  %891 = vperm.xlu0 %3920, %v889_v59   ;;  %v4864_v60 = vld [vmem:[#allocation5 + $0x70] sm:$0xff] }
  0x97   : > { %725 = vmatprep.subr.mxu1 %v4841_v62  ;;  %6283 = vst [vmem:[#allocation74_spill] sm:$0xff] %v4864_v60  ;;  %913 = vmatprep.subr.mxu0 %v4636_v7  ;;  %v4868_v62 = vld [vmem:[#allocation5 + $0x58] sm:$0xff]  ;;  %v4876_v59 = vld [vmem:[#allocation5 + $0x50] sm:$0xff] }
  0x98   : > { %726 = vmatpush1.msra.mxu1 %v4845_v63  ;;  %914 = vmatpush1.msra.mxu0 %v4638_v8  ;;  %v4887_v63 = vld [vmem:[#allocation5 + $0x18] sm:$0xff] }
  0x99   : > { %727 = vmatprep.subr.mxu1 %v4852_v0  ;;  %v4880_v0 = vld [vmem:[#allocation5 + $0x38] sm:$0xff]  ;;  %915 = vmatprep.subr.mxu0 %v4644_v10 }
  0x9a   : > { %728 = vmatpush1.msra.mxu1 %v4855_v54  ;;  %v4884_v54 = vld [vmem:[#allocation5 + $0x30] sm:$0xff]  ;;  %1231 = vperm.xlu0 %3920, %v1229_v56   ;;  %v2949_v56 = vsel %vm2948_vm4, 1, %v6279_v61 }
  0x9b   : > { %3690 = vmatmul.mubr.msk.f32.vlgmr.msra.gmra.mxu1 %vm693_vm2, %v550_v52  ;;  %792 = vmatprep.subr.mxu1 %v4861_v50  ;;  %v2261_v50 = vsel %vm2260_vm3, 1, %v6279_v61 }
  0x9c   : > { %793 = vmatpush1.msra.mxu1 %v4864_v60  ;;  %832 = vmatprep.mubr.f32.mxu1 %v6275_v58  ;;  %v4894_v60 = vld [vmem:[#allocation5 + $0x10] sm:$0xff] }
  0x9d   : > { %794 = vmatprep.subr.mxu1 %v4868_v62  ;;  %916 = vmatpush1.msra.mxu0 %v4650_v12 }
  0x9e   : > { %795 = vmatpush1.msra.mxu1 %v4876_v59  ;;  %917 = vmatprep.subr.mxu0 %v4652_v13 }
  0x9f   : > { %796 = vmatprep.subr.mxu1 %v4880_v0  ;;  %2263 = vperm.xlu0 %3920, %v2261_v50   ;;  %v3293_v50 = vsel %vm3292_vm5, 1, %v6279_v61 }
  0xa0   : > { %797 = vmatpush1.msra.mxu1 %v4884_v54  ;;  %918 = vmatpush1.msra.mxu0 %v4658_v15 }
  0xa1   : > { %798 = vmatprep.subr.mxu1 %v4887_v63  ;;  %919 = vmatprep.subr.mxu0 %v4664_v17 }
  0xa2   : > { %799 = vmatpush1.msra.mxu1 %v4894_v60  ;;  %920 = vmatpush1.msra.mxu0 %v4670_v19 }
  0xa3   : > { %3691 = vmatmul.mubr.msk.f32.vlgmr.msra.gmra.mxu1 %vm693_vm2, %v550_v52  ;;  %984 = vmatprep.subr.mxu1 %v4624_v2  ;;  %v6284_v52 = vld [vmem:[#allocation57_spill] sm:$0xff] }
  0xa4   : > { %985 = vmatpush1.msra.mxu1 %v4626_v3  ;;  %2951 = vperm.xlu0 %3920, %v2949_v56   ;;  %v6285_v56 = vld [vmem:[#allocation48_spill] sm:$0xff] }
  0xa5   : > { %986 = vmatprep.subr.mxu1 %v4628_v4  ;;  %921 = vmatprep.subr.mxu0 %v4676_v21 }
  0xa6   : > { %987 = vmatpush1.msra.mxu1 %v4631_v5  ;;  %922 = vmatpush1.msra.mxu0 %v4682_v23 }
  0xa7   : > { %988 = vmatprep.subr.mxu1 %v4634_v6  ;;  %923 = vmatprep.subr.mxu0 %v4688_v25 }
  0xa8   : > { %989 = vmatpush1.msra.mxu1 %v4641_v9  ;;  %3295 = vperm.xlu0 %3920, %v3293_v50   ;;  %v6286_v50 = vld [vmem:[#allocation59_spill] sm:$0xff] }
  0xa9   : > { %990 = vmatprep.subr.mxu1 %v4647_v11  ;;  %924 = vmatpush1.msra.mxu0 %v4694_v27 }
  0xaa   : > { %991 = vmatpush1.msra.mxu1 %v4655_v14  ;;  %925 = vmatprep.subr.mxu0 %v4700_v29 }
  0xab   : > { %992 = vmatprep.subr.mxu1 %v4661_v16  ;;  %926 = vmatpush1.msra.mxu0 %v4706_v31 }
  0xac   : > { %993 = vmatpush1.msra.mxu1 %v4667_v18  ;;  %927 = vmatprep.subr.mxu0 %v4712_v33 }
  0xad   : > { %994 = vmatprep.subr.mxu1 %v4673_v20  ;;  %928 = vmatpush1.msra.mxu0 %v4718_v35 }
  0xae   : > { %995 = vmatpush1.msra.mxu1 %v4679_v22  ;;  %929 = vmatprep.subr.mxu0 %v4725_v37 }
  0xaf   : > { %996 = vmatprep.subr.mxu1 %v4685_v24  ;;  %930 = vmatpush1.msra.mxu0 %v4731_v39 }
  0xb0   : > { %997 = vmatpush1.msra.mxu1 %v4691_v26  ;;  %931 = vmatprep.subr.mxu0 %v4737_v41 }
  0xb1   : > { %998 = vmatprep.subr.mxu1 %v4697_v28  ;;  %932 = vmatpush1.msra.mxu0 %v4743_v43 }
  0xb2   : > { %999 = vmatpush1.msra.mxu1 %v4703_v30  ;;  %933 = vmatprep.subr.mxu0 %v4754_v45 }
  0xb3   : > { %1000 = vmatprep.subr.mxu1 %v4709_v32  ;;  %934 = vmatpush1.msra.mxu0 %v4760_v47 }
  0xb4   : > { %1001 = vmatpush1.msra.mxu1 %v4715_v34  ;;  %935 = vmatprep.subr.mxu0 %v4766_v49  ;;  %v6293_v34 = vld [vmem:[#allocation56_spill] sm:$0xff] }
  0xb5   : > { %1002 = vmatprep.subr.mxu1 %v4722_v36  ;;  %936 = vmatpush1.msra.mxu0 %v4772_v51  ;;  %v6291_v36 = vld [vmem:[#allocation54_spill] sm:$0xff] }
  0xb6   : > { %1003 = vmatpush1.msra.mxu1 %v4728_v38  ;;  %937 = vmatprep.subr.mxu0 %v4779_v53  ;;  %v6289_v38 = vld [vmem:[#allocation52_spill] sm:$0xff] }
  0xb7   : > { %1004 = vmatprep.subr.mxu1 %v4734_v40  ;;  %938 = vmatpush1.msra.mxu0 %v4785_v55  ;;  %v6287_v40 = vld [vmem:[#allocation50_spill] sm:$0xff] }
  0xb8   : > { %1005 = vmatpush1.msra.mxu1 %v4740_v42  ;;  %939 = vmatprep.subr.mxu0 %v4791_v57  ;;  %v6288_v42 = vld [vmem:[#allocation61_spill] sm:$0xff] }
  0xb9   : > { %1006 = vmatprep.subr.mxu1 %v4751_v44  ;;  %940 = vmatpush1.msra.mxu0 %v6284_v52  ;;  %v6290_v44 = vld [vmem:[#allocation65_spill] sm:$0xff] }
  0xba   : > { %1007 = vmatpush1.msra.mxu1 %v4757_v46  ;;  %941 = vmatprep.subr.mxu0 %v6286_v50  ;;  %v6292_v46 = vld [vmem:[#allocation67_spill] sm:$0xff] }
  0xbb   : > { %1008 = vmatprep.subr.mxu1 %v4763_v48  ;;  %942 = vmatpush1.msra.mxu0 %v6288_v42  ;;  %v6294_v48 = vld [vmem:[#allocation58_spill] sm:$0xff] }
  0xbc   : > { %1009 = vmatpush1.msra.mxu1 %v6285_v56  ;;  %943 = vmatprep.subr.mxu0 %v6290_v44  ;;  %v6295_v56 = vld [vmem:[#allocation60_spill] sm:$0xff] }
  0xbd   : > { %1010 = vmatprep.subr.mxu1 %v6287_v40  ;;  %944 = vmatpush1.msra.mxu0 %v6292_v46  ;;  %v6296_v40 = vld [vmem:[#allocation63_spill] sm:$0xff] }
  0xbe   : > { %1011 = vmatpush1.msra.mxu1 %v6289_v38  ;;  %977 = vmatprep.mubr.f32.mxu0 %v6275_v58 }
  0xbf   : > { %1012 = vmatprep.subr.mxu1 %v6291_v36  ;;  %1048 = vmatprep.mubr.f32.mxu1 %v6275_v58  ;;  %v1573_v36 = vsel %vm1572_vm6, 1, %v6279_v61 }
  0xc0   : > { %1013 = vmatpush1.msra.mxu1 %v6293_v34  ;;  %1257 = vmatprep.subr.mxu0 %v4636_v7  ;;  %v2605_v7 = vsel %vm2604_vm8, 1, %v6279_v61 }
  0xc1   : > { %1014 = vmatprep.subr.mxu1 %v6294_v48  ;;  %1575 = vperm.xlu1 %3921, %v1573_v36   ;;  %v1917_v48 = vsel %vm1916_vm7, 1, %v6279_v61  ;;  %v547_v36 = vld [vmem:[%s6005_s4] sm:$0xf] }
  0xc2   : > { %1015 = vmatpush1.msra.mxu1 %v6295_v56  ;;  %v6090_v56 = vlaneseq }
  0xc3   : > { %1082 = vmatprep.subr.mxu1 %v6296_v40 }
  0xc4   : > { %v841_v34 = vshrl.u32 %v6090_v56, 7 }
  0xc5   : > { %1919 = vperm.xlu1 %3921, %v1917_v48  }
  0xc6   : > { %v842_v40 = vsub.s32 0, %v841_v34  ;;  %v846_v46 = vsub.s32 1, %v841_v34  ;;  %v854_v28 = vsub.s32 3, %v841_v34 }
  0xc8   : > { %v4989_v48 = vrot.slane %v547_v36, %v842_v40  ;;  %v4991_v52 = vrot.slane %v547_v36, %v846_v46  ;;  %v4995_v40 = vrot.slane %v547_v36, %v854_v28 }
  0xc9   : > { %2607 = vperm.xlu1 %3921, %v2605_v7  }
 0x153   : > { %v688_v38 = vpop.f32.mrf.mxu1 }
 0x154   : > { %v617_v42 = vpop.f32.mrf.mxu0 }
 0x155   : > { %v690_v44 = vpop.f32.mrf.mxu1 }
 0x156   : > { %v619_v61 = vpop.f32.mrf.mxu0 }
 0x15b   : > { %v763_v50 = vpop.f32.mrf.mxu1 }
 0x15c   : > { %v764_v32 = vadd.f32 %v763_v50, %v617_v42  ;;  %v850_v42 = vsub.s32 2, %v841_v34 }
 0x15d   : > { %v765_v7 = vpop.f32.mrf.mxu1 }
 0x15e   : > { %v860_v1 = vadd.f32 %v4989_v48, %v764_v32  ;;  %v766_v56 = vadd.f32 %v765_v7, %v619_v61  ;;  %v4998_v51 = vrot.slane %v547_v36, %v850_v42 }
 0x160   : > { %v3692_v30 = vmul.f32 -1.442695, %v860_v1  ;;  %v861_v57 = vadd.f32 %v4991_v52, %v766_v56 }
 0x162   : > { %3932 = vpow2.f32 %v3692_v30  ;;  %v3693_v55 = vmul.f32 -1.442695, %v861_v57 }
 0x163   : > { %v834_v26 = vpop.f32.mrf.mxu1 }
 0x164   : > { %3934 = vpow2.f32 %v3693_v55  ;;  %v835_v50 = vadd.f32 %v834_v26, %v688_v38 }
 0x165   : > { %v836_v53 = vpop.f32.mrf.mxu1 }
 0x166   : > { %v837_v24 = vadd.f32 %v836_v53, %v690_v44  ;;  %v862_v1 = vadd.f32 %v4998_v51, %v835_v50  ;;  %v892_v53 = vpop.permute.xlu0 %891 }
 0x167   : > { %vm893_vm9 = vcmp.eq.s32.totalorder %v892_v53, 1  ;;  %v6304_v53 = vld [vmem:[#allocation73_spill] sm:$0xff] }
 0x168   : > { %v863_v46 = vadd.f32 %v4995_v40, %v837_v24 }
 0x16a   : > { %v3694_v32 = vmul.f32 -1.442695, %v863_v46 }
 0x16c   : > { %3936 = vpow2.f32 %v3694_v32 }
 0x16f   : > { %v3933_v61 = vpop.eup %3932 }
 0x170   : > { %v867_v56 = vadd.f32 1.0, %v3933_v61  ;;  %v6297_v61 = vld [vmem:[#allocation64_spill] sm:$0xff] }
 0x171   : > { %v3935_v7 = vpop.eup %3934 }
 0x172   : > { %3938 = vrcp.f32 %v867_v56  ;;  %v873_v30 = vadd.f32 1.0, %v3935_v7  ;;  %v6299_v56 = vld [vmem:[#allocation68_spill] sm:$0xff]  ;;  %v6300_v7 = vld [vmem:[#allocation69_spill] sm:$0xff] }
 0x173   : > { %3940 = vtanh.f32 %v862_v1  ;;  %v6298_v1 = vld [vmem:[#allocation66_spill] sm:$0xff] }
 0x174   : > { %3942 = vrcp.f32 %v873_v30  ;;  %v6301_v30 = vld [vmem:[#allocation70_spill] sm:$0xff] }
 0x179   : > { %v3937_v28 = vpop.eup %3936 }
 0x17a   : > { %v880_v26 = vadd.f32 1.0, %v3937_v28  ;;  %v3696_v28 = vld [vmem:[%s4606_s22 + $0x8] sm:$0xff] }
 0x17c   : > { %3944 = vrcp.f32 %v880_v26  ;;  %v6306_v26 = vld [vmem:[#allocation49_spill] sm:$0xff] }
 0x17f   : > { %v3939_v44 = vpop.eup %3938 }
 0x180   : > { %v3941_v34 = vpop.eup %3940 }
 0x181   : > { %v3943_v24 = vpop.eup %3942  ;;  %v884_v55 = vmul.f32 %v3941_v34, %v3939_v44  ;;  %v6302_v44 = vld [vmem:[#allocation71_spill] sm:$0xff]  ;;  %v6303_v34 = vld [vmem:[#allocation72_spill] sm:$0xff] }
 0x182   : > { %v883_v38 = vmul.f32 0.0, %v3943_v24  ;;  %v6305_v24 = vld [vmem:[#allocation74_spill] sm:$0xff] }
 0x184   : > { %v885_v57 = vadd.f32 %v884_v55, %v883_v38  ;;  %v6307_v38 = vld [vmem:[#allocation24_spill] sm:$0xff]  ;;  %v6308_v55 = vld [vmem:[#allocation51_spill] sm:$0xff] }
 0x186   : > { %3946 = vtanh.f32 %v885_v57  ;;  %898 = vadd.xlane.f32.xlu1 %v885_v57  ;;  %v5001_v36 = vsel %vm893_vm9, %v885_v57, 0.0  ;;  %v6309_v57 = vld [vmem:[#allocation25_spill] sm:$0xff] }
 0x187   : > { %897 = vst [vmem:[%s5004_s28] sm:$0xff] %v5001_v36 }
 0x189   : > { %v3945_v42 = vpop.eup %3944 }
 0x193   : > { %v3947_v46 = vpop.eup %3946 }
 0x194   : > { %v887_v50 = vmul.f32 %v3947_v46, %v3945_v42  ;;  %v6310_v42 = vld [vmem:[#allocation53_spill] sm:$0xff]  ;;  %v6311_v46 = vld [vmem:[#allocation26_spill] sm:$0xff] }
 0x196   : > { %3697 = vmatmul.mubr.msk.f32.vlgmr.msra.gmra.mxu0 %vm893_vm9, %v887_v50  ;;  %3698 = vmatmul.mubr.msk.f32.vlgmr.msra.gmra.mxu1 %vm893_vm9, %v887_v50  ;;  %v5008_v32 = vsel %vm893_vm9, %v887_v50, 0.0  ;;  %v6312_v50 = vld [vmem:[#allocation55_spill] sm:$0xff] }
 0x197   : > { %1083 = vmatpush1.msra.mxu1 %v6297_v61  ;;  %1122 = vmatprep.mubr.f32.mxu1 %v6275_v58  ;;  %896 = vst [vmem:[%s5013_s23] sm:$0xff] %v5008_v32 }
 0x198   : > { %1084 = vmatprep.subr.mxu1 %v6298_v1  ;;  %1258 = vmatpush1.msra.mxu0 %v4638_v8 }
 0x199   : > { %1085 = vmatpush1.msra.mxu1 %v6299_v56  ;;  %1259 = vmatprep.subr.mxu0 %v4644_v10 }
 0x19a   : > { %1086 = vmatprep.subr.mxu1 %v6300_v7  ;;  %1260 = vmatpush1.msra.mxu0 %v4650_v12 }
 0x19b   : > { %1087 = vmatpush1.msra.mxu1 %v6301_v30  ;;  %1261 = vmatprep.subr.mxu0 %v4652_v13 }
 0x19c   : > { %1088 = vmatprep.subr.mxu1 %v6302_v44  ;;  %1262 = vmatpush1.msra.mxu0 %v4658_v15 }
 0x19d   : > { %1089 = vmatpush1.msra.mxu1 %v6303_v34  ;;  %1263 = vmatprep.subr.mxu0 %v4664_v17 }
 0x19e   : > { %3699 = vmatmul.mubr.msk.f32.vlgmr.msra.gmra.mxu1 %vm693_vm2, %v3696_v28  ;;  %1153 = vmatprep.subr.mxu1 %v6304_v53 }
 0x19f   : > { %1154 = vmatpush1.msra.mxu1 %v6305_v24  ;;  %1193 = vmatprep.mubr.f32.mxu1 %v6275_v58 }
 0x1a0   : > { %1155 = vmatprep.subr.mxu1 %v4868_v62  ;;  %1264 = vmatpush1.msra.mxu0 %v4670_v19 }
 0x1a1   : > { %1156 = vmatpush1.msra.mxu1 %v4876_v59  ;;  %1265 = vmatprep.subr.mxu0 %v4676_v21 }
 0x1a2   : > { %1157 = vmatprep.subr.mxu1 %v4880_v0  ;;  %1266 = vmatpush1.msra.mxu0 %v4682_v23 }
 0x1a3   : > { %1158 = vmatpush1.msra.mxu1 %v4884_v54  ;;  %1267 = vmatprep.subr.mxu0 %v4688_v25 }
 0x1a4   : > { %1159 = vmatprep.subr.mxu1 %v4887_v63  ;;  %1268 = vmatpush1.msra.mxu0 %v4694_v27 }
 0x1a5   : > { %1160 = vmatpush1.msra.mxu1 %v4894_v60  ;;  %1269 = vmatprep.subr.mxu0 %v4700_v29 }
 0x1a6   : > { %3700 = vmatmul.mubr.msk.f32.vlgmr.msra.gmra.mxu1 %vm693_vm2, %v3696_v28  ;;  %1328 = vmatprep.subr.mxu1 %v4624_v2  ;;  %v6313_v28 = vld [vmem:[#allocation28_spill] sm:$0xff] }
 0x1a7   : > { %1329 = vmatpush1.msra.mxu1 %v4626_v3  ;;  %1270 = vmatpush1.msra.mxu0 %v4706_v31 }
 0x1a8   : > { %1330 = vmatprep.subr.mxu1 %v4628_v4  ;;  %1271 = vmatprep.subr.mxu0 %v4712_v33 }
 0x1a9   : > { %1331 = vmatpush1.msra.mxu1 %v4631_v5  ;;  %1272 = vmatpush1.msra.mxu0 %v4718_v35 }
 0x1aa   : > { %1332 = vmatprep.subr.mxu1 %v4634_v6  ;;  %1273 = vmatprep.subr.mxu0 %v4725_v37  ;;  %v6335_v37 = vld [vmem:[#allocation60_spill] sm:$0xff] }
 0x1ab   : > { %1333 = vmatpush1.msra.mxu1 %v4641_v9  ;;  %1274 = vmatpush1.msra.mxu0 %v4731_v39  ;;  %v6322_v39 = vld [vmem:[#allocation67_spill] sm:$0xff] }
 0x1ac   : > { %1334 = vmatprep.subr.mxu1 %v4647_v11  ;;  %1275 = vmatprep.subr.mxu0 %v4737_v41  ;;  %v6320_v41 = vld [vmem:[#allocation65_spill] sm:$0xff] }
 0x1ad   : > { %1335 = vmatpush1.msra.mxu1 %v4655_v14  ;;  %1276 = vmatpush1.msra.mxu0 %v4743_v43  ;;  %v6318_v43 = vld [vmem:[#allocation61_spill] sm:$0xff] }
 0x1ae   : > { %1336 = vmatprep.subr.mxu1 %v4661_v16  ;;  %1277 = vmatprep.subr.mxu0 %v4754_v45  ;;  %v6316_v45 = vld [vmem:[#allocation59_spill] sm:$0xff] }
 0x1af   : > { %1337 = vmatpush1.msra.mxu1 %v4667_v18  ;;  %1278 = vmatpush1.msra.mxu0 %v4760_v47  ;;  %v6314_v47 = vld [vmem:[#allocation57_spill] sm:$0xff] }
 0x1b0   : > { %1338 = vmatprep.subr.mxu1 %v4673_v20  ;;  %1279 = vmatprep.subr.mxu0 %v4766_v49  ;;  %v6315_v49 = vld [vmem:[#allocation30_spill] sm:$0xff] }
 0x1b1   : > { %1339 = vmatpush1.msra.mxu1 %v4679_v22  ;;  %1280 = vmatpush1.msra.mxu0 %v6306_v26  ;;  %v6317_v26 = vld [vmem:[#allocation32_spill] sm:$0xff] }
 0x1b2   : > { %1340 = vmatprep.subr.mxu1 %v6307_v38  ;;  %1281 = vmatprep.subr.mxu0 %v6308_v55  ;;  %v6319_v55 = vld [vmem:[#allocation34_spill] sm:$0xff] }
 0x1b3   : > { %1341 = vmatpush1.msra.mxu1 %v6309_v57  ;;  %1282 = vmatpush1.msra.mxu0 %v6310_v42  ;;  %v6321_v42 = vld [vmem:[#allocation36_spill] sm:$0xff] }
 0x1b4   : > { %1342 = vmatprep.subr.mxu1 %v6311_v46  ;;  %1283 = vmatprep.subr.mxu0 %v6312_v50  ;;  %v6323_v50 = vld [vmem:[#allocation38_spill] sm:$0xff] }
 0x1b5   : > { %1343 = vmatpush1.msra.mxu1 %v6313_v28  ;;  %1284 = vmatpush1.msra.mxu0 %v6314_v47  ;;  %v6324_v47 = vld [vmem:[#allocation40_spill] sm:$0xff] }
 0x1b6   : > { %1344 = vmatprep.subr.mxu1 %v6315_v49  ;;  %1285 = vmatprep.subr.mxu0 %v6316_v45  ;;  %v6325_v45 = vld [vmem:[#allocation42_spill] sm:$0xff]  ;;  %v6333_v49 = vld [vmem:[#allocation56_spill] sm:$0xff] }
 0x1b7   : > { %1345 = vmatpush1.msra.mxu1 %v6317_v26  ;;  %1286 = vmatpush1.msra.mxu0 %v6318_v43  ;;  %v6326_v26 = vld [vmem:[#allocation63_spill] sm:$0xff]  ;;  %v6327_v43 = vld [vmem:[#allocation44_spill] sm:$0xff] }
 0x1b8   : > { %1346 = vmatprep.subr.mxu1 %v6319_v55  ;;  %1287 = vmatprep.subr.mxu0 %v6320_v41  ;;  %v6328_v55 = vld [vmem:[#allocation46_spill] sm:$0xff]  ;;  %v6329_v41 = vld [vmem:[#allocation48_spill] sm:$0xff] }
 0x1b9   : > { %1347 = vmatpush1.msra.mxu1 %v6321_v42  ;;  %1288 = vmatpush1.msra.mxu0 %v6322_v39  ;;  %v6330_v42 = vld [vmem:[#allocation50_spill] sm:$0xff]  ;;  %v6331_v39 = vld [vmem:[#allocation52_spill] sm:$0xff] }
 0x1ba   : > { %1348 = vmatprep.subr.mxu1 %v6323_v50  ;;  %1321 = vmatprep.mubr.f32.mxu0 %v6275_v58  ;;  %v6332_v50 = vld [vmem:[#allocation54_spill] sm:$0xff] }
 0x1bb   : > { %1349 = vmatpush1.msra.mxu1 %v6324_v47  ;;  %1392 = vmatprep.mubr.f32.mxu1 %v6275_v58  ;;  %v6334_v47 = vld [vmem:[#allocation58_spill] sm:$0xff] }
 0x1bc   : > { %1350 = vmatprep.subr.mxu1 %v6325_v45  ;;  %1426 = vmatprep.subr.mxu0 %v6326_v26  ;;  %v5102_v26 = vpop.permute.xlu1 %1575 }
 0x1bd   : > { %1351 = vmatpush1.msra.mxu1 %v6327_v43  ;;  %6336 = vst [vmem:[#allocation64_spill] sm:$0xff] %v5102_v26 }
 0x1be   : > { %1352 = vmatprep.subr.mxu1 %v6328_v55 }
 0x1bf   : > { %1353 = vmatpush1.msra.mxu1 %v6329_v41 }
 0x1c0   : > { %1354 = vmatprep.subr.mxu1 %v6330_v42  ;;  %v5104_v43 = vpop.permute.xlu1 %1919 }
 0x1c1   : > { %1355 = vmatpush1.msra.mxu1 %v6331_v39  ;;  %6337 = vst [vmem:[#allocation66_spill] sm:$0xff] %v5104_v43 }
 0x1c2   : > { %1356 = vmatprep.subr.mxu1 %v6332_v50 }
 0x1c3   : > { %1357 = vmatpush1.msra.mxu1 %v6333_v49 }
 0x1c4   : > { %1358 = vmatprep.subr.mxu1 %v6334_v47  ;;  %v5106_v55 = vpop.permute.xlu1 %2607 }
 0x1c5   : > { %1359 = vmatpush1.msra.mxu1 %v6335_v37  ;;  %6338 = vst [vmem:[#allocation68_spill] sm:$0xff] %v5106_v55 }
 0x1c6   : > { %1497 = vmatprep.subr.mxu1 %v6304_v53 }
 0x20f   : > { %v899_v41 = vpop.xlane.xlu1 %898 }
 0x210   : > { %vm900_vm10 = vcmp.ne.f32.partialorder %v899_v41, 0.0 }
 0x211   : > { %vm901_vm11 = vmand %vm888_vm0, %vm900_vm10 }
 0x212   : > { %v3695_v50 = vsel %vm901_vm11, 1.0, %v6275_v58 }
 0x213   : > { %907 = vperm.xlu0 %3920, %v3695_v50  }
 0x256   : > { %v1050_v49 = vpop.f32.mrf.mxu1  ;;  %v979_v47 = vpop.f32.mrf.mxu0 }
 0x258   : > { %v1052_v39 = vpop.f32.mrf.mxu1  ;;  %v981_v53 = vpop.f32.mrf.mxu0 }
 0x25e   : > { %v1124_v37 = vpop.f32.mrf.mxu1 }
 0x25f   : > { %v1125_v45 = vadd.f32 %v1124_v37, %v979_v47 }
 0x260   : > { %v1126_v28 = vpop.f32.mrf.mxu1 }
 0x261   : > { %v1200_v26 = vadd.f32 %v1125_v45, %v4989_v48  ;;  %v1127_v43 = vadd.f32 %v1126_v28, %v981_v53 }
 0x263   : > { %v3701_v35 = vmul.f32 -1.442695, %v1200_v26  ;;  %v1201_v55 = vadd.f32 %v1127_v43, %v4991_v52 }
 0x265   : > { %3948 = vpow2.f32 %v3701_v35  ;;  %v3702_v41 = vmul.f32 -1.442695, %v1201_v55  ;;  %v1232_v55 = vpop.permute.xlu0 %1231 }
 0x266   : > { %v1195_v42 = vpop.f32.mrf.mxu1  ;;  %vm1233_vm12 = vcmp.eq.s32.totalorder %v1232_v55, 1  ;;  %v6375_v55 = vld [vmem:[#allocation61_spill] sm:$0xff] }
 0x267   : > { %3950 = vpow2.f32 %v3702_v41  ;;  %v1196_v57 = vadd.f32 %v1195_v42, %v1050_v49 }
 0x268   : > { %v1197_v46 = vpop.f32.mrf.mxu1 }
 0x269   : > { %v1198_v33 = vadd.f32 %v1197_v46, %v1052_v39  ;;  %v1202_v37 = vadd.f32 %v1196_v57, %v4998_v51 }
 0x26b   : > { %v1203_v50 = vadd.f32 %v1198_v33, %v4995_v40 }
 0x26d   : > { %v3703_v31 = vmul.f32 -1.442695, %v1203_v50  ;;  %v6364_v50 = vld [vmem:[#allocation44_spill] sm:$0xff] }
 0x26f   : > { %3952 = vpow2.f32 %v3703_v31 }
 0x272   : > { %v3949_v38 = vpop.eup %3948 }
 0x273   : > { %v1207_v47 = vadd.f32 1.0, %v3949_v38 }
 0x274   : > { %v3951_v29 = vpop.eup %3950 }
 0x275   : > { %3954 = vrcp.f32 %v1207_v47  ;;  %v1213_v45 = vadd.f32 1.0, %v3951_v29  ;;  %v6366_v47 = vld [vmem:[#allocation46_spill] sm:$0xff] }
 0x276   : > { %3956 = vtanh.f32 %v1202_v37  ;;  %v6365_v37 = vld [vmem:[#allocation51_spill] sm:$0xff] }
 0x277   : > { %3958 = vrcp.f32 %v1213_v45  ;;  %v6367_v45 = vld [vmem:[#allocation53_spill] sm:$0xff] }
 0x27c   : > { %v3953_v35 = vpop.eup %3952 }
 0x27d   : > { %v1220_v39 = vadd.f32 1.0, %v3953_v35  ;;  %v6368_v35 = vld [vmem:[#allocation48_spill] sm:$0xff] }
 0x27f   : > { %3960 = vrcp.f32 %v1220_v39  ;;  %v6372_v39 = vld [vmem:[#allocation52_spill] sm:$0xff] }
 0x282   : > { %v3955_v43 = vpop.eup %3954 }
 0x283   : > { %v3957_v53 = vpop.eup %3956 }
 0x284   : > { %v3959_v26 = vpop.eup %3958  ;;  %v1224_v49 = vmul.f32 %v3957_v53, %v3955_v43  ;;  %v6369_v43 = vld [vmem:[#allocation55_spill] sm:$0xff]  ;;  %v6370_v53 = vld [vmem:[#allocation50_spill] sm:$0xff] }
 0x285   : > { %v1223_v33 = vmul.f32 %v3959_v26, %v5001_v36  ;;  %v6371_v26 = vld [vmem:[#allocation57_spill] sm:$0xff] }
 0x287   : > { %v1225_v42 = vadd.f32 %v1224_v49, %v1223_v33  ;;  %v6373_v33 = vld [vmem:[#allocation59_spill] sm:$0xff]  ;;  %v6374_v49 = vld [vmem:[#allocation54_spill] sm:$0xff] }
 0x289   : > { %1242 = vadd.xlane.f32.xlu0 %v1225_v42  ;;  %3962 = vtanh.f32 %v1225_v42  ;;  %v1239_v31 = vsel %vm1233_vm12, %v1225_v42, 0.0  ;;  %v5117_v29 = vsel %vm1233_vm12, %v1225_v42, %v5001_v36  ;;  %v3707_v36 = vld [vmem:[%s4606_s22 + $0x10] sm:$0xff]  ;;  %v6376_v42 = vld [vmem:[#allocation56_spill] sm:$0xff] }
 0x28a   : > { %3705 = vst [vmem:[%s5004_s28 + $0x8] sm:$0xff] %v1239_v31  ;;  %v6377_v31 = vld [vmem:[#allocation65_spill] sm:$0xff] }
 0x28c   : > { %v3961_v38 = vpop.eup %3960 }
 0x296   : > { %v3963_v57 = vpop.eup %3962 }
 0x297   : > { %v1227_v46 = vmul.f32 %v3963_v57, %v3961_v38  ;;  %v6378_v38 = vld [vmem:[#allocation58_spill] sm:$0xff]  ;;  %v6379_v57 = vld [vmem:[#allocation67_spill] sm:$0xff] }
 0x299   : > { %v5121_v28 = vsel %vm1233_vm12, %v1227_v46, %v5008_v32  ;;  %v1236_v41 = vsel %vm1233_vm12, %v1227_v46, 0.0  ;;  %v6340_v32 = vld [vmem:[#allocation23_spill] sm:$0xff]  ;;  %v6380_v46 = vld [vmem:[#allocation60_spill] sm:$0xff] }
 0x29a   : > { %3704 = vst [vmem:[%s5013_s23 + $0x8] sm:$0xff] %v1236_v41  ;;  %1322 = vmatmul.mubr.f32.vlgmr.msra.gmra.mxu0 %v5121_v28  ;;  %1393 = vmatmul.mubr.f32.vlgmr.msra.gmra.mxu1 %v5121_v28  ;;  %v6381_v41 = vld [vmem:[#allocation63_spill] sm:$0xff] }
 0x29b   : > { %1427 = vmatpush1.msra.mxu0 %v6297_v61  ;;  %1498 = vmatpush1.msra.mxu1 %v6305_v24 }
 0x29c   : > { %1428 = vmatprep.subr.mxu0 %v6298_v1  ;;  %1499 = vmatprep.subr.mxu1 %v4868_v62 }
 0x29d   : > { %1429 = vmatpush1.msra.mxu0 %v6299_v56  ;;  %1500 = vmatpush1.msra.mxu1 %v4876_v59 }
 0x29e   : > { %1430 = vmatprep.subr.mxu0 %v6300_v7  ;;  %1501 = vmatprep.subr.mxu1 %v4880_v0 }
 0x29f   : > { %1431 = vmatpush1.msra.mxu0 %v6301_v30  ;;  %1502 = vmatpush1.msra.mxu1 %v4884_v54 }
 0x2a0   : > { %1432 = vmatprep.subr.mxu0 %v6302_v44  ;;  %1503 = vmatprep.subr.mxu1 %v4887_v63 }
 0x2a1   : > { %1433 = vmatpush1.msra.mxu0 %v6303_v34  ;;  %1466 = vmatprep.mubr.f32.mxu0 %v6275_v58 }
 0x2a2   : > { %1504 = vmatpush1.msra.mxu1 %v4894_v60  ;;  %1537 = vmatprep.mubr.f32.mxu1 %v6275_v58 }
 0x2a3   : > { %3708 = vmatmul.mubr.msk.f32.vlgmr.msra.gmra.mxu0 %vm693_vm2, %v3707_v36  ;;  %3709 = vmatmul.mubr.msk.f32.vlgmr.msra.gmra.mxu1 %vm693_vm2, %v3707_v36  ;;  %v6382_v36 = vld [vmem:[#allocation73_spill] sm:$0xff] }
 0x2a4   : > { %1601 = vmatprep.subr.mxu0 %v6340_v32  ;;  %1672 = vmatprep.subr.mxu1 %v4624_v2  ;;  %v6341_v2 = vld [vmem:[#allocation27_spill] sm:$0xff] }
 0x2a5   : > { %1602 = vmatpush1.msra.mxu0 %v4638_v8  ;;  %1673 = vmatpush1.msra.mxu1 %v4626_v3  ;;  %v6342_v3 = vld [vmem:[#allocation24_spill] sm:$0xff]  ;;  %v6346_v8 = vld [vmem:[#allocation26_spill] sm:$0xff] }
 0x2a6   : > { %1603 = vmatprep.subr.mxu0 %v4644_v10  ;;  %1674 = vmatprep.subr.mxu1 %v4628_v4  ;;  %v6343_v4 = vld [vmem:[#allocation29_spill] sm:$0xff]  ;;  %v6348_v10 = vld [vmem:[#allocation28_spill] sm:$0xff] }
 0x2a7   : > { %1604 = vmatpush1.msra.mxu0 %v4650_v12  ;;  %1675 = vmatpush1.msra.mxu1 %v4631_v5  ;;  %v6344_v5 = vld [vmem:[#allocation25_spill] sm:$0xff]  ;;  %v6350_v12 = vld [vmem:[#allocation30_spill] sm:$0xff] }
 0x2a8   : > { %1605 = vmatprep.subr.mxu0 %v4652_v13  ;;  %1676 = vmatprep.subr.mxu1 %v4634_v6  ;;  %v6345_v6 = vld [vmem:[#allocation31_spill] sm:$0xff]  ;;  %v6351_v13 = vld [vmem:[#allocation37_spill] sm:$0xff] }
 0x2a9   : > { %1606 = vmatpush1.msra.mxu0 %v4658_v15  ;;  %1677 = vmatpush1.msra.mxu1 %v4641_v9  ;;  %v6347_v9 = vld [vmem:[#allocation33_spill] sm:$0xff]  ;;  %v6353_v15 = vld [vmem:[#allocation39_spill] sm:$0xff] }
 0x2aa   : > { %1607 = vmatprep.subr.mxu0 %v4664_v17  ;;  %1678 = vmatprep.subr.mxu1 %v4647_v11  ;;  %v6349_v11 = vld [vmem:[#allocation35_spill] sm:$0xff]  ;;  %v6355_v17 = vld [vmem:[#allocation41_spill] sm:$0xff] }
 0x2ab   : > { %1608 = vmatpush1.msra.mxu0 %v4670_v19  ;;  %1679 = vmatpush1.msra.mxu1 %v4655_v14  ;;  %v6352_v14 = vld [vmem:[#allocation32_spill] sm:$0xff]  ;;  %v6357_v19 = vld [vmem:[#allocation43_spill] sm:$0xff] }
 0x2ac   : > { %1609 = vmatprep.subr.mxu0 %v4676_v21  ;;  %1680 = vmatprep.subr.mxu1 %v4661_v16  ;;  %v6354_v16 = vld [vmem:[#allocation34_spill] sm:$0xff]  ;;  %v6359_v21 = vld [vmem:[#allocation45_spill] sm:$0xff] }
 0x2ad   : > { %1610 = vmatpush1.msra.mxu0 %v4682_v23  ;;  %1681 = vmatpush1.msra.mxu1 %v4667_v18  ;;  %v6356_v18 = vld [vmem:[#allocation36_spill] sm:$0xff]  ;;  %v6361_v23 = vld [vmem:[#allocation47_spill] sm:$0xff] }
 0x2ae   : > { %1611 = vmatprep.subr.mxu0 %v4688_v25  ;;  %1682 = vmatprep.subr.mxu1 %v4673_v20  ;;  %v6358_v20 = vld [vmem:[#allocation38_spill] sm:$0xff] }
 0x2af   : > { %1612 = vmatpush1.msra.mxu0 %v4694_v27  ;;  %1683 = vmatpush1.msra.mxu1 %v4679_v22  ;;  %v6360_v22 = vld [vmem:[#allocation40_spill] sm:$0xff]  ;;  %v6362_v25 = vld [vmem:[#allocation42_spill] sm:$0xff]  ;;  %v6363_v27 = vld [vmem:[#allocation49_spill] sm:$0xff] }
 0x2b0   : > { %1613 = vmatprep.subr.mxu0 %v6341_v2  ;;  %1684 = vmatprep.subr.mxu1 %v6342_v3 }
 0x2b1   : > { %1614 = vmatpush1.msra.mxu0 %v6343_v4  ;;  %1685 = vmatpush1.msra.mxu1 %v6344_v5 }
 0x2b2   : > { %1615 = vmatprep.subr.mxu0 %v6345_v6  ;;  %1686 = vmatprep.subr.mxu1 %v6346_v8 }
 0x2b3   : > { %1616 = vmatpush1.msra.mxu0 %v6347_v9  ;;  %1687 = vmatpush1.msra.mxu1 %v6348_v10 }
 0x2b4   : > { %1617 = vmatprep.subr.mxu0 %v6349_v11  ;;  %1688 = vmatprep.subr.mxu1 %v6350_v12 }
 0x2b5   : > { %1618 = vmatpush1.msra.mxu0 %v6351_v13  ;;  %1689 = vmatpush1.msra.mxu1 %v6352_v14 }
 0x2b6   : > { %1619 = vmatprep.subr.mxu0 %v6353_v15  ;;  %1690 = vmatprep.subr.mxu1 %v6354_v16 }
 0x2b7   : > { %1620 = vmatpush1.msra.mxu0 %v6355_v17  ;;  %1691 = vmatpush1.msra.mxu1 %v6356_v18 }
 0x2b8   : > { %1621 = vmatprep.subr.mxu0 %v6357_v19  ;;  %1692 = vmatprep.subr.mxu1 %v6358_v20 }
 0x2b9   : > { %1622 = vmatpush1.msra.mxu0 %v6359_v21  ;;  %1693 = vmatpush1.msra.mxu1 %v6360_v22 }
 0x2ba   : > { %1623 = vmatprep.subr.mxu0 %v6361_v23  ;;  %1694 = vmatprep.subr.mxu1 %v6362_v25 }
 0x2bb   : > { %1624 = vmatpush1.msra.mxu0 %v6363_v27  ;;  %1695 = vmatpush1.msra.mxu1 %v6364_v50 }
 0x2bc   : > { %1625 = vmatprep.subr.mxu0 %v6365_v37  ;;  %1696 = vmatprep.subr.mxu1 %v6366_v47 }
 0x2bd   : > { %1626 = vmatpush1.msra.mxu0 %v6367_v45  ;;  %1697 = vmatpush1.msra.mxu1 %v6368_v35 }
 0x2be   : > { %1627 = vmatprep.subr.mxu0 %v6369_v43  ;;  %1698 = vmatprep.subr.mxu1 %v6370_v53  ;;  %v6383_v53 = vld [vmem:[#allocation64_spill] sm:$0xff] }
 0x2bf   : > { %1628 = vmatpush1.msra.mxu0 %v6371_v26  ;;  %1699 = vmatpush1.msra.mxu1 %v6372_v39  ;;  %vm1577_vm13 = vcmp.eq.s32.totalorder %v6383_v53, 1  ;;  %v5395_v53 = vld [vmem:[#allocation7 + $0x78] sm:$0xff] }
 0x2c0   : > { %1629 = vmatprep.subr.mxu0 %v6373_v33  ;;  %1700 = vmatprep.subr.mxu1 %v6374_v49  ;;  %6410 = vst [vmem:[#allocation47_spill] sm:$0xff] %v5395_v53 }
 0x2c1   : > { %1630 = vmatpush1.msra.mxu0 %v6375_v55  ;;  %1701 = vmatpush1.msra.mxu1 %v6376_v42 }
 0x2c2   : > { %1631 = vmatprep.subr.mxu0 %v6377_v31  ;;  %1702 = vmatprep.subr.mxu1 %v6378_v38 }
 0x2c3   : > { %1632 = vmatpush1.msra.mxu0 %v6379_v57  ;;  %1703 = vmatpush1.msra.mxu1 %v6380_v46  ;;  %v5293_v57 = vld [vmem:[#allocation7 + $0x190] sm:$0xff]  ;;  %v5296_v46 = vld [vmem:[#allocation7 + $0x168] sm:$0xff] }
 0x2c4   : > { %1665 = vmatprep.mubr.f32.mxu0 %v6275_v58  ;;  %1736 = vmatprep.mubr.f32.mxu1 %v6275_v58 }
 0x2c5   : > { %1770 = vmatprep.subr.mxu0 %v6381_v41  ;;  %1841 = vmatprep.subr.mxu1 %v6382_v36  ;;  %v5299_v41 = vld [vmem:[#allocation7 + $0x178] sm:$0xff]  ;;  %v5302_v36 = vld [vmem:[#allocation7 + $0x160] sm:$0xff] }
 0x35a   : > { %v1323_v32 = vpop.f32.mrf.mxu0  ;;  %v1394_v2 = vpop.f32.mrf.mxu1 }
 0x35c   : > { %v1325_v3 = vpop.f32.mrf.mxu0  ;;  %v1396_v5 = vpop.f32.mrf.mxu1 }
 0x363   : > { %v1468_v4 = vpop.f32.mrf.mxu0  ;;  %v1539_v10 = vpop.f32.mrf.mxu1 }
 0x364   : > { %v1469_v6 = vadd.f32 %v1468_v4, %v1323_v32  ;;  %v1540_v18 = vadd.f32 %v1539_v10, %v1394_v2  ;;  %v5305_v32 = vld [vmem:[#allocation7 + $0x170] sm:$0xff]  ;;  %v5308_v2 = vld [vmem:[#allocation7 + $0x148] sm:$0xff]  ;;  %v5314_v4 = vld [vmem:[#allocation7 + $0x140] sm:$0xff] }
 0x365   : > { %v1470_v8 = vpop.f32.mrf.mxu0  ;;  %v1541_v15 = vpop.f32.mrf.mxu1  ;;  %v5329_v10 = vld [vmem:[#allocation7 + $0x130] sm:$0xff] }
 0x366   : > { %v1544_v9 = vadd.f32 %v1469_v6, %v4989_v48  ;;  %v1471_v11 = vadd.f32 %v1470_v8, %v1325_v3  ;;  %v1542_v16 = vadd.f32 %v1541_v15, %v1396_v5  ;;  %v1546_v21 = vadd.f32 %v1540_v18, %v4998_v51  ;;  %v5311_v3 = vld [vmem:[#allocation7 + $0x158] sm:$0xff]  ;;  %v5317_v5 = vld [vmem:[#allocation7 + $0x150] sm:$0xff]  ;;  %v5320_v6 = vld [vmem:[#allocation7 + $0x128] sm:$0xff]  ;;  %6388 = vst [vmem:[#allocation74_spill] sm:$0xff] %v5329_v10 }
 0x367   : > { %6384 = vst [vmem:[#allocation69_spill] sm:$0xff] %v5317_v5  ;;  %6385 = vst [vmem:[#allocation70_spill] sm:$0xff] %v5320_v6  ;;  %v5323_v8 = vld [vmem:[#allocation7 + $0x138] sm:$0xff]  ;;  %v5344_v15 = vld [vmem:[#allocation7 + $0xe8] sm:$0xff] }
 0x368   : > { %v3710_v12 = vmul.f32 -1.442695, %v1544_v9  ;;  %v1545_v13 = vadd.f32 %v1471_v11, %v4991_v52  ;;  %v1547_v17 = vadd.f32 %v1542_v16, %v4995_v40  ;;  %6386 = vst [vmem:[#allocation71_spill] sm:$0xff] %v5323_v8  ;;  %v5326_v9 = vld [vmem:[#allocation7 + $0x120] sm:$0xff]  ;;  %v5332_v11 = vld [vmem:[#allocation7 + $0x108] sm:$0xff]  ;;  %6393 = vst [vmem:[#allocation25_spill] sm:$0xff] %v5344_v15 }
 0x369   : > { %6387 = vst [vmem:[#allocation72_spill] sm:$0xff] %v5326_v9  ;;  %6389 = vst [vmem:[#allocation23_spill] sm:$0xff] %v5332_v11  ;;  %v5347_v16 = vld [vmem:[#allocation7 + $0xf8] sm:$0xff]  ;;  %v5353_v18 = vld [vmem:[#allocation7 + $0xf0] sm:$0xff] }
 0x36a   : > { %3964 = vpow2.f32 %v3710_v12  ;;  %v3711_v14 = vmul.f32 -1.442695, %v1545_v13  ;;  %v3712_v19 = vmul.f32 -1.442695, %v1547_v17  ;;  %v5335_v12 = vld [vmem:[#allocation7 + $0x118] sm:$0xff]  ;;  %v5338_v13 = vld [vmem:[#allocation7 + $0x100] sm:$0xff] }
 0x36b   : > { %6390 = vst [vmem:[#allocation27_spill] sm:$0xff] %v5335_v12  ;;  %6391 = vst [vmem:[#allocation24_spill] sm:$0xff] %v5338_v13  ;;  %v5350_v17 = vld [vmem:[#allocation7 + $0xe0] sm:$0xff] }
 0x36c   : > { %3966 = vpow2.f32 %v3711_v14  ;;  %v5341_v14 = vld [vmem:[#allocation7 + $0x110] sm:$0xff]  ;;  %6394 = vst [vmem:[#allocation31_spill] sm:$0xff] %v5347_v16  ;;  %6395 = vst [vmem:[#allocation26_spill] sm:$0xff] %v5350_v17 }
 0x36d   : > { %3968 = vpow2.f32 %v3712_v19  ;;  %6392 = vst [vmem:[#allocation29_spill] sm:$0xff] %v5341_v14  ;;  %6396 = vst [vmem:[#allocation33_spill] sm:$0xff] %v5353_v18  ;;  %v5356_v19 = vld [vmem:[#allocation7 + $0xc8] sm:$0xff] }
 0x36e   : > { %6397 = vst [vmem:[#allocation28_spill] sm:$0xff] %v5356_v19 }
 0x377   : > { %v3965_v20 = vpop.eup %3964 }
 0x378   : > { %v1551_v22 = vadd.f32 1.0, %v3965_v20  ;;  %v5359_v20 = vld [vmem:[#allocation7 + $0xd8] sm:$0xff] }
 0x379   : > { %v3967_v23 = vpop.eup %3966  ;;  %6398 = vst [vmem:[#allocation35_spill] sm:$0xff] %v5359_v20 }
 0x37a   : > { %3970 = vrcp.f32 %v1551_v22  ;;  %v1557_v25 = vadd.f32 1.0, %v3967_v23  ;;  %v3969_v27 = vpop.eup %3968  ;;  %v5365_v22 = vld [vmem:[#allocation7 + $0xd0] sm:$0xff]  ;;  %v5368_v23 = vld [vmem:[#allocation7 + $0xa8] sm:$0xff] }
 0x37b   : > { %3972 = vtanh.f32 %v1546_v21  ;;  %v1564_v45 = vadd.f32 1.0, %v3969_v27  ;;  %v5362_v21 = vld [vmem:[#allocation7 + $0xc0] sm:$0xff]  ;;  %6400 = vst [vmem:[#allocation37_spill] sm:$0xff] %v5365_v22  ;;  %6401 = vst [vmem:[#allocation32_spill] sm:$0xff] %v5368_v23 }
 0x37c   : > { %3974 = vrcp.f32 %v1557_v25  ;;  %6399 = vst [vmem:[#allocation30_spill] sm:$0xff] %v5362_v21  ;;  %v5371_v25 = vld [vmem:[#allocation7 + $0xb8] sm:$0xff]  ;;  %v5374_v27 = vld [vmem:[#allocation7 + $0xa0] sm:$0xff] }
 0x37d   : > { %3976 = vrcp.f32 %v1564_v45  ;;  %6402 = vst [vmem:[#allocation39_spill] sm:$0xff] %v5371_v25  ;;  %6403 = vst [vmem:[#allocation34_spill] sm:$0xff] %v5374_v27  ;;  %v5386_v45 = vld [vmem:[#allocation7 + $0x80] sm:$0xff] }
 0x37e   : > { %6407 = vst [vmem:[#allocation38_spill] sm:$0xff] %v5386_v45 }
 0x387   : > { %v3971_v50 = vpop.eup %3970 }
 0x388   : > { %v3973_v37 = vpop.eup %3972 }
 0x389   : > { %v3975_v47 = vpop.eup %3974  ;;  %v1568_v43 = vmul.f32 %v3973_v37, %v3971_v50  ;;  %v5377_v50 = vld [vmem:[#allocation7 + $0xb0] sm:$0xff]  ;;  %v5380_v37 = vld [vmem:[#allocation7 + $0x88] sm:$0xff] }
 0x38a   : > { %v1567_v35 = vmul.f32 %v3975_v47, %v5117_v29  ;;  %v3977_v49 = vpop.eup %3976  ;;  %6404 = vst [vmem:[#allocation41_spill] sm:$0xff] %v5377_v50  ;;  %6405 = vst [vmem:[#allocation36_spill] sm:$0xff] %v5380_v37  ;;  %v5383_v47 = vld [vmem:[#allocation7 + $0x98] sm:$0xff] }
 0x38b   : > { %6406 = vst [vmem:[#allocation43_spill] sm:$0xff] %v5383_v47 }
 0x38c   : > { %v1569_v26 = vadd.f32 %v1568_v43, %v1567_v35  ;;  %v5389_v35 = vld [vmem:[#allocation7 + $0x90] sm:$0xff]  ;;  %v5392_v43 = vld [vmem:[#allocation7 + $0x68] sm:$0xff] }
 0x38d   : > { %6408 = vst [vmem:[#allocation45_spill] sm:$0xff] %v5389_v35  ;;  %6409 = vst [vmem:[#allocation40_spill] sm:$0xff] %v5392_v43 }
 0x38e   : > { %1586 = vadd.xlane.f32.xlu0 %v1569_v26  ;;  %3978 = vtanh.f32 %v1569_v26  ;;  %v1583_v39 = vsel %vm1577_vm13, %v1569_v26, 0.0  ;;  %v5220_v33 = vsel %vm1577_vm13, %v1569_v26, %v5117_v29  ;;  %v5287_v29 = vld [vmem:[#allocation7 + $0x198] sm:$0xff]  ;;  %v5398_v26 = vld [vmem:[#allocation7 + $0x60] sm:$0xff] }
 0x38f   : > { %3714 = vst [vmem:[%s5004_s28 + $0x10] sm:$0xff] %v1583_v39  ;;  %6411 = vst [vmem:[#allocation42_spill] sm:$0xff] %v5398_v26  ;;  %v5401_v39 = vld [vmem:[#allocation7 + $0x70] sm:$0xff] }
 0x390   : > { %6412 = vst [vmem:[#allocation49_spill] sm:$0xff] %v5401_v39 }
 0x39b   : > { %v3979_v55 = vpop.eup %3978 }
 0x39c   : > { %v1571_v42 = vmul.f32 %v3979_v55, %v3977_v49  ;;  %v5404_v49 = vld [vmem:[#allocation7 + $0x48] sm:$0xff]  ;;  %v5407_v55 = vld [vmem:[#allocation7 + $0x58] sm:$0xff] }
 0x39d   : > { %6413 = vst [vmem:[#allocation44_spill] sm:$0xff] %v5404_v49  ;;  %6414 = vst [vmem:[#allocation51_spill] sm:$0xff] %v5407_v55 }
 0x39e   : > { %v5224_v31 = vsel %vm1577_vm13, %v1571_v42, %v5121_v28  ;;  %v1580_v38 = vsel %vm1577_vm13, %v1571_v42, 0.0  ;;  %v5290_v28 = vld [vmem:[#allocation7 + $0x180] sm:$0xff] }
 0x39f   : > { %3713 = vst [vmem:[%s5013_s23 + $0x10] sm:$0xff] %v1580_v38  ;;  %1666 = vmatmul.mubr.f32.vlgmr.msra.gmra.mxu0 %v5224_v31  ;;  %1737 = vmatmul.mubr.f32.vlgmr.msra.gmra.mxu1 %v5224_v31  ;;  %v5410_v42 = vld [vmem:[#allocation7 + $0x40] sm:$0xff]  ;;  %v5413_v38 = vld [vmem:[#allocation7 + $0x50] sm:$0xff] }
 0x3a0   : > { %1771 = vmatpush1.msra.mxu0 %v6297_v61  ;;  %1842 = vmatpush1.msra.mxu1 %v6305_v24  ;;  %v3716_v61 = vld [vmem:[%s4606_s22 + $0x18] sm:$0xff]  ;;  %v5284_v24 = vld [vmem:[#allocation7 + $0x188] sm:$0xff]  ;;  %6415 = vst [vmem:[#allocation46_spill] sm:$0xff] %v5410_v42  ;;  %6416 = vst [vmem:[#allocation53_spill] sm:$0xff] %v5413_v38 }
 0x3a1   : > { %1772 = vmatprep.subr.mxu0 %v6298_v1  ;;  %1843 = vmatprep.subr.mxu1 %v4868_v62  ;;  %v5254_v62 = vld [vmem:[#allocation7 + $0x1e0] sm:$0xff] }
 0x3a2   : > { %1773 = vmatpush1.msra.mxu0 %v6299_v56  ;;  %1844 = vmatpush1.msra.mxu1 %v4876_v59  ;;  %v5263_v59 = vld [vmem:[#allocation7 + $0x1d8] sm:$0xff]  ;;  %v5266_v1 = vld [vmem:[#allocation7 + $0x1c0] sm:$0xff]  ;;  %v5269_v56 = vld [vmem:[#allocation7 + $0x1d0] sm:$0xff] }
 0x3a3   : > { %1774 = vmatprep.subr.mxu0 %v6300_v7  ;;  %1845 = vmatprep.subr.mxu1 %v4880_v0  ;;  %v5248_v0 = vld [vmem:[#allocation7 + $0x1e8] sm:$0xff] }
 0x3a4   : > { %1775 = vmatpush1.msra.mxu0 %v6301_v30  ;;  %1846 = vmatpush1.msra.mxu1 %v4884_v54  ;;  %v5251_v54 = vld [vmem:[#allocation7 + $0x1f8] sm:$0xff]  ;;  %v5272_v7 = vld [vmem:[#allocation7 + $0x1a8] sm:$0xff] }
 0x3a5   : > { %1776 = vmatprep.subr.mxu0 %v6302_v44  ;;  %1847 = vmatprep.subr.mxu1 %v4887_v63  ;;  %v5257_v63 = vld [vmem:[#allocation7 + $0x1f0] sm:$0xff]  ;;  %v5275_v30 = vld [vmem:[#allocation7 + $0x1b8] sm:$0xff]  ;;  %v5278_v44 = vld [vmem:[#allocation7 + $0x1a0] sm:$0xff] }
 0x3a6   : > { %1777 = vmatpush1.msra.mxu0 %v6303_v34  ;;  %1810 = vmatprep.mubr.f32.mxu0 %v6275_v58  ;;  %v5281_v34 = vld [vmem:[#allocation7 + $0x1b0] sm:$0xff] }
 0x3a7   : > { %1848 = vmatpush1.msra.mxu1 %v4894_v60  ;;  %1881 = vmatprep.mubr.f32.mxu1 %v6275_v58  ;;  %v5260_v60 = vld [vmem:[#allocation7 + $0x1c8] sm:$0xff] }
 0x3a8   : > { %3717 = vmatmul.mubr.msk.f32.vlgmr.msra.gmra.mxu0 %vm693_vm2, %v3716_v61  ;;  %3718 = vmatmul.mubr.msk.f32.vlgmr.msra.gmra.mxu1 %vm693_vm2, %v3716_v61  ;;  %v5416_v61 = vld [vmem:[#allocation7 + $0x28] sm:$0xff] }
 0x3a9   : > { %1945 = vmatprep.subr.mxu0 %v5248_v0  ;;  %2016 = vmatprep.subr.mxu1 %v5251_v54  ;;  %6417 = vst [vmem:[#allocation48_spill] sm:$0xff] %v5416_v61 }
 0x3aa   : > { %1946 = vmatpush1.msra.mxu0 %v5254_v62  ;;  %2017 = vmatpush1.msra.mxu1 %v5257_v63 }
 0x3ab   : > { %1947 = vmatprep.subr.mxu0 %v5260_v60  ;;  %2018 = vmatprep.subr.mxu1 %v5263_v59 }
 0x3ac   : > { %1948 = vmatpush1.msra.mxu0 %v5266_v1  ;;  %2019 = vmatpush1.msra.mxu1 %v5269_v56 }
 0x3ad   : > { %1949 = vmatprep.subr.mxu0 %v5272_v7  ;;  %2020 = vmatprep.subr.mxu1 %v5275_v30 }
 0x3ae   : > { %1950 = vmatpush1.msra.mxu0 %v5278_v44  ;;  %2021 = vmatpush1.msra.mxu1 %v5281_v34 }
 0x3af   : > { %1951 = vmatprep.subr.mxu0 %v5284_v24  ;;  %2022 = vmatprep.subr.mxu1 %v5287_v29 }
 0x3b0   : > { %1952 = vmatpush1.msra.mxu0 %v5290_v28  ;;  %2023 = vmatpush1.msra.mxu1 %v5293_v57 }
 0x3b1   : > { %1953 = vmatprep.subr.mxu0 %v5296_v46  ;;  %2024 = vmatprep.subr.mxu1 %v5299_v41 }
 0x3b2   : > { %1954 = vmatpush1.msra.mxu0 %v5302_v36  ;;  %2025 = vmatpush1.msra.mxu1 %v5305_v32 }
 0x3b3   : > { %1955 = vmatprep.subr.mxu0 %v5308_v2  ;;  %2026 = vmatprep.subr.mxu1 %v5311_v3 }
 0x3b4   : > { %1956 = vmatpush1.msra.mxu0 %v5314_v4  ;;  %2027 = vmatpush1.msra.mxu1 %v5317_v5 }
 0x3b5   : > { %1957 = vmatprep.subr.mxu0 %v5320_v6  ;;  %2028 = vmatprep.subr.mxu1 %v5323_v8 }
 0x3b6   : > { %1958 = vmatpush1.msra.mxu0 %v5326_v9  ;;  %2029 = vmatpush1.msra.mxu1 %v5329_v10 }
 0x3b7   : > { %1959 = vmatprep.subr.mxu0 %v5332_v11  ;;  %2030 = vmatprep.subr.mxu1 %v5335_v12 }
 0x3b8   : > { %1960 = vmatpush1.msra.mxu0 %v5338_v13  ;;  %2031 = vmatpush1.msra.mxu1 %v5341_v14 }
 0x3b9   : > { %1961 = vmatprep.subr.mxu0 %v5344_v15  ;;  %2032 = vmatprep.subr.mxu1 %v5347_v16 }
 0x3ba   : > { %1962 = vmatpush1.msra.mxu0 %v5350_v17  ;;  %2033 = vmatpush1.msra.mxu1 %v5353_v18 }
 0x3bb   : > { %1963 = vmatprep.subr.mxu0 %v5356_v19  ;;  %2034 = vmatprep.subr.mxu1 %v5359_v20 }
 0x3bc   : > { %1964 = vmatpush1.msra.mxu0 %v5362_v21  ;;  %2035 = vmatpush1.msra.mxu1 %v5365_v22 }
 0x3bd   : > { %1965 = vmatprep.subr.mxu0 %v5368_v23  ;;  %2036 = vmatprep.subr.mxu1 %v5371_v25 }
 0x3be   : > { %1966 = vmatpush1.msra.mxu0 %v5374_v27  ;;  %2037 = vmatpush1.msra.mxu1 %v5377_v50 }
 0x3bf   : > { %1967 = vmatprep.subr.mxu0 %v5380_v37  ;;  %2038 = vmatprep.subr.mxu1 %v5383_v47 }
 0x3c0   : > { %1968 = vmatpush1.msra.mxu0 %v5386_v45  ;;  %2039 = vmatpush1.msra.mxu1 %v5389_v35 }
 0x3c1   : > { %1969 = vmatprep.subr.mxu0 %v5392_v43  ;;  %2040 = vmatprep.subr.mxu1 %v5395_v53 }
 0x3c2   : > { %1970 = vmatpush1.msra.mxu0 %v5398_v26  ;;  %2041 = vmatpush1.msra.mxu1 %v5401_v39  ;;  %v5419_v39 = vld [vmem:[#allocation7 + $0x38] sm:$0xff] }
 0x3c3   : > { %1971 = vmatprep.subr.mxu0 %v5404_v49  ;;  %2042 = vmatprep.subr.mxu1 %v5407_v55  ;;  %6418 = vst [vmem:[#allocation55_spill] sm:$0xff] %v5419_v39  ;;  %v5422_v49 = vld [vmem:[#allocation7 + $0x20] sm:$0xff]  ;;  %v5425_v55 = vld [vmem:[#allocation7 + $0x30] sm:$0xff] }
 0x3c4   : > { %1972 = vmatpush1.msra.mxu0 %v5410_v42  ;;  %2043 = vmatpush1.msra.mxu1 %v5413_v38  ;;  %6419 = vst [vmem:[#allocation50_spill] sm:$0xff] %v5422_v49  ;;  %6420 = vst [vmem:[#allocation57_spill] sm:$0xff] %v5425_v55  ;;  %v5428_v42 = vld [vmem:[#allocation7 + $0x8] sm:$0xff]  ;;  %v5431_v38 = vld [vmem:[#allocation7 + $0x18] sm:$0xff] }
 0x3c5   : > { %1973 = vmatprep.subr.mxu0 %v5416_v61  ;;  %2044 = vmatprep.subr.mxu1 %v5419_v39  ;;  %6421 = vst [vmem:[#allocation52_spill] sm:$0xff] %v5428_v42  ;;  %6422 = vst [vmem:[#allocation59_spill] sm:$0xff] %v5431_v38  ;;  %v5434_v61 = vld [vmem:[#allocation7] sm:$0xff]  ;;  %v5437_v39 = vld [vmem:[#allocation7 + $0x10] sm:$0xff] }
 0x3c6   : > { %1974 = vmatpush1.msra.mxu0 %v5422_v49  ;;  %2045 = vmatpush1.msra.mxu1 %v5425_v55  ;;  %6423 = vst [vmem:[#allocation54_spill] sm:$0xff] %v5434_v61  ;;  %6424 = vst [vmem:[#allocation61_spill] sm:$0xff] %v5437_v39  ;;  %v5442_v55 = vld [vmem:[#allocation5 + $0x68] sm:$0xff] }
 0x3c7   : > { %1975 = vmatprep.subr.mxu0 %v5428_v42  ;;  %2046 = vmatprep.subr.mxu1 %v5431_v38  ;;  %6425 = vst [vmem:[#allocation56_spill] sm:$0xff] %v5442_v55  ;;  %v5445_v42 = vld [vmem:[#allocation5 + $0x78] sm:$0xff] }
 0x3c8   : > { %1976 = vmatpush1.msra.mxu0 %v5434_v61  ;;  %2047 = vmatpush1.msra.mxu1 %v5437_v39  ;;  %6426 = vst [vmem:[#allocation65_spill] sm:$0xff] %v5445_v42 }
 0x3c9   : > { %2009 = vmatprep.mubr.f32.mxu0 %v6275_v58  ;;  %2080 = vmatprep.mubr.f32.mxu1 %v6275_v58 }
 0x3ca   : > { %2114 = vmatprep.subr.mxu0 %v5442_v55  ;;  %2185 = vmatprep.subr.mxu1 %v5445_v42 }
 0x45f   : > { %v1667_v38 = vpop.f32.mrf.mxu0  ;;  %v1738_v49 = vpop.f32.mrf.mxu1 }
 0x461   : > { %v1669_v26 = vpop.f32.mrf.mxu0  ;;  %v1740_v53 = vpop.f32.mrf.mxu1 }
 0x468   : > { %v1812_v61 = vpop.f32.mrf.mxu0  ;;  %v1883_v45 = vpop.f32.mrf.mxu1 }
 0x469   : > { %v1813_v43 = vadd.f32 %v1812_v61, %v1667_v38  ;;  %v1884_v23 = vadd.f32 %v1883_v45, %v1738_v49 }
 0x46a   : > { %v1814_v35 = vpop.f32.mrf.mxu0  ;;  %v1885_v27 = vpop.f32.mrf.mxu1 }
 0x46b   : > { %v1888_v39 = vadd.f32 %v1813_v43, %v4989_v48  ;;  %v1815_v47 = vadd.f32 %v1814_v35, %v1669_v26  ;;  %v1886_v25 = vadd.f32 %v1885_v27, %v1740_v53  ;;  %v1890_v38 = vadd.f32 %v1884_v23, %v4998_v51  ;;  %v6427_v26 = vld [vmem:[#allocation66_spill] sm:$0xff] }
 0x46c   : > { %vm1921_vm14 = vcmp.eq.s32.totalorder %v6427_v26, 1  ;;  %v5505_v26 = vld [vmem:[#allocation5 + $0x10] sm:$0xff] }
 0x46d   : > { %v3719_v37 = vmul.f32 -1.442695, %v1888_v39  ;;  %v1889_v50 = vadd.f32 %v1815_v47, %v4991_v52  ;;  %v1891_v42 = vadd.f32 %v1886_v25, %v4995_v40 }
 0x46f   : > { %3980 = vpow2.f32 %v3719_v37  ;;  %v3720_v55 = vmul.f32 -1.442695, %v1889_v50  ;;  %v3721_v22 = vmul.f32 -1.442695, %v1891_v42  ;;  %v5464_v42 = vld [vmem:[#allocation5 + $0x60] sm:$0xff] }
 0x471   : > { %3982 = vpow2.f32 %v3720_v55 }
 0x472   : > { %3984 = vpow2.f32 %v3721_v22 }
 0x47c   : > { %v3981_v21 = vpop.eup %3980 }
 0x47d   : > { %v1895_v61 = vadd.f32 1.0, %v3981_v21 }
 0x47e   : > { %v3983_v20 = vpop.eup %3982 }
 0x47f   : > { %3986 = vrcp.f32 %v1895_v61  ;;  %v1901_v35 = vadd.f32 1.0, %v3983_v20  ;;  %v3985_v37 = vpop.eup %3984  ;;  %v5476_v61 = vld [vmem:[#allocation5 + $0x40] sm:$0xff] }
 0x480   : > { %3988 = vtanh.f32 %v1890_v38  ;;  %v1908_v27 = vadd.f32 1.0, %v3985_v37  ;;  %v5467_v38 = vld [vmem:[#allocation5 + $0x70] sm:$0xff]  ;;  %v5482_v37 = vld [vmem:[#allocation5 + $0x28] sm:$0xff] }
 0x481   : > { %3990 = vrcp.f32 %v1901_v35  ;;  %v5479_v35 = vld [vmem:[#allocation5 + $0x50] sm:$0xff] }
 0x482   : > { %3992 = vrcp.f32 %v1908_v27  ;;  %v5494_v27 = vld [vmem:[#allocation5 + $0x8] sm:$0xff] }
 0x48c   : > { %v3987_v50 = vpop.eup %3986 }
 0x48d   : > { %v3989_v47 = vpop.eup %3988 }
 0x48e   : > { %v3991_v43 = vpop.eup %3990  ;;  %v1912_v45 = vmul.f32 %v3989_v47, %v3987_v50  ;;  %v5485_v50 = vld [vmem:[#allocation5 + $0x38] sm:$0xff]  ;;  %v5488_v47 = vld [vmem:[#allocation5 + $0x20] sm:$0xff] }
 0x48f   : > { %v1911_v25 = vmul.f32 %v3991_v43, %v5220_v33  ;;  %v3993_v22 = vpop.eup %3992  ;;  %v5491_v43 = vld [vmem:[#allocation5 + $0x30] sm:$0xff] }
 0x491   : > { %v1913_v53 = vadd.f32 %v1912_v45, %v1911_v25  ;;  %v5497_v25 = vld [vmem:[#allocation5 + $0x18] sm:$0xff]  ;;  %v3725_v45 = vld [vmem:[%s4606_s22 + $0x20] sm:$0xff] }
 0x493   : > { %1930 = vadd.xlane.f32.xlu1 %v1913_v53  ;;  %3994 = vtanh.f32 %v1913_v53  ;;  %v1927_v21 = vsel %vm1921_vm14, %v1913_v53, 0.0  ;;  %v5455_v20 = vsel %vm1921_vm14, %v1913_v53, %v5220_v33  ;;  %v5470_v33 = vld [vmem:[#allocation5 + $0x48] sm:$0xff]  ;;  %v5501_v53 = vld [vmem:[#allocation5] sm:$0xff] }
 0x494   : > { %3723 = vst [vmem:[%s5004_s28 + $0x18] sm:$0xff] %v1927_v21  ;;  %v6428_v21 = vld [vmem:[#allocation35_spill] sm:$0xff] }
 0x4a0   : > { %v3995_v23 = vpop.eup %3994 }
 0x4a1   : > { %v1915_v39 = vmul.f32 %v3995_v23, %v3993_v22  ;;  %v6429_v22 = vld [vmem:[#allocation30_spill] sm:$0xff]  ;;  %v6430_v23 = vld [vmem:[#allocation37_spill] sm:$0xff] }
 0x4a3   : > { %v5459_v49 = vsel %vm1921_vm14, %v1915_v39, %v5224_v31  ;;  %v1924_v55 = vsel %vm1921_vm14, %v1915_v39, 0.0  ;;  %v5473_v31 = vld [vmem:[#allocation5 + $0x58] sm:$0xff] }
 0x4a4   : > { %3722 = vst [vmem:[%s5013_s23 + $0x18] sm:$0xff] %v1924_v55  ;;  %2010 = vmatmul.mubr.f32.vlgmr.msra.gmra.mxu0 %v5459_v49  ;;  %2081 = vmatmul.mubr.f32.vlgmr.msra.gmra.mxu1 %v5459_v49  ;;  %v6431_v39 = vld [vmem:[#allocation32_spill] sm:$0xff]  ;;  %v6432_v55 = vld [vmem:[#allocation39_spill] sm:$0xff] }
 0x4a5   : > { %2115 = vmatpush1.msra.mxu0 %v5464_v42  ;;  %2186 = vmatpush1.msra.mxu1 %v5467_v38 }
 0x4a6   : > { %2116 = vmatprep.subr.mxu0 %v5470_v33  ;;  %2187 = vmatprep.subr.mxu1 %v5473_v31 }
 0x4a7   : > { %2117 = vmatpush1.msra.mxu0 %v5476_v61  ;;  %2188 = vmatpush1.msra.mxu1 %v5479_v35 }
 0x4a8   : > { %2118 = vmatprep.subr.mxu0 %v5482_v37  ;;  %2189 = vmatprep.subr.mxu1 %v5485_v50 }
 0x4a9   : > { %2119 = vmatpush1.msra.mxu0 %v5488_v47  ;;  %2190 = vmatpush1.msra.mxu1 %v5491_v43 }
 0x4aa   : > { %2120 = vmatprep.subr.mxu0 %v5494_v27  ;;  %2191 = vmatprep.subr.mxu1 %v5497_v25 }
 0x4ab   : > { %2121 = vmatpush1.msra.mxu0 %v5501_v53  ;;  %2154 = vmatprep.mubr.f32.mxu0 %v6275_v58 }
 0x4ac   : > { %2192 = vmatpush1.msra.mxu1 %v5505_v26  ;;  %2225 = vmatprep.mubr.f32.mxu1 %v6275_v58 }
 0x4ad   : > { %3726 = vmatmul.mubr.msk.f32.vlgmr.msra.gmra.mxu0 %vm693_vm2, %v3725_v45  ;;  %3727 = vmatmul.mubr.msk.f32.vlgmr.msra.gmra.mxu1 %vm693_vm2, %v3725_v45  ;;  %v6433_v45 = vld [vmem:[#allocation34_spill] sm:$0xff] }
 0x4ae   : > { %2289 = vmatprep.subr.mxu0 %v5248_v0  ;;  %2360 = vmatprep.subr.mxu1 %v5251_v54 }
 0x4af   : > { %2290 = vmatpush1.msra.mxu0 %v5254_v62  ;;  %2361 = vmatpush1.msra.mxu1 %v5257_v63 }
 0x4b0   : > { %2291 = vmatprep.subr.mxu0 %v5260_v60  ;;  %2362 = vmatprep.subr.mxu1 %v5263_v59 }
 0x4b1   : > { %2292 = vmatpush1.msra.mxu0 %v5266_v1  ;;  %2363 = vmatpush1.msra.mxu1 %v5269_v56 }
 0x4b2   : > { %2293 = vmatprep.subr.mxu0 %v5272_v7  ;;  %2364 = vmatprep.subr.mxu1 %v5275_v30 }
 0x4b3   : > { %2294 = vmatpush1.msra.mxu0 %v5278_v44  ;;  %2365 = vmatpush1.msra.mxu1 %v5281_v34 }
 0x4b4   : > { %2295 = vmatprep.subr.mxu0 %v5284_v24  ;;  %2366 = vmatprep.subr.mxu1 %v5287_v29 }
 0x4b5   : > { %2296 = vmatpush1.msra.mxu0 %v5290_v28  ;;  %2367 = vmatpush1.msra.mxu1 %v5293_v57 }
 0x4b6   : > { %2297 = vmatprep.subr.mxu0 %v5296_v46  ;;  %2368 = vmatprep.subr.mxu1 %v5299_v41 }
 0x4b7   : > { %2298 = vmatpush1.msra.mxu0 %v5302_v36  ;;  %2369 = vmatpush1.msra.mxu1 %v5305_v32 }
 0x4b8   : > { %2299 = vmatprep.subr.mxu0 %v5308_v2  ;;  %2370 = vmatprep.subr.mxu1 %v5311_v3 }
 0x4b9   : > { %2300 = vmatpush1.msra.mxu0 %v5314_v4  ;;  %2371 = vmatpush1.msra.mxu1 %v5317_v5 }
 0x4ba   : > { %2301 = vmatprep.subr.mxu0 %v5320_v6  ;;  %2372 = vmatprep.subr.mxu1 %v5323_v8 }
 0x4bb   : > { %2302 = vmatpush1.msra.mxu0 %v5326_v9  ;;  %2373 = vmatpush1.msra.mxu1 %v5329_v10 }
 0x4bc   : > { %2303 = vmatprep.subr.mxu0 %v5332_v11  ;;  %2374 = vmatprep.subr.mxu1 %v5335_v12 }
 0x4bd   : > { %2304 = vmatpush1.msra.mxu0 %v5338_v13  ;;  %2375 = vmatpush1.msra.mxu1 %v5341_v14 }
 0x4be   : > { %2305 = vmatprep.subr.mxu0 %v5344_v15  ;;  %2376 = vmatprep.subr.mxu1 %v5347_v16  ;;  %v6434_v15 = vld [vmem:[#allocation41_spill] sm:$0xff]  ;;  %v6435_v16 = vld [vmem:[#allocation36_spill] sm:$0xff] }
 0x4bf   : > { %2306 = vmatpush1.msra.mxu0 %v5350_v17  ;;  %2377 = vmatpush1.msra.mxu1 %v5353_v18  ;;  %v6436_v17 = vld [vmem:[#allocation43_spill] sm:$0xff]  ;;  %v6437_v18 = vld [vmem:[#allocation38_spill] sm:$0xff] }
 0x4c0   : > { %2307 = vmatprep.subr.mxu0 %v5356_v19  ;;  %2378 = vmatprep.subr.mxu1 %v6428_v21  ;;  %v6438_v19 = vld [vmem:[#allocation45_spill] sm:$0xff]  ;;  %v6439_v21 = vld [vmem:[#allocation40_spill] sm:$0xff] }
 0x4c1   : > { %2308 = vmatpush1.msra.mxu0 %v6429_v22  ;;  %2379 = vmatpush1.msra.mxu1 %v6430_v23  ;;  %v6440_v22 = vld [vmem:[#allocation47_spill] sm:$0xff]  ;;  %v6441_v23 = vld [vmem:[#allocation42_spill] sm:$0xff] }
 0x4c2   : > { %2309 = vmatprep.subr.mxu0 %v6431_v39  ;;  %2380 = vmatprep.subr.mxu1 %v6432_v55  ;;  %v6442_v39 = vld [vmem:[#allocation49_spill] sm:$0xff]  ;;  %v6443_v55 = vld [vmem:[#allocation44_spill] sm:$0xff] }
 0x4c3   : > { %2310 = vmatpush1.msra.mxu0 %v6433_v45  ;;  %2381 = vmatpush1.msra.mxu1 %v6434_v15  ;;  %v6444_v45 = vld [vmem:[#allocation51_spill] sm:$0xff]  ;;  %v6445_v15 = vld [vmem:[#allocation46_spill] sm:$0xff] }
 0x4c4   : > { %2311 = vmatprep.subr.mxu0 %v6435_v16  ;;  %2382 = vmatprep.subr.mxu1 %v6436_v17  ;;  %v6446_v16 = vld [vmem:[#allocation53_spill] sm:$0xff]  ;;  %v6447_v17 = vld [vmem:[#allocation48_spill] sm:$0xff] }
 0x4c5   : > { %2312 = vmatpush1.msra.mxu0 %v6437_v18  ;;  %2383 = vmatpush1.msra.mxu1 %v6438_v19  ;;  %v6448_v18 = vld [vmem:[#allocation55_spill] sm:$0xff]  ;;  %v6449_v19 = vld [vmem:[#allocation50_spill] sm:$0xff] }
 0x4c6   : > { %2313 = vmatprep.subr.mxu0 %v6439_v21  ;;  %2384 = vmatprep.subr.mxu1 %v6440_v22  ;;  %v6450_v21 = vld [vmem:[#allocation57_spill] sm:$0xff]  ;;  %v6451_v22 = vld [vmem:[#allocation52_spill] sm:$0xff] }
 0x4c7   : > { %2314 = vmatpush1.msra.mxu0 %v6441_v23  ;;  %2385 = vmatpush1.msra.mxu1 %v6442_v39  ;;  %v6452_v23 = vld [vmem:[#allocation59_spill] sm:$0xff]  ;;  %v6453_v39 = vld [vmem:[#allocation54_spill] sm:$0xff] }
 0x4c8   : > { %2315 = vmatprep.subr.mxu0 %v6443_v55  ;;  %2386 = vmatprep.subr.mxu1 %v6444_v45  ;;  %v6454_v55 = vld [vmem:[#allocation61_spill] sm:$0xff] }
 0x4c9   : > { %2316 = vmatpush1.msra.mxu0 %v6445_v15  ;;  %2387 = vmatpush1.msra.mxu1 %v6446_v16  ;;  %v6455_v16 = vld [vmem:[#allocation56_spill] sm:$0xff] }
 0x4ca   : > { %2317 = vmatprep.subr.mxu0 %v6447_v17  ;;  %2388 = vmatprep.subr.mxu1 %v6448_v18  ;;  %v6456_v17 = vld [vmem:[#allocation65_spill] sm:$0xff] }
 0x4cb   : > { %2318 = vmatpush1.msra.mxu0 %v6449_v19  ;;  %2389 = vmatpush1.msra.mxu1 %v6450_v21 }
 0x4cc   : > { %2319 = vmatprep.subr.mxu0 %v6451_v22  ;;  %2390 = vmatprep.subr.mxu1 %v6452_v23 }
 0x4cd   : > { %2320 = vmatpush1.msra.mxu0 %v6453_v39  ;;  %2391 = vmatpush1.msra.mxu1 %v6454_v55 }
 0x4ce   : > { %2353 = vmatprep.mubr.f32.mxu0 %v6275_v58  ;;  %2424 = vmatprep.mubr.f32.mxu1 %v6275_v58 }
 0x4cf   : > { %2458 = vmatprep.subr.mxu0 %v6455_v16  ;;  %2529 = vmatprep.subr.mxu1 %v6456_v17 }
 0x564   : > { %v2011_v18 = vpop.f32.mrf.mxu0  ;;  %v2082_v19 = vpop.f32.mrf.mxu1 }
 0x566   : > { %v2013_v15 = vpop.f32.mrf.mxu0  ;;  %v2084_v45 = vpop.f32.mrf.mxu1 }
 0x56d   : > { %v2156_v21 = vpop.f32.mrf.mxu0  ;;  %v2227_v39 = vpop.f32.mrf.mxu1 }
 0x56e   : > { %v2157_v22 = vadd.f32 %v2156_v21, %v2011_v18  ;;  %v2228_v9 = vadd.f32 %v2227_v39, %v2082_v19 }
 0x56f   : > { %v2158_v14 = vpop.f32.mrf.mxu0  ;;  %v2229_v10 = vpop.f32.mrf.mxu1 }
 0x570   : > { %v2232_v23 = vadd.f32 %v2157_v22, %v4989_v48  ;;  %v2159_v13 = vadd.f32 %v2158_v14, %v2013_v15  ;;  %v2230_v16 = vadd.f32 %v2229_v10, %v2084_v45  ;;  %v2234_v18 = vadd.f32 %v2228_v9, %v4998_v51 }
 0x572   : > { %v3728_v55 = vmul.f32 -1.442695, %v2232_v23  ;;  %v2233_v12 = vadd.f32 %v2159_v13, %v4991_v52  ;;  %v2235_v17 = vadd.f32 %v2230_v16, %v4995_v40  ;;  %v2264_v13 = vpop.permute.xlu0 %2263 }
 0x573   : > { %vm2265_vm15 = vcmp.eq.s32.totalorder %v2264_v13, 1 }
 0x574   : > { %3996 = vpow2.f32 %v3728_v55  ;;  %v3729_v11 = vmul.f32 -1.442695, %v2233_v12  ;;  %v3730_v8 = vmul.f32 -1.442695, %v2235_v17 }
 0x576   : > { %3998 = vpow2.f32 %v3729_v11  ;;  %v5583_v16 = vpop.permute.xlu0 %2951 }
 0x577   : > { %4000 = vpow2.f32 %v3730_v8  ;;  %6457 = vst [vmem:[#allocation58_spill] sm:$0xff] %v5583_v16  ;;  %v6481_v16 = vld [vmem:[#allocation34_spill] sm:$0xff] }
 0x57a   : > { %v5590_v8 = vpop.permute.xlu0 %3295 }
 0x57b   : > { %6458 = vst [vmem:[#allocation67_spill] sm:$0xff] %v5590_v8  ;;  %v6480_v8 = vld [vmem:[#allocation39_spill] sm:$0xff] }
 0x57e   : > { %v5592_v23 = vpop.permute.xlu0 %907 }
 0x57f   : > { %6459 = vst [vmem:[#allocation60_spill] sm:$0xff] %v5592_v23  ;;  %v6477_v23 = vld [vmem:[#allocation30_spill] sm:$0xff] }
 0x581   : > { %v3997_v6 = vpop.eup %3996 }
 0x582   : > { %v2239_v21 = vadd.f32 1.0, %v3997_v6  ;;  %v5594_v39 = vpop.xlane.xlu0 %1242 }
 0x583   : > { %v3999_v5 = vpop.eup %3998  ;;  %6460 = vst [vmem:[#allocation63_spill] sm:$0xff] %v5594_v39  ;;  %v6479_v39 = vld [vmem:[#allocation32_spill] sm:$0xff] }
 0x584   : > { %4002 = vrcp.f32 %v2239_v21  ;;  %v2245_v14 = vadd.f32 1.0, %v3999_v5  ;;  %v4001_v12 = vpop.eup %4000 }
 0x585   : > { %4004 = vtanh.f32 %v2234_v18  ;;  %v2252_v22 = vadd.f32 1.0, %v4001_v12  ;;  %v6478_v12 = vld [vmem:[#allocation37_spill] sm:$0xff] }
 0x586   : > { %4006 = vrcp.f32 %v2245_v14  ;;  %v1587_v18 = vpop.xlane.xlu0 %1586 }
 0x587   : > { %4008 = vrcp.f32 %v2252_v22  ;;  %vm1588_vm0 = vcmp.ne.f32.partialorder %v1587_v18, 0.0  ;;  %v6463_v22 = vld [vmem:[#allocation70_spill] sm:$0xff]  ;;  %v6470_v18 = vld [vmem:[#allocation29_spill] sm:$0xff] }
 0x588   : > { %vm1589_vm9 = vmand %vm1572_vm6, %vm1588_vm0 }
 0x591   : > { %v4003_v15 = vpop.eup %4002 }
 0x592   : > { %v4005_v11 = vpop.eup %4004 }
 0x593   : > { %v4007_v10 = vpop.eup %4006  ;;  %v2256_v19 = vmul.f32 %v4005_v11, %v4003_v15  ;;  %v3734_v15 = vld [vmem:[%s4606_s22 + $0x28] sm:$0xff] }
 0x594   : > { %v2255_v17 = vmul.f32 %v4007_v10, %v5455_v20  ;;  %v4009_v55 = vpop.eup %4008  ;;  %v6462_v10 = vld [vmem:[#allocation69_spill] sm:$0xff] }
 0x596   : > { %v2257_v9 = vadd.f32 %v2256_v19, %v2255_v17  ;;  %v6464_v17 = vld [vmem:[#allocation71_spill] sm:$0xff]  ;;  %v6465_v19 = vld [vmem:[#allocation72_spill] sm:$0xff] }
 0x598   : > { %2274 = vadd.xlane.f32.xlu0 %v2257_v9  ;;  %4010 = vtanh.f32 %v2257_v9  ;;  %v2271_v5 = vsel %vm2265_vm15, %v2257_v9, 0.0  ;;  %v5587_v6 = vsel %vm2265_vm15, %v2257_v9, %v5455_v20  ;;  %v1931_v20 = vpop.xlane.xlu1 %1930  ;;  %v6466_v9 = vld [vmem:[#allocation74_spill] sm:$0xff] }
 0x599   : > { %3732 = vst [vmem:[%s5004_s28 + $0x20] sm:$0xff] %v2271_v5  ;;  %vm1932_vm10 = vcmp.ne.f32.partialorder %v1931_v20, 0.0  ;;  %v6467_v5 = vld [vmem:[#allocation23_spill] sm:$0xff]  ;;  %v6473_v20 = vld [vmem:[#allocation26_spill] sm:$0xff] }
 0x59a   : > { %vm1933_vm6 = vmand %vm1916_vm7, %vm1932_vm10 }
 0x59b   : > { %v3724_v11 = vsel %vm1933_vm6, 1.0, %v6275_v58 }
 0x5a5   : > { %v4011_v45 = vpop.eup %4010 }
 0x5a6   : > { %v2259_v21 = vmul.f32 %v4011_v45, %v4009_v55  ;;  %v6468_v55 = vld [vmem:[#allocation27_spill] sm:$0xff]  ;;  %v6469_v45 = vld [vmem:[#allocation24_spill] sm:$0xff] }
 0x5a8   : > { %v5597_v14 = vsel %vm2265_vm15, %v2259_v21, %v5459_v49  ;;  %v2268_v13 = vsel %vm2265_vm15, %v2259_v21, 0.0  ;;  %v3715_v49 = vsel %vm1589_vm9, 1.0, %v6275_v58  ;;  %v6471_v21 = vld [vmem:[#allocation25_spill] sm:$0xff] }
 0x5a9   : > { %3731 = vst [vmem:[%s5013_s23 + $0x20] sm:$0xff] %v2268_v13  ;;  %2354 = vmatmul.mubr.f32.vlgmr.msra.gmra.mxu0 %v5597_v14  ;;  %2425 = vmatmul.mubr.f32.vlgmr.msra.gmra.mxu1 %v5597_v14  ;;  %v6472_v13 = vld [vmem:[#allocation31_spill] sm:$0xff] }
 0x5aa   : > { %2459 = vmatpush1.msra.mxu0 %v5464_v42  ;;  %2530 = vmatpush1.msra.mxu1 %v5467_v38 }
 0x5ab   : > { %2460 = vmatprep.subr.mxu0 %v5470_v33  ;;  %2531 = vmatprep.subr.mxu1 %v5473_v31 }
 0x5ac   : > { %2461 = vmatpush1.msra.mxu0 %v5476_v61  ;;  %2532 = vmatpush1.msra.mxu1 %v5479_v35 }
 0x5ad   : > { %2462 = vmatprep.subr.mxu0 %v5482_v37  ;;  %2533 = vmatprep.subr.mxu1 %v5485_v50 }
 0x5ae   : > { %2463 = vmatpush1.msra.mxu0 %v5488_v47  ;;  %2534 = vmatpush1.msra.mxu1 %v5491_v43 }
 0x5af   : > { %2464 = vmatprep.subr.mxu0 %v5494_v27  ;;  %2535 = vmatprep.subr.mxu1 %v5497_v25 }
 0x5b0   : > { %1595 = vperm.xlu0 %3920, %v3715_v49   ;;  %2465 = vmatpush1.msra.mxu0 %v5501_v53  ;;  %v6474_v49 = vld [vmem:[#allocation33_spill] sm:$0xff] }
 0x5b1   : > { %2498 = vmatprep.mubr.f32.mxu0 %v6275_v58  ;;  %2536 = vmatpush1.msra.mxu1 %v5505_v26 }
 0x5b2   : > { %2569 = vmatprep.mubr.f32.mxu1 %v6275_v58  ;;  %3735 = vmatmul.mubr.msk.f32.vlgmr.msra.gmra.mxu0 %vm693_vm2, %v3734_v15 }
 0x5b3   : > { %3736 = vmatmul.mubr.msk.f32.vlgmr.msra.gmra.mxu1 %vm693_vm2, %v3734_v15  ;;  %2633 = vmatprep.subr.mxu0 %v5248_v0  ;;  %v6475_v15 = vld [vmem:[#allocation28_spill] sm:$0xff] }
 0x5b4   : > { %1939 = vperm.xlu0 %3920, %v3724_v11   ;;  %2704 = vmatprep.subr.mxu1 %v5251_v54  ;;  %v6476_v11 = vld [vmem:[#allocation35_spill] sm:$0xff] }
 0x5b5   : > { %2634 = vmatpush1.msra.mxu0 %v5254_v62  ;;  %2705 = vmatpush1.msra.mxu1 %v5257_v63 }
 0x5b6   : > { %2635 = vmatprep.subr.mxu0 %v5260_v60  ;;  %2706 = vmatprep.subr.mxu1 %v5263_v59 }
 0x5b7   : > { %2636 = vmatpush1.msra.mxu0 %v5266_v1  ;;  %2707 = vmatpush1.msra.mxu1 %v5269_v56 }
 0x5b8   : > { %2637 = vmatprep.subr.mxu0 %v5272_v7  ;;  %2708 = vmatprep.subr.mxu1 %v5275_v30 }
 0x5b9   : > { %2638 = vmatpush1.msra.mxu0 %v5278_v44  ;;  %2709 = vmatpush1.msra.mxu1 %v5281_v34 }
 0x5ba   : > { %2639 = vmatprep.subr.mxu0 %v5284_v24  ;;  %2710 = vmatprep.subr.mxu1 %v5287_v29 }
 0x5bb   : > { %2640 = vmatpush1.msra.mxu0 %v5290_v28  ;;  %2711 = vmatpush1.msra.mxu1 %v5293_v57 }
 0x5bc   : > { %2641 = vmatprep.subr.mxu0 %v5296_v46  ;;  %2712 = vmatprep.subr.mxu1 %v5299_v41 }
 0x5bd   : > { %2642 = vmatpush1.msra.mxu0 %v5302_v36  ;;  %2713 = vmatpush1.msra.mxu1 %v5305_v32 }
 0x5be   : > { %2643 = vmatprep.subr.mxu0 %v5308_v2  ;;  %2714 = vmatprep.subr.mxu1 %v5311_v3 }
 0x5bf   : > { %2644 = vmatpush1.msra.mxu0 %v5314_v4  ;;  %2715 = vmatpush1.msra.mxu1 %v6462_v10 }
 0x5c0   : > { %2645 = vmatprep.subr.mxu0 %v6463_v22  ;;  %2716 = vmatprep.subr.mxu1 %v6464_v17 }
 0x5c1   : > { %2646 = vmatpush1.msra.mxu0 %v6465_v19  ;;  %2717 = vmatpush1.msra.mxu1 %v6466_v9 }
 0x5c2   : > { %2647 = vmatprep.subr.mxu0 %v6467_v5  ;;  %2718 = vmatprep.subr.mxu1 %v6468_v55 }
 0x5c3   : > { %2648 = vmatpush1.msra.mxu0 %v6469_v45  ;;  %2719 = vmatpush1.msra.mxu1 %v6470_v18 }
 0x5c4   : > { %2649 = vmatprep.subr.mxu0 %v6471_v21  ;;  %2720 = vmatprep.subr.mxu1 %v6472_v13  ;;  %v6482_v21 = vld [vmem:[#allocation41_spill] sm:$0xff]  ;;  %v6483_v13 = vld [vmem:[#allocation36_spill] sm:$0xff] }
 0x5c5   : > { %2650 = vmatpush1.msra.mxu0 %v6473_v20  ;;  %2721 = vmatpush1.msra.mxu1 %v6474_v49  ;;  %v6484_v20 = vld [vmem:[#allocation43_spill] sm:$0xff]  ;;  %v6485_v49 = vld [vmem:[#allocation38_spill] sm:$0xff] }
 0x5c6   : > { %2651 = vmatprep.subr.mxu0 %v6475_v15  ;;  %2722 = vmatprep.subr.mxu1 %v6476_v11  ;;  %v6486_v15 = vld [vmem:[#allocation45_spill] sm:$0xff]  ;;  %v6487_v11 = vld [vmem:[#allocation40_spill] sm:$0xff] }
 0x5c7   : > { %2652 = vmatpush1.msra.mxu0 %v6477_v23  ;;  %2723 = vmatpush1.msra.mxu1 %v6478_v12  ;;  %v6488_v23 = vld [vmem:[#allocation47_spill] sm:$0xff]  ;;  %v6489_v12 = vld [vmem:[#allocation42_spill] sm:$0xff] }
 0x5c8   : > { %2653 = vmatprep.subr.mxu0 %v6479_v39  ;;  %2724 = vmatprep.subr.mxu1 %v6480_v8  ;;  %v6490_v39 = vld [vmem:[#allocation49_spill] sm:$0xff]  ;;  %v6491_v8 = vld [vmem:[#allocation44_spill] sm:$0xff] }
 0x5c9   : > { %2654 = vmatpush1.msra.mxu0 %v6481_v16  ;;  %2725 = vmatpush1.msra.mxu1 %v6482_v21  ;;  %v6492_v16 = vld [vmem:[#allocation51_spill] sm:$0xff]  ;;  %v6493_v21 = vld [vmem:[#allocation46_spill] sm:$0xff] }
 0x5ca   : > { %2655 = vmatprep.subr.mxu0 %v6483_v13  ;;  %2726 = vmatprep.subr.mxu1 %v6484_v20  ;;  %v6494_v13 = vld [vmem:[#allocation53_spill] sm:$0xff]  ;;  %v6495_v20 = vld [vmem:[#allocation48_spill] sm:$0xff] }
 0x5cb   : > { %2656 = vmatpush1.msra.mxu0 %v6485_v49  ;;  %2727 = vmatpush1.msra.mxu1 %v6486_v15  ;;  %v6496_v49 = vld [vmem:[#allocation55_spill] sm:$0xff]  ;;  %v6497_v15 = vld [vmem:[#allocation50_spill] sm:$0xff] }
 0x5cc   : > { %2657 = vmatprep.subr.mxu0 %v6487_v11  ;;  %2728 = vmatprep.subr.mxu1 %v6488_v23  ;;  %v6498_v11 = vld [vmem:[#allocation57_spill] sm:$0xff]  ;;  %v6499_v23 = vld [vmem:[#allocation52_spill] sm:$0xff] }
 0x5cd   : > { %2658 = vmatpush1.msra.mxu0 %v6489_v12  ;;  %2729 = vmatpush1.msra.mxu1 %v6490_v39  ;;  %v6500_v12 = vld [vmem:[#allocation59_spill] sm:$0xff]  ;;  %v6501_v39 = vld [vmem:[#allocation54_spill] sm:$0xff] }
 0x5ce   : > { %2659 = vmatprep.subr.mxu0 %v6491_v8  ;;  %2730 = vmatprep.subr.mxu1 %v6492_v16  ;;  %v6502_v8 = vld [vmem:[#allocation61_spill] sm:$0xff] }
 0x5cf   : > { %2660 = vmatpush1.msra.mxu0 %v6493_v21  ;;  %2731 = vmatpush1.msra.mxu1 %v6494_v13  ;;  %v6503_v13 = vld [vmem:[#allocation56_spill] sm:$0xff] }
 0x5d0   : > { %2661 = vmatprep.subr.mxu0 %v6495_v20  ;;  %2732 = vmatprep.subr.mxu1 %v6496_v49  ;;  %v6504_v20 = vld [vmem:[#allocation65_spill] sm:$0xff] }
 0x5d1   : > { %2662 = vmatpush1.msra.mxu0 %v6497_v15  ;;  %2733 = vmatpush1.msra.mxu1 %v6498_v11 }
 0x5d2   : > { %2663 = vmatprep.subr.mxu0 %v6499_v23  ;;  %2734 = vmatprep.subr.mxu1 %v6500_v12 }
 0x5d3   : > { %2664 = vmatpush1.msra.mxu0 %v6501_v39  ;;  %2735 = vmatpush1.msra.mxu1 %v6502_v8 }
 0x5d4   : > { %2697 = vmatprep.mubr.f32.mxu0 %v6275_v58  ;;  %2768 = vmatprep.mubr.f32.mxu1 %v6275_v58 }
 0x5d5   : > { %2802 = vmatprep.subr.mxu0 %v6503_v13  ;;  %2873 = vmatprep.subr.mxu1 %v6504_v20 }
 0x669   : > { %v2355_v49 = vpop.f32.mrf.mxu0  ;;  %v2426_v15 = vpop.f32.mrf.mxu1 }
 0x66b   : > { %v2357_v21 = vpop.f32.mrf.mxu0  ;;  %v2428_v16 = vpop.f32.mrf.mxu1 }
 0x672   : > { %v2500_v11 = vpop.f32.mrf.mxu0 }
 0x673   : > { %v2501_v23 = vadd.f32 %v2500_v11, %v2355_v49  ;;  %v2571_v39 = vpop.f32.mrf.mxu1 }
 0x674   : > { %v2502_v18 = vpop.f32.mrf.mxu0  ;;  %v2572_v19 = vadd.f32 %v2571_v39, %v2426_v15  ;;  %v6530_v15 = vld [vmem:[#allocation45_spill] sm:$0xff] }
 0x675   : > { %v2576_v12 = vadd.f32 %v2501_v23, %v4989_v48  ;;  %v2503_v45 = vadd.f32 %v2502_v18, %v2357_v21  ;;  %v2573_v9 = vpop.f32.mrf.mxu1  ;;  %v6505_v18 = vld [vmem:[#allocation68_spill] sm:$0xff] }
 0x676   : > { %v2574_v13 = vadd.f32 %v2573_v9, %v2428_v16  ;;  %v2578_v49 = vadd.f32 %v2572_v19, %v4998_v51  ;;  %vm2609_vm7 = vcmp.eq.s32.totalorder %v6505_v18, 1  ;;  %v6542_v18 = vld [vmem:[#allocation57_spill] sm:$0xff] }
 0x677   : > { %v3737_v8 = vmul.f32 -1.442695, %v2576_v12  ;;  %v2577_v55 = vadd.f32 %v2503_v45, %v4991_v52 }
 0x678   : > { %v2579_v20 = vadd.f32 %v2574_v13, %v4995_v40 }
 0x679   : > { %4012 = vpow2.f32 %v3737_v8  ;;  %v3738_v5 = vmul.f32 -1.442695, %v2577_v55 }
 0x67a   : > { %v3739_v17 = vmul.f32 -1.442695, %v2579_v20 }
 0x67b   : > { %4014 = vpow2.f32 %v3738_v5 }
 0x67c   : > { %4016 = vpow2.f32 %v3739_v17 }
 0x686   : > { %v4013_v22 = vpop.eup %4012 }
 0x687   : > { %v2583_v11 = vadd.f32 1.0, %v4013_v22 }
 0x688   : > { %v4015_v10 = vpop.eup %4014 }
 0x689   : > { %4018 = vrcp.f32 %v2583_v11  ;;  %v2589_v23 = vadd.f32 1.0, %v4015_v10  ;;  %v4017_v8 = vpop.eup %4016  ;;  %v6532_v11 = vld [vmem:[#allocation47_spill] sm:$0xff] }
 0x68a   : > { %4020 = vtanh.f32 %v2578_v49  ;;  %v2596_v16 = vadd.f32 1.0, %v4017_v8  ;;  %v6531_v49 = vld [vmem:[#allocation40_spill] sm:$0xff]  ;;  %v6534_v8 = vld [vmem:[#allocation49_spill] sm:$0xff] }
 0x68b   : > { %4022 = vrcp.f32 %v2589_v23  ;;  %v6533_v23 = vld [vmem:[#allocation42_spill] sm:$0xff] }
 0x68c   : > { %4024 = vrcp.f32 %v2596_v16  ;;  %v6538_v16 = vld [vmem:[#allocation53_spill] sm:$0xff] }
 0x696   : > { %v4019_v12 = vpop.eup %4018 }
 0x697   : > { %v4021_v55 = vpop.eup %4020 }
 0x698   : > { %v4023_v5 = vpop.eup %4022  ;;  %v2600_v9 = vmul.f32 %v4021_v55, %v4019_v12  ;;  %v6535_v12 = vld [vmem:[#allocation44_spill] sm:$0xff]  ;;  %v6536_v55 = vld [vmem:[#allocation51_spill] sm:$0xff] }
 0x699   : > { %v2599_v39 = vmul.f32 %v4023_v5, %v5587_v6  ;;  %v4025_v17 = vpop.eup %4024  ;;  %v6537_v5 = vld [vmem:[#allocation46_spill] sm:$0xff] }
 0x69b   : > { %v2601_v45 = vadd.f32 %v2600_v9, %v2599_v39  ;;  %v6539_v39 = vld [vmem:[#allocation48_spill] sm:$0xff]  ;;  %v6540_v9 = vld [vmem:[#allocation55_spill] sm:$0xff] }
 0x69d   : > { %2618 = vadd.xlane.f32.xlu1 %v2601_v45  ;;  %4026 = vtanh.f32 %v2601_v45  ;;  %v2615_v22 = vsel %vm2609_vm7, %v2601_v45, 0.0  ;;  %v5702_v10 = vsel %vm2609_vm7, %v2601_v45, %v5587_v6  ;;  %v3743_v6 = vld [vmem:[%s4606_s22 + $0x30] sm:$0xff]  ;;  %v6541_v45 = vld [vmem:[#allocation50_spill] sm:$0xff] }
 0x69e   : > { %3741 = vst [vmem:[%s5004_s28 + $0x28] sm:$0xff] %v2615_v22  ;;  %v6543_v22 = vld [vmem:[#allocation52_spill] sm:$0xff] }
 0x6aa   : > { %v4027_v19 = vpop.eup %4026 }
 0x6ab   : > { %v2603_v21 = vmul.f32 %v4027_v19, %v4025_v17  ;;  %v6544_v17 = vld [vmem:[#allocation59_spill] sm:$0xff]  ;;  %v6545_v19 = vld [vmem:[#allocation54_spill] sm:$0xff] }
 0x6ad   : > { %v5706_v13 = vsel %vm2609_vm7, %v2603_v21, %v5597_v14  ;;  %v2612_v20 = vsel %vm2609_vm7, %v2603_v21, 0.0  ;;  %v6529_v14 = vld [vmem:[#allocation38_spill] sm:$0xff]  ;;  %v6546_v21 = vld [vmem:[#allocation61_spill] sm:$0xff] }
 0x6ae   : > { %3740 = vst [vmem:[%s5013_s23 + $0x28] sm:$0xff] %v2612_v20  ;;  %2698 = vmatmul.mubr.f32.vlgmr.msra.gmra.mxu0 %v5706_v13  ;;  %2769 = vmatmul.mubr.f32.vlgmr.msra.gmra.mxu1 %v5706_v13  ;;  %v6547_v20 = vld [vmem:[#allocation56_spill] sm:$0xff] }
 0x6af   : > { %2803 = vmatpush1.msra.mxu0 %v5464_v42  ;;  %2874 = vmatpush1.msra.mxu1 %v5467_v38 }
 0x6b0   : > { %2804 = vmatprep.subr.mxu0 %v5470_v33  ;;  %2875 = vmatprep.subr.mxu1 %v5473_v31 }
 0x6b1   : > { %2805 = vmatpush1.msra.mxu0 %v5476_v61  ;;  %2876 = vmatpush1.msra.mxu1 %v5479_v35 }
 0x6b2   : > { %2806 = vmatprep.subr.mxu0 %v5482_v37  ;;  %2877 = vmatprep.subr.mxu1 %v5485_v50 }
 0x6b3   : > { %2807 = vmatpush1.msra.mxu0 %v5488_v47  ;;  %2878 = vmatpush1.msra.mxu1 %v5491_v43 }
 0x6b4   : > { %2808 = vmatprep.subr.mxu0 %v5494_v27  ;;  %2879 = vmatprep.subr.mxu1 %v5497_v25 }
 0x6b5   : > { %2809 = vmatpush1.msra.mxu0 %v5501_v53  ;;  %2842 = vmatprep.mubr.f32.mxu0 %v6275_v58 }
 0x6b6   : > { %2880 = vmatpush1.msra.mxu1 %v5505_v26  ;;  %2913 = vmatprep.mubr.f32.mxu1 %v6275_v58 }
 0x6b7   : > { %3744 = vmatmul.mubr.msk.f32.vlgmr.msra.gmra.mxu0 %vm693_vm2, %v3743_v6  ;;  %3745 = vmatmul.mubr.msk.f32.vlgmr.msra.gmra.mxu1 %vm693_vm2, %v3743_v6  ;;  %v6548_v6 = vld [vmem:[#allocation65_spill] sm:$0xff] }
 0x6b8   : > { %2977 = vmatprep.subr.mxu0 %v5248_v0  ;;  %3048 = vmatprep.subr.mxu1 %v5251_v54  ;;  %v6506_v0 = vld [vmem:[#allocation69_spill] sm:$0xff]  ;;  %v6507_v54 = vld [vmem:[#allocation70_spill] sm:$0xff] }
 0x6b9   : > { %2978 = vmatpush1.msra.mxu0 %v5254_v62  ;;  %3049 = vmatpush1.msra.mxu1 %v5257_v63  ;;  %v6508_v62 = vld [vmem:[#allocation71_spill] sm:$0xff]  ;;  %v6509_v63 = vld [vmem:[#allocation72_spill] sm:$0xff] }
 0x6ba   : > { %2979 = vmatprep.subr.mxu0 %v5260_v60  ;;  %3050 = vmatprep.subr.mxu1 %v5263_v59  ;;  %v6510_v60 = vld [vmem:[#allocation74_spill] sm:$0xff]  ;;  %v6511_v59 = vld [vmem:[#allocation23_spill] sm:$0xff] }
 0x6bb   : > { %2980 = vmatpush1.msra.mxu0 %v5266_v1  ;;  %3051 = vmatpush1.msra.mxu1 %v5269_v56  ;;  %v6512_v1 = vld [vmem:[#allocation27_spill] sm:$0xff]  ;;  %v6513_v56 = vld [vmem:[#allocation24_spill] sm:$0xff] }
 0x6bc   : > { %2981 = vmatprep.subr.mxu0 %v5272_v7  ;;  %3052 = vmatprep.subr.mxu1 %v5275_v30  ;;  %v6514_v7 = vld [vmem:[#allocation29_spill] sm:$0xff] }
 0x6bd   : > { %2982 = vmatpush1.msra.mxu0 %v5278_v44  ;;  %3053 = vmatpush1.msra.mxu1 %v5281_v34  ;;  %v6515_v30 = vld [vmem:[#allocation25_spill] sm:$0xff]  ;;  %v6516_v44 = vld [vmem:[#allocation31_spill] sm:$0xff]  ;;  %v6517_v34 = vld [vmem:[#allocation26_spill] sm:$0xff] }
 0x6be   : > { %2983 = vmatprep.subr.mxu0 %v5284_v24  ;;  %3054 = vmatprep.subr.mxu1 %v5287_v29  ;;  %v6518_v24 = vld [vmem:[#allocation33_spill] sm:$0xff]  ;;  %v6519_v29 = vld [vmem:[#allocation28_spill] sm:$0xff] }
 0x6bf   : > { %2984 = vmatpush1.msra.mxu0 %v5290_v28  ;;  %3055 = vmatpush1.msra.mxu1 %v5293_v57  ;;  %v6520_v28 = vld [vmem:[#allocation35_spill] sm:$0xff]  ;;  %v6521_v57 = vld [vmem:[#allocation30_spill] sm:$0xff] }
 0x6c0   : > { %2985 = vmatprep.subr.mxu0 %v5296_v46  ;;  %3056 = vmatprep.subr.mxu1 %v5299_v41  ;;  %v6522_v46 = vld [vmem:[#allocation37_spill] sm:$0xff]  ;;  %v6523_v41 = vld [vmem:[#allocation32_spill] sm:$0xff] }
 0x6c1   : > { %2986 = vmatpush1.msra.mxu0 %v5302_v36  ;;  %3057 = vmatpush1.msra.mxu1 %v5305_v32  ;;  %v6524_v36 = vld [vmem:[#allocation39_spill] sm:$0xff]  ;;  %v6525_v32 = vld [vmem:[#allocation34_spill] sm:$0xff] }
 0x6c2   : > { %2987 = vmatprep.subr.mxu0 %v5308_v2  ;;  %3058 = vmatprep.subr.mxu1 %v5311_v3  ;;  %v6526_v2 = vld [vmem:[#allocation41_spill] sm:$0xff]  ;;  %v6527_v3 = vld [vmem:[#allocation36_spill] sm:$0xff] }
 0x6c3   : > { %2988 = vmatpush1.msra.mxu0 %v5314_v4  ;;  %3059 = vmatpush1.msra.mxu1 %v6506_v0  ;;  %v6528_v4 = vld [vmem:[#allocation43_spill] sm:$0xff] }
 0x6c4   : > { %2989 = vmatprep.subr.mxu0 %v6507_v54  ;;  %3060 = vmatprep.subr.mxu1 %v6508_v62 }
 0x6c5   : > { %2990 = vmatpush1.msra.mxu0 %v6509_v63  ;;  %3061 = vmatpush1.msra.mxu1 %v6510_v60 }
 0x6c6   : > { %2991 = vmatprep.subr.mxu0 %v6511_v59  ;;  %3062 = vmatprep.subr.mxu1 %v6512_v1 }
 0x6c7   : > { %2992 = vmatpush1.msra.mxu0 %v6513_v56  ;;  %3063 = vmatpush1.msra.mxu1 %v6514_v7 }
 0x6c8   : > { %2993 = vmatprep.subr.mxu0 %v6515_v30  ;;  %3064 = vmatprep.subr.mxu1 %v6516_v44 }
 0x6c9   : > { %2994 = vmatpush1.msra.mxu0 %v6517_v34  ;;  %3065 = vmatpush1.msra.mxu1 %v6518_v24 }
 0x6ca   : > { %2995 = vmatprep.subr.mxu0 %v6519_v29  ;;  %3066 = vmatprep.subr.mxu1 %v6520_v28 }
 0x6cb   : > { %2996 = vmatpush1.msra.mxu0 %v6521_v57  ;;  %3067 = vmatpush1.msra.mxu1 %v6522_v46 }
 0x6cc   : > { %2997 = vmatprep.subr.mxu0 %v6523_v41  ;;  %3068 = vmatprep.subr.mxu1 %v6524_v36 }
 0x6cd   : > { %2998 = vmatpush1.msra.mxu0 %v6525_v32  ;;  %3069 = vmatpush1.msra.mxu1 %v6526_v2 }
 0x6ce   : > { %2999 = vmatprep.subr.mxu0 %v6527_v3  ;;  %3070 = vmatprep.subr.mxu1 %v6528_v4 }
 0x6cf   : > { %3000 = vmatpush1.msra.mxu0 %v6529_v14  ;;  %3071 = vmatpush1.msra.mxu1 %v6530_v15 }
 0x6d0   : > { %3001 = vmatprep.subr.mxu0 %v6531_v49  ;;  %3072 = vmatprep.subr.mxu1 %v6532_v11 }
 0x6d1   : > { %3002 = vmatpush1.msra.mxu0 %v6533_v23  ;;  %3073 = vmatpush1.msra.mxu1 %v6534_v8 }
 0x6d2   : > { %3003 = vmatprep.subr.mxu0 %v6535_v12  ;;  %3074 = vmatprep.subr.mxu1 %v6536_v55 }
 0x6d3   : > { %3004 = vmatpush1.msra.mxu0 %v6537_v5  ;;  %3075 = vmatpush1.msra.mxu1 %v6538_v16  ;;  %v6549_v5 = vld [vmem:[#allocation58_spill] sm:$0xff] }
 0x6d4   : > { %3005 = vmatprep.subr.mxu0 %v6539_v39  ;;  %3076 = vmatprep.subr.mxu1 %v6540_v9  ;;  %vm2953_vm11 = vcmp.eq.s32.totalorder %v6549_v5, 1 }
 0x6d5   : > { %3006 = vmatpush1.msra.mxu0 %v6541_v45  ;;  %3077 = vmatpush1.msra.mxu1 %v6542_v18 }
 0x6d6   : > { %3007 = vmatprep.subr.mxu0 %v6543_v22  ;;  %3078 = vmatprep.subr.mxu1 %v6544_v17 }
 0x6d7   : > { %3008 = vmatpush1.msra.mxu0 %v6545_v19  ;;  %3079 = vmatpush1.msra.mxu1 %v6546_v21  ;;  %v3318_v19 = vld [vmem:[#allocation8] sm:$0xff] }
 0x6d8   : > { %3041 = vmatprep.mubr.f32.mxu0 %v6275_v58  ;;  %3112 = vmatprep.mubr.f32.mxu1 %v6275_v58 }
 0x6d9   : > { %3146 = vmatprep.subr.mxu0 %v6547_v20  ;;  %3217 = vmatprep.subr.mxu1 %v6548_v6 }
 0x76e   : > { %v2699_v0 = vpop.f32.mrf.mxu0  ;;  %v2770_v54 = vpop.f32.mrf.mxu1 }
 0x770   : > { %v2701_v62 = vpop.f32.mrf.mxu0  ;;  %v2772_v60 = vpop.f32.mrf.mxu1 }
 0x777   : > { %v2844_v63 = vpop.f32.mrf.mxu0  ;;  %v2915_v7 = vpop.f32.mrf.mxu1 }
 0x778   : > { %v2845_v59 = vadd.f32 %v2844_v63, %v2699_v0  ;;  %v2916_v46 = vadd.f32 %v2915_v7, %v2770_v54 }
 0x779   : > { %v2846_v1 = vpop.f32.mrf.mxu0  ;;  %v2917_v29 = vpop.f32.mrf.mxu1 }
 0x77a   : > { %v2920_v56 = vadd.f32 %v2845_v59, %v4989_v48  ;;  %v2847_v30 = vadd.f32 %v2846_v1, %v2701_v62  ;;  %v2918_v28 = vadd.f32 %v2917_v29, %v2772_v60  ;;  %v2922_v32 = vadd.f32 %v2916_v46, %v4998_v51 }
 0x77c   : > { %v3746_v44 = vmul.f32 -1.442695, %v2920_v56  ;;  %v2921_v34 = vadd.f32 %v2847_v30, %v4991_v52  ;;  %v2923_v57 = vadd.f32 %v2918_v28, %v4995_v40 }
 0x77e   : > { %4028 = vpow2.f32 %v3746_v44  ;;  %v3747_v24 = vmul.f32 -1.442695, %v2921_v34  ;;  %v3748_v41 = vmul.f32 -1.442695, %v2923_v57 }
 0x780   : > { %4030 = vpow2.f32 %v3747_v24 }
 0x781   : > { %4032 = vpow2.f32 %v3748_v41 }
 0x78b   : > { %v4029_v36 = vpop.eup %4028 }
 0x78c   : > { %v2927_v2 = vadd.f32 1.0, %v4029_v36 }
 0x78d   : > { %v4031_v3 = vpop.eup %4030 }
 0x78e   : > { %4034 = vrcp.f32 %v2927_v2  ;;  %v2933_v4 = vadd.f32 1.0, %v4031_v3  ;;  %v4033_v14 = vpop.eup %4032 }
 0x78f   : > { %4036 = vtanh.f32 %v2922_v32  ;;  %v2940_v23 = vadd.f32 1.0, %v4033_v14 }
 0x790   : > { %4038 = vrcp.f32 %v2933_v4 }
 0x791   : > { %4040 = vrcp.f32 %v2940_v23  ;;  %v6551_v23 = vld [vmem:[#allocation63_spill] sm:$0xff] }
 0x792   : > { %vm1244_vm13 = vcmp.ne.f32.partialorder %v6551_v23, 0.0 }
 0x793   : > { %vm1245_vm15 = vmand %vm1228_vm1, %vm1244_vm13 }
 0x79b   : > { %v4035_v15 = vpop.eup %4034 }
 0x79c   : > { %v4037_v49 = vpop.eup %4036 }
 0x79d   : > { %v4039_v11 = vpop.eup %4038  ;;  %v2944_v12 = vmul.f32 %v4037_v49, %v4035_v15  ;;  %v6550_v49 = vld [vmem:[#allocation67_spill] sm:$0xff] }
 0x79e   : > { %v2943_v8 = vmul.f32 %v4039_v11, %v5702_v10  ;;  %v4041_v9 = vpop.eup %4040  ;;  %vm3297_vm12 = vcmp.eq.s32.totalorder %v6550_v49, 1  ;;  %v2619_v11 = vpop.xlane.xlu1 %2618 }
 0x79f   : > { %vm2620_vm14 = vcmp.ne.f32.partialorder %v2619_v11, 0.0 }
 0x7a0   : > { %v2945_v55 = vadd.f32 %v2944_v12, %v2943_v8  ;;  %v2275_v8 = vpop.xlane.xlu0 %2274  ;;  %vm2621_vm9 = vmand %vm2604_vm8, %vm2620_vm14 }
 0x7a1   : > { %vm2276_vm0 = vcmp.ne.f32.partialorder %v2275_v8, 0.0 }
 0x7a2   : > { %2962 = vadd.xlane.f32.xlu1 %v2945_v55  ;;  %4042 = vtanh.f32 %v2945_v55  ;;  %v2959_v16 = vsel %vm2953_vm11, %v2945_v55, 0.0  ;;  %v5805_v39 = vsel %vm2953_vm11, %v2945_v55, %v5702_v10  ;;  %v3320_v10 = vld [vmem:[#allocation8 + $0x10] sm:$0xff]  ;;  %vm2277_vm10 = vmand %vm2260_vm3, %vm2276_vm0 }
 0x7a3   : > { %3750 = vst [vmem:[%s5004_s28 + $0x30] sm:$0xff] %v2959_v16 }
 0x7af   : > { %v4043_v45 = vpop.eup %4042 }
 0x7b0   : > { %v2947_v18 = vmul.f32 %v4043_v45, %v4041_v9 }
 0x7b2   : > { %v5809_v22 = vsel %vm2953_vm11, %v2947_v18, %v5706_v13  ;;  %v2956_v17 = vsel %vm2953_vm11, %v2947_v18, 0.0  ;;  %v3319_v13 = vld [vmem:[#allocation8 + $0x8] sm:$0xff]  ;;  %v3706_v18 = vsel %vm1245_vm15, 1.0, %v6275_v58 }
 0x7b3   : > { %3749 = vst [vmem:[%s5013_s23 + $0x30] sm:$0xff] %v2956_v17  ;;  %3042 = vmatmul.mubr.f32.vlgmr.msra.gmra.mxu0 %v5809_v22  ;;  %3113 = vmatmul.mubr.f32.vlgmr.msra.gmra.mxu1 %v5809_v22  ;;  %v3733_v17 = vsel %vm2277_vm10, 1.0, %v6275_v58 }
 0x7b4   : > { %3147 = vmatpush1.msra.mxu0 %v5464_v42  ;;  %3218 = vmatpush1.msra.mxu1 %v5467_v38  ;;  %v3752_v42 = vld [vmem:[%s4606_s22 + $0x38] sm:$0xff]  ;;  %s5897_s22 = scalar_lea.sflag [#allocation12], %s3420_s2 }
 0x7b5   : > { %3148 = vmatprep.subr.mxu0 %v5470_v33  ;;  %3219 = vmatprep.subr.mxu1 %v5473_v31  ;;  %v3333_v38 = vld [vmem:[#allocation8 + $0x78] sm:$0xff]  ;;  %v3332_v33 = vld [vmem:[#allocation8 + $0x70] sm:$0xff]  ;;  %v3331_v31 = vld [vmem:[#allocation8 + $0x68] sm:$0xff] }
 0x7b6   : > { %3149 = vmatpush1.msra.mxu0 %v5476_v61  ;;  %3220 = vmatpush1.msra.mxu1 %v5479_v35  ;;  %v3330_v61 = vld [vmem:[#allocation8 + $0x60] sm:$0xff]  ;;  %v3329_v35 = vld [vmem:[#allocation8 + $0x58] sm:$0xff] }
 0x7b7   : > { %3150 = vmatprep.subr.mxu0 %v5482_v37  ;;  %3221 = vmatprep.subr.mxu1 %v5485_v50  ;;  %v3328_v37 = vld [vmem:[#allocation8 + $0x50] sm:$0xff]  ;;  %v3327_v50 = vld [vmem:[#allocation8 + $0x48] sm:$0xff] }
 0x7b8   : > { %3151 = vmatpush1.msra.mxu0 %v5488_v47  ;;  %3222 = vmatpush1.msra.mxu1 %v5491_v43  ;;  %v3326_v47 = vld [vmem:[#allocation8 + $0x40] sm:$0xff]  ;;  %v3325_v43 = vld [vmem:[#allocation8 + $0x38] sm:$0xff] }
 0x7b9   : > { %3152 = vmatprep.subr.mxu0 %v5494_v27  ;;  %3223 = vmatprep.subr.mxu1 %v5497_v25  ;;  %v3324_v27 = vld [vmem:[#allocation8 + $0x30] sm:$0xff]  ;;  %v3323_v25 = vld [vmem:[#allocation8 + $0x28] sm:$0xff] }
 0x7ba   : > { %3153 = vmatpush1.msra.mxu0 %v5501_v53  ;;  %3186 = vmatprep.mubr.f32.mxu0 %v6275_v58  ;;  %v3322_v53 = vld [vmem:[#allocation8 + $0x20] sm:$0xff] }
 0x7bb   : > { %3224 = vmatpush1.msra.mxu1 %v5505_v26  ;;  %3257 = vmatprep.mubr.f32.mxu1 %v6275_v58  ;;  %v3321_v26 = vld [vmem:[#allocation8 + $0x18] sm:$0xff] }
 0x7bc   : > { %3753 = vmatmul.mubr.msk.f32.vlgmr.msra.gmra.mxu0 %vm693_vm2, %v3752_v42  ;;  %3754 = vmatmul.mubr.msk.f32.vlgmr.msra.gmra.mxu1 %vm693_vm2, %v3752_v42  ;;  %vm4389_vm2 = vmmov 0  }
 0x7bd   : > { %3787 = vmatprep.subr.mxu0 %v6275_v58  ;;  %3819 = vmatprep.mubr.msk.f32.mxu0 %vm4389_vm2, %v6275_v58 }
 0x7be   : > { %3788 = vmatpush3.msra.mxu0 %v3333_v38 }
 0x7bf   : > { %3789 = vmatprep.subr.mxu0 %v6275_v58 }
 0x7c0   : > { %3790 = vmatpush3.msra.mxu0 %v3332_v33 }
 0x7c1   : > { %3791 = vmatprep.subr.mxu0 %v6275_v58 }
 0x7c2   : > { %3792 = vmatpush3.msra.mxu0 %v3331_v31 }
 0x7c3   : > { %3793 = vmatprep.subr.mxu0 %v6275_v58 }
 0x7c4   : > { %3794 = vmatpush3.msra.mxu0 %v3330_v61 }
 0x7c5   : > { %3795 = vmatprep.subr.mxu0 %v6275_v58 }
 0x7c6   : > { %3796 = vmatpush3.msra.mxu0 %v3329_v35 }
 0x7c7   : > { %3797 = vmatprep.subr.mxu0 %v6275_v58 }
 0x7c8   : > { %3798 = vmatpush3.msra.mxu0 %v3328_v37 }
 0x7c9   : > { %3799 = vmatprep.subr.mxu0 %v6275_v58 }
 0x7ca   : > { %3800 = vmatpush3.msra.mxu0 %v3327_v50 }
 0x7cb   : > { %3801 = vmatprep.subr.mxu0 %v6275_v58 }
 0x7cc   : > { %3802 = vmatpush3.msra.mxu0 %v3326_v47 }
 0x7cd   : > { %3803 = vmatprep.subr.mxu0 %v6275_v58 }
 0x7ce   : > { %3804 = vmatpush3.msra.mxu0 %v3325_v43 }
 0x7cf   : > { %3805 = vmatprep.subr.mxu0 %v6275_v58 }
 0x7d0   : > { %3806 = vmatpush3.msra.mxu0 %v3324_v27 }
 0x7d1   : > { %3807 = vmatprep.subr.mxu0 %v6275_v58 }
 0x7d2   : > { %3808 = vmatpush3.msra.mxu0 %v3323_v25 }
 0x7d3   : > { %3809 = vmatprep.subr.mxu0 %v6275_v58 }
 0x7d4   : > { %3810 = vmatpush3.msra.mxu0 %v3322_v53 }
 0x7d5   : > { %3811 = vmatprep.subr.mxu0 %v6275_v58 }
 0x7d6   : > { %3812 = vmatpush3.msra.mxu0 %v3321_v26 }
 0x7d7   : > { %3813 = vmatprep.subr.mxu0 %v6275_v58 }
 0x7d8   : > { %3814 = vmatpush3.msra.mxu0 %v3320_v10 }
 0x7d9   : > { %3815 = vmatprep.subr.mxu0 %v6275_v58 }
 0x7da   : > { %3816 = vmatpush3.msra.mxu0 %v3319_v13 }
 0x7db   : > { %3817 = vmatprep.subr.mxu0 %v6275_v58 }
 0x7dc   : > { %3818 = vmatpush3.msra.mxu0 %v3318_v19 }
 0x82b   : > { %v2963_v38 = vpop.xlane.xlu1 %2962 }
 0x82c   : > { %vm2964_vm1 = vcmp.ne.f32.partialorder %v2963_v38, 0.0 }
 0x82d   : > { %vm2965_vm3 = vmand %vm2948_vm4, %vm2964_vm1 }
 0x82e   : > { %v3751_v33 = vsel %vm2965_vm3, 1.0, %v6275_v58 }
 0x873   : > { %v3043_v21 = vpop.f32.mrf.mxu0  ;;  %v3114_v20 = vpop.f32.mrf.mxu1 }
 0x875   : > { %v3045_v6 = vpop.f32.mrf.mxu0  ;;  %v3116_v54 = vpop.f32.mrf.mxu1 }
 0x87c   : > { %v3188_v0 = vpop.f32.mrf.mxu0  ;;  %v3259_v59 = vpop.f32.mrf.mxu1 }
 0x87d   : > { %v3189_v62 = vadd.f32 %v3188_v0, %v3043_v21  ;;  %v3260_v29 = vadd.f32 %v3259_v59, %v3114_v20 }
 0x87e   : > { %v3190_v63 = vpop.f32.mrf.mxu0  ;;  %v3261_v44 = vpop.f32.mrf.mxu1 }
 0x87f   : > { %v3264_v60 = vadd.f32 %v3189_v62, %v4989_v48  ;;  %v3191_v1 = vadd.f32 %v3190_v63, %v3045_v6  ;;  %v3262_v34 = vadd.f32 %v3261_v44, %v3116_v54  ;;  %v3266_v46 = vadd.f32 %v3260_v29, %v4998_v51 }
 0x881   : > { %v3755_v56 = vmul.f32 -1.442695, %v3264_v60  ;;  %v3265_v7 = vadd.f32 %v3191_v1, %v4991_v52  ;;  %v3267_v24 = vadd.f32 %v3262_v34, %v4995_v40 }
 0x883   : > { %4044 = vpow2.f32 %v3755_v56  ;;  %v3756_v30 = vmul.f32 -1.442695, %v3265_v7  ;;  %v3757_v28 = vmul.f32 -1.442695, %v3267_v24 }
 0x885   : > { %4046 = vpow2.f32 %v3756_v30 }
 0x886   : > { %4048 = vpow2.f32 %v3757_v28 }
 0x890   : > { %v4045_v57 = vpop.eup %4044 }
 0x891   : > { %v3271_v41 = vadd.f32 1.0, %v4045_v57 }
 0x892   : > { %v4047_v36 = vpop.eup %4046 }
 0x893   : > { %4050 = vrcp.f32 %v3271_v41  ;;  %v3277_v48 = vadd.f32 1.0, %v4047_v36  ;;  %v4049_v52 = vpop.eup %4048 }
 0x894   : > { %4052 = vtanh.f32 %v3266_v46  ;;  %v3284_v4 = vadd.f32 1.0, %v4049_v52 }
 0x895   : > { %4054 = vrcp.f32 %v3277_v48 }
 0x896   : > { %4056 = vrcp.f32 %v3284_v4 }
 0x8a0   : > { %v4051_v32 = vpop.eup %4050 }
 0x8a1   : > { %v4053_v2 = vpop.eup %4052 }
 0x8a2   : > { %v4055_v3 = vpop.eup %4054  ;;  %v3288_v14 = vmul.f32 %v4053_v2, %v4051_v32 }
 0x8a3   : > { %v3287_v40 = vmul.f32 %v4055_v3, %v5805_v39  ;;  %v4057_v12 = vpop.eup %4056  ;;  %v3742_v39 = vsel %vm2621_vm9, 1.0, %v6275_v58 }
 0x8a4   : > { %v3922_v42 = vpack.i.bf16 %v3742_v39, %v3733_v17 }
 0x8a5   : > { %v3289_v15 = vadd.f32 %v3288_v14, %v3287_v40 }
 0x8a7   : > { %3305 = vadd.xlane.f32.xlu1 %v3289_v15  ;;  %4058 = vtanh.f32 %v3289_v15  ;;  %v3302_v51 = vsel %vm3297_vm12, %v3289_v15, 0.0 }
 0x8a8   : > { %3759 = vst [vmem:[%s5004_s28 + $0x38] sm:$0xff] %v3302_v51 }
 0x8b4   : > { %v4059_v5 = vpop.eup %4058 }
 0x8b5   : > { %v3291_v16 = vmul.f32 %v4059_v5, %v4057_v12 }
 0x8b7   : > { %v3298_v9 = vsel %vm3297_vm12, %v3291_v16, %v5809_v22  ;;  %v3299_v45 = vsel %vm3297_vm12, %v3291_v16, 0.0 }
 0x8b8   : > { %3758 = vst [vmem:[%s5013_s23 + $0x38] sm:$0xff] %v3299_v45  ;;  %3820 = vmatmul.mubr.f32.vlgmr.msra.gmra.mxu0 %v3298_v9  ;;  %1251 = vperm.xlu1 %3921, %v3706_v18  }
 0x8bc   : > { %3923 = vperm.xlu1 %3921, %v3922_v42  }
 0x930   : > { %v3306_v22 = vpop.xlane.xlu1 %3305 }
 0x931   : > { %vm3307_vm8 = vcmp.ne.f32.partialorder %v3306_v22, 0.0 }
 0x932   : > { %vm3308_vm6 = vmand %vm3292_vm5, %vm3307_vm8 }
 0x933   : > { %v3760_v31 = vsel %vm3308_vm6, 1.0, %v6275_v58 }
 0x934   : > { %v3927_v61 = vpack.i.bf16 %v3760_v31, %v3751_v33 }
 0x936   : > { %3928 = vperm.xlu0 %3920, %v3927_v61  }
 0x937   : > { %4261 = shalt.err (!%p4258_p2)
}
 0x938   : > { %s4262_s17 = scalar_lea.hbm %s5895_s3, 1024  ;;  %s4266_s23 = scalar_lea.hbm %s6009_s8, 2048 }
 0x939   : > { %p4263_p6 = scmp.ne.s32.totalorder %s5895_s3, %s4262_s17  ;;  %p4267_p1 = scmp.lt.s32.totalorder %s5895_s3, %s6009_s8 }
 0x93a   : > { %p4268_p5 = scmp.lt.s32.totalorder %s4266_s23, %s4262_s17 }
 0x93b   : > { %p4264_p13 = pnand %p4263_p6, %p6553_p11 }
 0x93c   : > { %p4269_p3 = por %p4268_p5, %p4267_p1 }
 0x93d   : > { %p4265_p8 = pneg %p4264_p13 }
 0x93f   : > { %p4270_p4 = pnand %p4269_p3, %p4265_p8 }
 0x941   : > { %4273 = shalt.err (!%p4270_p4)
}
 0x942   : > { %s4391_s21 = smov 128   ;;  %s4392_s24 = smov 256  }
 0x943   : > { %s4393_s27 = smov 8   ;;  %s5927_s17 = scalar_lea.hbm %s6008_s7, %s5889_s29 }
 0x944   : > { %3837 = dma.vmem_to_hbm [thread:$0]  (%p6553_p11), %s5881_s26, 1024, %s5895_s3, %s5897_s22, %s4391_s21, %s4392_s24, %s4393_s27  }
 0x945   : > { %s3416_s30 = scalar_lea.sflag [#allocation4], %s4599_s11  ;;  %s4274_s28 = scalar_lea.vmem %s5883_s18, 1024 }
 0x946   : > { %p4275_p9 = scmp.ne.s32.totalorder %s5883_s18, %s4274_s28  ;;  %s4394_s23 = smov [#allocation10]  }
 0x947   : > { %s4278_s2 = sshll.u32 %s4394_s23, 4  ;;  %s4279_s2 = int_to_ptr.vmem [resolvable:$false] %s4278_s2 }
 0x948   : > { %p4276_p12 = pnand %p4275_p9, %p6553_p11  ;;  %s4280_s10 = scalar_lea.vmem %s4279_s2, 2048 }
 0x949   : > { %p4281_p7 = scmp.lt.s32.totalorder %s5883_s18, %s4279_s2  ;;  %p4282_p10 = scmp.lt.s32.totalorder %s4280_s10, %s4274_s28 }
 0x94a   : > { %p4277_p0 = pneg %p4276_p12 }
 0x94b   : > { %p4283_p2 = por %p4282_p10, %p4281_p7 }
 0x94d   : > { %p4284_p6 = pnand %p4283_p2, %p4277_p0 }
 0x94f   : > { %4287 = shalt.err (!%p4284_p6)
}
 0x950   : > { %s4288_s26 = scalar_lea.hbm %s5927_s17, 1024  ;;  %s4292_s12 = scalar_lea.hbm %s6008_s7, 2048 }
 0x951   : > { %p4289_p13 = scmp.ne.s32.totalorder %s5927_s17, %s4288_s26  ;;  %p4293_p5 = scmp.lt.s32.totalorder %s5927_s17, %s6008_s7 }
 0x952   : > { %p4294_p3 = scmp.lt.s32.totalorder %s4292_s12, %s4288_s26 }
 0x953   : > { %p4290_p8 = pnand %p4289_p13, %p6553_p11 }
 0x954   : > { %p4295_p4 = por %p4294_p3, %p4293_p5 }
 0x955   : > { %p4291_p1 = pneg %p4290_p8 }
 0x957   : > { %p4296_p9 = pnand %p4295_p4, %p4291_p1 }
 0x959   : > { %4299 = shalt.err (!%p4296_p9)
}
 0x95a   : > { %3836 = dma.vmem_to_hbm [thread:$0]  (%p6553_p11), %s5883_s18, 1024, %s5927_s17, %s3416_s30, %s4391_s21, %s4392_s24, %s4393_s27  }
 0x95b   : > { %v3761_v58 = vld [vmem:[%s6007_s6] ss:$0 sm:$0xff]  ;;  %s3687_s19 = sshll.u32 %s4599_s11, 3  ;;  %s3471_s12 = scalar_lea.hbm %s6010_s9, %s5889_s29 }
 0x95c   : > { %s451_s10 = scalar_lea.vmem [#allocation13], %s3687_s19  ;;  %s4395_s18 = smov [#allocation13]  }
 0x95d   : > { %s3473_s26 = sshll.u32 %s451_s10, 4  ;;  %s4304_s21 = sshll.u32 %s4395_s18, 4  ;;  %s3474_s26 = int_to_ptr.vmem [resolvable:$true] %s3473_s26  ;;  %s4305_s21 = int_to_ptr.vmem [resolvable:$false] %s4304_s21 }
 0x95e   : > { %s4300_s23 = scalar_lea.vmem %s3474_s26, 128  ;;  %s4306_s24 = scalar_lea.vmem %s4305_s21, 256 }
 0x95f   : > { %p4301_p12 = scmp.ne.s32.totalorder %s3474_s26, %s4300_s23  ;;  %p4307_p10 = scmp.lt.s32.totalorder %s3474_s26, %s4305_s21 }
 0x960   : > { %p4308_p2 = scmp.lt.s32.totalorder %s4306_s24, %s4300_s23 }
 0x961   : > { %p4302_p0 = pnand %p4301_p12, %p6553_p11 }
 0x962   : > { %p4309_p6 = por %p4308_p2, %p4307_p10 }
 0x963   : > { %p4303_p7 = pneg %p4302_p0 }
 0x965   : > { %p4310_p13 = pnand %p4309_p6, %p4303_p7 }
 0x978   : > { %v3407_v35 = vpop.f32.mrf.mxu0 }
 0x979   : > { %v3408_v37 = vadd.f32 %v3761_v58, %v3407_v35 }
 0x97a   : > { %v3821_v50 = vpop.f32.mrf.mxu0 }
 0x97b   : > { %4060 = vtanh.f32 %v3408_v37 }
 0x988   : > { %v4061_v47 = vpop.eup %4060 }
 0x989   : > { %3412 = vst [vmem:[%s451_s10] sm:$0xff] %v4061_v47 }
 0x98a   : > { %4313 = shalt.err (!%p4310_p13)
}
 0x98b   : > { %s4314_s11 = scalar_lea.hbm %s3471_s12, 128  ;;  %s4318_s17 = scalar_lea.hbm %s6010_s9, 256 }
 0x98c   : > { %p4315_p8 = scmp.ne.s32.totalorder %s3471_s12, %s4314_s11  ;;  %p4319_p3 = scmp.lt.s32.totalorder %s3471_s12, %s6010_s9 }
 0x98d   : > { %p4320_p4 = scmp.lt.s32.totalorder %s4318_s17, %s4314_s11 }
 0x98e   : > { %p4316_p1 = pnand %p4315_p8, %p6553_p11 }
 0x98f   : > { %p4321_p9 = por %p4320_p4, %p4319_p3 }
 0x990   : > { %p4317_p5 = pneg %p4316_p1 }
 0x992   : > { %p4322_p12 = pnand %p4321_p9, %p4317_p5 }
 0x994   : > { %4325 = shalt.err (!%p4322_p12)
}
 0x995   : > { %3838 = dma.vmem_to_hbm [thread:$0]  (%p6553_p11), %s3474_s26, 128, %s3471_s12, %s5897_s22   ;;  %v6554_v43 = vlaneseq  ;;  %v1252_v25 = vpop.permute.xlu1 %1251  ;;  %v1596_v53 = vpop.permute.xlu0 %1595  ;;  %v6555_v26 = vld [vmem:[#allocation60_spill] sm:$0xff]  ;;  %vm3413_vm15 = vcmask 64512  }
 0x996   : > { %s6556_s25 = sshll.u32 %s4748_s13, 3  ;;  %s6557_s19 = sld [smem:[#allocation77_spill]] }
 0x997   : > { %v549_v27 = vand.u32 127, %v6554_v43 }
 0x999   : > { %vm902_vm4 = vcmp.eq.s32.totalorder %v549_v27, 0  ;;  %vm1246_vm5 = vcmp.eq.s32.totalorder %v549_v27, 1  ;;  %vm1590_vm7 = vcmp.eq.s32.totalorder %v549_v27, 2  ;;  %v3924_v19 = vpop.permute.xlu1 %3923  ;;  %vm1934_vm11 = vcmp.eq.s32.totalorder %v549_v27, 3  ;;  %v1940_v6 = vpop.permute.xlu0 %1939 }
 0x99a   : > { %v910_v10 = vsel %vm902_vm4, %v6555_v26, 0.0  ;;  %v3925_v20 = vunpack.i.l.bf16 %v3924_v19  ;;  %vm2278_vm2 = vcmp.eq.s32.totalorder %v549_v27, 4  ;;  %v3926_v54 = vunpack.i.h.bf16 %v3924_v19 }
 0x99b   : > { %v1254_v13 = vsel %vm1246_vm5, %v1252_v25, %v910_v10  ;;  %vm2622_vm12 = vcmp.eq.s32.totalorder %v549_v27, 5  ;;  %vm2966_vm13 = vcmp.eq.s32.totalorder %v549_v27, 6  ;;  %vm3309_vm14 = vcmp.eq.s32.totalorder %v549_v27, 7 }
 0x99c   : > { %v1598_v21 = vsel %vm1590_vm7, %v1596_v53, %v1254_v13  ;;  %s465_s10 = scalar_lea.vmem %s6557_s19, %s6556_s25 }
 0x99d   : > { %v1942_v0 = vsel %vm1934_vm11, %v1940_v6, %v1598_v21 }
 0x99e   : > { %v2286_v62 = vsel %vm2278_vm2, %v3925_v20, %v1942_v0 }
 0x99f   : > { %v2630_v1 = vsel %vm2622_vm12, %v3926_v54, %v2286_v62 }
 0x9b1   : > { %v3929_v63 = vpop.permute.xlu0 %3928 }
 0x9b2   : > { %v3931_v60 = vunpack.i.h.bf16 %v3929_v63  ;;  %v3930_v59 = vunpack.i.l.bf16 %v3929_v63 }
 0x9b4   : > { %v2974_v56 = vsel %vm2966_vm13, %v3930_v59, %v2630_v1 }
 0x9b5   : > { %v3317_v7 = vsel %vm3309_vm14, %v3931_v60, %v2974_v56 }
 0x9b6   : > { %3414 = vst.msk [vmem:[%s465_s10] sm:$0xff] %vm3413_vm15, %v3317_v7 }
 0x9b7 PF: > { %s6558_s26 = sld [smem:[#allocation19_spill]]  ;;  %p6561_p0 = scmp.ge.s32.totalorder %s4376_s16, 2 }
 0x9b8   : > { %s6559_s3 = sld [smem:[#allocation22_spill]] }
 0x9bd   : > { %s3488_s20 = sand.u32 1, %s6558_s26  }
 0x9be   : > { %p6560_p11 = scmp.ne.s32.totalorder %s6559_s3, 0  ;;  %s3489_s12 = scalar_lea.sflag [#allocation4], %s3488_s20 }
 0x9c0   : > { %p3857_p7 = pnand %p6561_p0, %p6560_p11 }
 0x9c2   : > { %p3858_p10 = pneg %p3857_p7 }
 0x9c4   : > { %4355 = dma.done.wait (%p3858_p10), %s3489_s12, 1024  }
 0x9c5   : > { %4357 = vsyncadd (%p3858_p10), %s3489_s12, 4294966272  ;;  %s6562_s13 = sadd.s32 4294967294, %s4376_s16  }
 0x9c6   : > { %s3497_s23 = sand.u32 1, %s6562_s13  }
 0x9c7   : > { %s3498_s18 = scalar_lea.sflag [#allocation12], %s3497_s23 }
 0x9c8   : > { %4359 = dma.done.wait (%p3858_p10), %s3498_s18, 1152  }
 0x9c9   : > { %4361 = vsyncadd (%p3858_p10), %s3498_s18, 4294966144  ;;  %s6563_s16 = sld [smem:[#allocation20_spill]]  ;;  %s6565_s13 = smov %s4368_s14 }
 0x9ca   : > { %s6564_s21 = sld [smem:[#allocation21_spill]]  ;;  %s6566_s14 = smov %s4372_s15 }
 0x9cf   : > { %p29_p2 = scmp.ge.s32.totalorder %s6563_s16, 4  }
 0x9d0   : > { %s6567_s15 = smov %s6564_s21 }
 0x9d1   :  { %31 = sbr.rel (!%p29_p2) target bundleno = 13 (0xd), region = 173 }
 0x9d6   :  { %3519 = vsyncpa [#allocation3], 1 }
 0x9d7   :  { %3521 = vsyncpa [#allocation3 + $0x1], 1 }
 0x9d8   :  { %3522 = vsyncpa [#allocation6], 1 }
 0x9d9   :  { %3523 = vsyncpa [#allocation9], 1 }
 0x9da   :  { %3524 = vsyncpa [#allocation4], 1 }
 0x9db   :  { %3526 = vsyncpa [#allocation4 + $0x1], 1 }
 0x9dc   :  { %3527 = vsyncpa [#allocation12], 1 }
 0x9dd   :  { %3529 = vsyncpa [#allocation12 + $0x1], 1 }

</bundles_post_ra>
